<compile_context>
chip_gen: v7x
topology: tpu7x:2x2x1
jax: 0.10.0
libtpu: 0.0.40
codegen_flags: <defaults>
</compile_context>

<pallas_src>
import math
from functools import partial

import jax
import jax.numpy as jnp
from jax.experimental import pallas as pl
from jax.experimental.pallas import tpu as pltpu

LN_EPS = 1e-12


# ----------------------------- kernel helpers -----------------------------

def _gelu(x):
    # tanh-approximate GELU (VPU + EUP).
    # TODO(synk): HF BERT defaults to the exact erf GELU; tanh approx differs slightly.
    c = math.sqrt(2.0 / math.pi)
    return 0.5 * x * (1.0 + jnp.tanh(c * (x + 0.044715 * x * x * x)))


def _layernorm(x, g, b):
    mu = jnp.mean(x, axis=-1, keepdims=True)
    var = jnp.mean((x - mu) ** 2, axis=-1, keepdims=True)
    return (x - mu) * jax.lax.rsqrt(var + LN_EPS) * g + b


# ------------------------------- fused kernel -------------------------------

def bert_stack_kernel(emb_ref, mask_ref, embg_ref, embb_ref,
                      wqkv_ref, bqkv_ref, wo_ref, bo_ref,
                      ln1g_ref, ln1b_ref, w1_ref, b1_ref,
                      w2_ref, b2_ref, ln2g_ref, ln2b_ref,
                      poolw_ref, poolb_ref,
                      pooled_ref, x_scr, ctx_scr, *, num_heads):
    """One grid step = (batch tile, encoder layer l)."""
    l = pl.program_id(1)
    n_layers = pl.num_programs(1)

    Bt, S, H = emb_ref.shape
    M = Bt * S
    dh = H // num_heads
    scale = 1.0 / math.sqrt(dh)

    # Fused embedding LayerNorm at the first layer step; the activation then
    # lives in VMEM scratch for the whole layer stack.
    @pl.when(l == 0)
    def _():
        e = emb_ref[...].astype(jnp.float32).reshape(M, H)
        x_scr[...] = _layernorm(e, embg_ref[...], embb_ref[...])

    x = x_scr[...]                       # (M, H) f32
    xb = x.astype(jnp.bfloat16)

    # Fused QKV projection: one (M,H)x(H,3H) bf16 matmul, f32 accumulation.
    qkv = jnp.dot(xb, wqkv_ref[...], preferred_element_type=jnp.float32) + bqkv_ref[...]

    # Cast once (no per-head casts); fold the softmax scale into q.
    q = (qkv[:, 0:H] * scale).astype(jnp.bfloat16).reshape(Bt, S, H)
    k = qkv[:, H:2 * H].astype(jnp.bfloat16).reshape(Bt, S, H)
    v = qkv[:, 2 * H:3 * H].astype(jnp.bfloat16).reshape(Bt, S, H)

    # Hoist the additive-mask broadcast out of the head loop.
    amask = jnp.broadcast_to(mask_ref[...], (Bt, S, S))      # (Bt, S, S) f32

    # Per-head attention; each head's context is written into a bf16 VMEM
    # buffer so the output projection is a single full-K matmul afterwards.
    # TODO(synk): switch to a head-pair loop (128-lane-aligned slices) or
    # lax.fori_loop to bound live ranges for 12-head BERT-base configs.
    for h in range(num_heads):
        lo = h * dh
        s = jnp.einsum('bqd,bkd->bqk', q[:, :, lo:lo + dh], k[:, :, lo:lo + dh],
                       preferred_element_type=jnp.float32) + amask
        s = s - jnp.max(s, axis=-1, keepdims=True)
        p = jnp.exp(s)
        p = p * pl.reciprocal(jnp.sum(p, axis=-1, keepdims=True), approx=True)
        ctx = jnp.einsum('bqk,bkd->bqd', p.astype(jnp.bfloat16), v[:, :, lo:lo + dh],
                         preferred_element_type=jnp.float32)
        ctx_scr[:, :, lo:lo + dh] = ctx.astype(jnp.bfloat16)

    # Single full-K output projection (M, H) x (H, H).
    attn = jnp.dot(ctx_scr[...].reshape(M, H), wo_ref[...],
                   preferred_element_type=jnp.float32) + bo_ref[...]

    x1 = _layernorm(x + attn, ln1g_ref[...], ln1b_ref[...])

    hmid = _gelu(jnp.dot(x1.astype(jnp.bfloat16), w1_ref[...],
                         preferred_element_type=jnp.float32) + b1_ref[...])
    ffn = jnp.dot(hmid.astype(jnp.bfloat16), w2_ref[...],
                  preferred_element_type=jnp.float32) + b2_ref[...]
    x2 = _layernorm(x1 + ffn, ln2g_ref[...], ln2b_ref[...])

    x_scr[...] = x2

    # Fused pooler at the last layer: pooled = tanh(CLS @ W + b).  Only the
    # (Bt, H) pooled block ever goes back to HBM.
    @pl.when(l == n_layers - 1)
    def _():
        cls = jnp.concatenate([x2[b * S:b * S + 1, :] for b in range(Bt)], axis=0)
        pooled = jnp.tanh(
            jnp.dot(cls.astype(jnp.bfloat16), poolw_ref[...],
                    preferred_element_type=jnp.float32) + poolb_ref[...])
        pooled_ref[...] = pooled.reshape(Bt, 1, H)


# ------------------------------- wrapper -------------------------------------

def _vmem_limit_bytes():
    """Generation-aware VMEM budget: ~96 MiB on 128-MiB parts (v5e/v6e),
    ~85% of physical on 64-MiB parts (v7x)."""
    try:
        cap = getattr(pltpu.get_tpu_info(), "vmem_capacity_bytes", 128 * 1024 * 1024)
    except Exception:
        cap = 128 * 1024 * 1024
    return max(32 * 1024 * 1024, min(96 * 1024 * 1024, int(cap * 0.85)))


def _pick_batch_tile(B, max_bt=8):
    bt = min(B, max_bt)
    while B % bt:
        bt -= 1
    return bt


def bert_encoder_pallas(emb, add_mask, p, num_heads, batch_tile=8):
    """emb: (B, S, H) pre-LN embeddings (bf16 ok); add_mask: (B, 1, S) additive mask.
    Returns the pooled CLS output (B, H)."""
    B, S, H = emb.shape
    L = p["wqkv"].shape[0]
    I = p["w1"].shape[-1]

    Bt = _pick_batch_tile(B, batch_tile)
    n_tiles = B // Bt

    def batch_spec(shape3):
        return pl.BlockSpec(shape3, lambda b, l: (b, 0, 0))

    def layer_spec(r, c):
        return pl.BlockSpec((None, r, c), lambda b, l: (l, 0, 0))

    def const_spec(r, c):
        return pl.BlockSpec((r, c), lambda b, l: (0, 0))

    in_specs = [
        batch_spec((Bt, S, H)),                        # embeddings (pre-LN, bf16)
        batch_spec((Bt, 1, S)),                        # additive attention mask
        const_spec(1, H), const_spec(1, H),            # embedding LN gamma / beta
        layer_spec(H, 3 * H), layer_spec(1, 3 * H),    # fused QKV weight / bias
        layer_spec(H, H), layer_spec(1, H),            # attn output proj
        layer_spec(1, H), layer_spec(1, H),            # LN1 gamma / beta
        layer_spec(H, I), layer_spec(1, I),            # FFN in
        layer_spec(I, H), layer_spec(1, H),            # FFN out
        layer_spec(1, H), layer_spec(1, H),            # LN2 gamma / beta
        const_spec(H, H), const_spec(1, H),            # pooler weight / bias
    ]

    pooled = pl.pallas_call(
        partial(bert_stack_kernel, num_heads=num_heads),
        out_shape=jax.ShapeDtypeStruct((B, 1, H), jnp.float32),
        grid=(n_tiles, L),
        in_specs=in_specs,
        out_specs=pl.BlockSpec((Bt, 1, H), lambda b, l: (b, 0, 0)),
        scratch_shapes=[pltpu.VMEM((Bt * S, H), jnp.float32),       # activation
                        pltpu.VMEM((Bt, S, H), jnp.bfloat16)],      # per-head ctx
        compiler_params=pltpu.CompilerParams(
            dimension_semantics=("parallel", "arbitrary"),
            vmem_limit_bytes=_vmem_limit_bytes()),
    )(emb, add_mask,
      p["emb_ln_g"], p["emb_ln_b"],
      p["wqkv"], p["bqkv"], p["wo"], p["bo"],
      p["ln1g"], p["ln1b"], p["w1"], p["b1"],
      p["w2"], p["b2"], p["ln2g"], p["ln2b"],
      p["pooler_w"], p["pooler_b"])
    return pooled[:, 0, :]


# --------------------------- parameter creation ------------------------------

def init_params(key, *, vocab, hidden, num_layers, intermediate, max_pos):
    H, I, L = hidden, intermediate, num_layers
    ks = iter(jax.random.split(key, 32))
    f32, bf16 = jnp.float32, jnp.bfloat16

    def nrm(shape, dtype=f32):
        return (0.02 * jax.random.normal(next(ks), shape)).astype(dtype)

    def zeros(shape, dtype=f32):
        return jnp.zeros(shape, dtype)

    def ones(shape, dtype=f32):
        return jnp.ones(shape, dtype)

    params = {
        "word_emb": nrm((vocab, H)),
        "pos_emb": nrm((max_pos, H)),
        "type_emb": nrm((2, H)),
        "emb_ln_g": ones((1, H)), "emb_ln_b": zeros((1, H)),
        # layer-stacked encoder weights (bf16 matmul operands, f32 bias/LN)
        "wqkv": nrm((L, H, 3 * H), bf16), "bqkv": zeros((L, 1, 3 * H)),
        "wo": nrm((L, H, H), bf16), "bo": zeros((L, 1, H)),
        "ln1g": ones((L, 1, H)), "ln1b": zeros((L, 1, H)),
        "w1": nrm((L, H, I), bf16), "b1": zeros((L, 1, I)),
        "w2": nrm((L, I, H), bf16), "b2": zeros((L, 1, H)),
        "ln2g": ones((L, 1, H)), "ln2b": zeros((L, 1, H)),
        "pooler_w": nrm((H, H), bf16), "pooler_b": zeros((1, H)),
        # task heads (nn.Linear(H, 5), nn.Linear(2H, 1) x2) -- computed in XLA
        "sent_w": nrm((H, 5)), "sent_b": zeros((5,)),
        "para_w": nrm((2 * H, 1)), "para_b": zeros((1,)),
        "sim_w": nrm((2 * H, 1)), "sim_b": zeros((1,)),
    }
    return params


# ------------------------------ model glue -----------------------------------

def bert_pooler_output(params, input_ids, attention_mask, num_heads):
    """Equivalent of self.bert(...)['pooler_output'] == MultitaskBERT.forward."""
    B, S = input_ids.shape
    emb = (jnp.take(params["word_emb"], input_ids, axis=0)
           + params["pos_emb"][:S][None, :, :]
           + params["type_emb"][0][None, None, :])          # token_type_ids == 0

    # Pad S to a multiple of 8 for BlockSpec compatibility; padded keys are
    # masked out via the additive mask so they never leak into real tokens.
    S_pad = ((S + 7) // 8) * 8
    if S_pad != S:
        emb = jnp.pad(emb, ((0, 0), (0, S_pad - S), (0, 0)))
        attention_mask = jnp.pad(attention_mask, ((0, 0), (0, S_pad - S)))

    add_mask = ((1.0 - attention_mask.astype(jnp.float32)) * -10000.0)[:, None, :]
    # bf16 embeddings halve the per-sequence activation DMA into the kernel.
    return bert_encoder_pallas(emb.astype(jnp.bfloat16), add_mask, params, num_heads)


def predict_sentiment(params, input_ids, attention_mask, num_heads):
    emb = bert_pooler_output(params, input_ids, attention_mask, num_heads)
    # dropout == identity in eval; tiny 5-wide head left to XLA
    return jnp.dot(emb, params["sent_w"]) + params["sent_b"]            # (B, 5)


def predict_paraphrase(params, ids1, m1, ids2, m2, num_heads):
    e1 = bert_pooler_output(params, ids1, m1, num_heads)
    e2 = bert_pooler_output(params, ids2, m2, num_heads)
    comb = jnp.concatenate([e1, e2], axis=-1)
    return (jnp.dot(comb, params["para_w"]) + params["para_b"]).squeeze(-1)   # (B,)


def predict_similarity(params, ids1, m1, ids2, m2, num_heads):
    e1 = bert_pooler_output(params, ids1, m1, num_heads)
    e2 = bert_pooler_output(params, ids2, m2, num_heads)
    comb = jnp.concatenate([e1, e2], axis=-1)
    return (jnp.dot(comb, params["sim_w"]) + params["sim_b"]).squeeze(-1)     # (B,)


# --------------------------------- demo --------------------------------------

if __name__ == "__main__":
    # Small synthetic BERT config (instead of bert-base-uncased checkpoint).
    VOCAB, HIDDEN, LAYERS, HEADS, INTER, MAX_POS = 64, 128, 2, 4, 256, 16
    B, S = 2, 8

    key = jax.random.PRNGKey(0)
    k_par, k_i1, k_i2 = jax.random.split(key, 3)
    params = init_params(k_par, vocab=VOCAB, hidden=HIDDEN,
                         num_layers=LAYERS, intermediate=INTER, max_pos=MAX_POS)

    ids1 = jax.random.randint(k_i1, (B, S), 0, VOCAB, dtype=jnp.int32)
    ids2 = jax.random.randint(k_i2, (B, S), 0, VOCAB, dtype=jnp.int32)
    # attention masks with a couple of padded (0) positions
    mask1 = jnp.array([[1, 1, 1, 1, 1, 1, 0, 0],
                       [1, 1, 1, 1, 1, 1, 1, 1]], dtype=jnp.int32)
    mask2 = jnp.array([[1, 1, 1, 1, 1, 0, 0, 0],
                       [1, 1, 1, 1, 1, 1, 1, 0]], dtype=jnp.int32)

    sent_logits = predict_sentiment(params, ids1, mask1, HEADS)               # (B, 5)
    para_logit = predict_paraphrase(params, ids1, mask1, ids2, mask2, HEADS)  # (B,)
    sim_logit = predict_similarity(params, ids1, mask1, ids2, mask2, HEADS)   # (B,)

    jax.block_until_ready((sent_logits, para_logit, sim_logit))
    assert sent_logits.shape == (B, 5)
    assert para_logit.shape == (B,)
    assert sim_logit.shape == (B,)
    print("KERNEL_OK")
</pallas_src>

<mosaic_0001>
module attributes {stable_mosaic.version = 11 : i64} {
  func.func @bert_stack_kernel(%arg0: i32, %arg1: i32, %arg2: memref<2x8x128xbf16, #tpu.memory_space<vmem>>, %arg3: memref<2x1x8xf32, #tpu.memory_space<vmem>>, %arg4: memref<1x128xf32, #tpu.memory_space<vmem>>, %arg5: memref<1x128xf32, #tpu.memory_space<vmem>>, %arg6: memref<1x128x384xbf16, #tpu.memory_space<vmem>>, %arg7: memref<1x1x384xf32, #tpu.memory_space<vmem>>, %arg8: memref<1x128x128xbf16, #tpu.memory_space<vmem>>, %arg9: memref<1x1x128xf32, #tpu.memory_space<vmem>>, %arg10: memref<1x1x128xf32, #tpu.memory_space<vmem>>, %arg11: memref<1x1x128xf32, #tpu.memory_space<vmem>>, %arg12: memref<1x128x256xbf16, #tpu.memory_space<vmem>>, %arg13: memref<1x1x256xf32, #tpu.memory_space<vmem>>, %arg14: memref<1x256x128xbf16, #tpu.memory_space<vmem>>, %arg15: memref<1x1x128xf32, #tpu.memory_space<vmem>>, %arg16: memref<1x1x128xf32, #tpu.memory_space<vmem>>, %arg17: memref<1x1x128xf32, #tpu.memory_space<vmem>>, %arg18: memref<128x128xbf16, #tpu.memory_space<vmem>>, %arg19: memref<1x128xf32, #tpu.memory_space<vmem>>, %arg20: memref<2x1x128xf32, #tpu.memory_space<vmem>>, %arg21: memref<16x128xf32, #tpu.memory_space<vmem>>, %arg22: memref<2x8x128xbf16, #tpu.memory_space<vmem>>) attributes {dimension_semantics = [#tpu.dimension_semantics<parallel>, #tpu.dimension_semantics<arbitrary>], iteration_bounds = array<i64: 1, 2>, scalar_prefetch = 0 : i64, scratch_operands = 2 : i64, tpu.core_type = #tpu.core_type<tc>, window_params = [{transform_indices = @transform_0, window_bounds = array<i64: 2, 8, 128>}, {transform_indices = @transform_1, window_bounds = array<i64: 2, 1, 8>}, {pipeline_mode = #tpu.pipeline_mode<synchronous>, transform_indices = @transform_2, window_bounds = array<i64: 1, 128>}, {pipeline_mode = #tpu.pipeline_mode<synchronous>, transform_indices = @transform_3, window_bounds = array<i64: 1, 128>}, {transform_indices = @transform_4, window_bounds = array<i64: 1, 128, 384>}, {transform_indices = @transform_5, window_bounds = array<i64: 1, 1, 384>}, {transform_indices = @transform_6, window_bounds = array<i64: 1, 128, 128>}, {transform_indices = @transform_7, window_bounds = array<i64: 1, 1, 128>}, {transform_indices = @transform_8, window_bounds = array<i64: 1, 1, 128>}, {transform_indices = @transform_9, window_bounds = array<i64: 1, 1, 128>}, {transform_indices = @transform_10, window_bounds = array<i64: 1, 128, 256>}, {transform_indices = @transform_11, window_bounds = array<i64: 1, 1, 256>}, {transform_indices = @transform_12, window_bounds = array<i64: 1, 256, 128>}, {transform_indices = @transform_13, window_bounds = array<i64: 1, 1, 128>}, {transform_indices = @transform_14, window_bounds = array<i64: 1, 1, 128>}, {transform_indices = @transform_15, window_bounds = array<i64: 1, 1, 128>}, {pipeline_mode = #tpu.pipeline_mode<synchronous>, transform_indices = @transform_16, window_bounds = array<i64: 128, 128>}, {pipeline_mode = #tpu.pipeline_mode<synchronous>, transform_indices = @transform_17, window_bounds = array<i64: 1, 128>}, {transform_indices = @transform_18, window_bounds = array<i64: 2, 1, 128>}]} {
    %c0_i32 = arith.constant 0 : i32
    %0 = arith.cmpi eq, %arg1, %c0_i32 : i32
    %1 = arith.extui %0 : i1 to i32
    %c0_i32_0 = arith.constant 0 : i32
    %2 = arith.cmpi ne, %1, %c0_i32_0 : i32
    scf.if %2 {
      %c0_90 = arith.constant 0 : index
      %c0_91 = arith.constant 0 : index
      %c0_92 = arith.constant 0 : index
      %198 = vector.load %arg2[%c0_90, %c0_91, %c0_92] : memref<2x8x128xbf16, #tpu.memory_space<vmem>>, vector<2x8x128xbf16>
      %199 = arith.extf %198 : vector<2x8x128xbf16> to vector<2x8x128xf32>
      %200 = vector.shape_cast %199 : vector<2x8x128xf32> to vector<16x128xf32>
      %c0_93 = arith.constant 0 : index
      %c0_94 = arith.constant 0 : index
      %201 = vector.load %arg4[%c0_93, %c0_94] : memref<1x128xf32, #tpu.memory_space<vmem>>, vector<1x128xf32>
      %c0_95 = arith.constant 0 : index
      %c0_96 = arith.constant 0 : index
      %202 = vector.load %arg5[%c0_95, %c0_96] : memref<1x128xf32, #tpu.memory_space<vmem>>, vector<1x128xf32>
      %cst_97 = arith.constant dense<0.000000e+00> : vector<16xf32>
      %203 = vector.multi_reduction <add>, %200, %cst_97 [1] : vector<16x128xf32> to vector<16xf32>
      %204 = vector.shape_cast %203 : vector<16xf32> to vector<16x1xf32>
      %cst_98 = arith.constant 1.280000e+02 : f32
      %205 = vector.broadcast %cst_98 : f32 to vector<16x1xf32>
      %206 = arith.divf %204, %205 : vector<16x1xf32>
      %207 = vector.broadcast %206 : vector<16x1xf32> to vector<16x128xf32>
      %208 = arith.subf %200, %207 : vector<16x128xf32>
      %209 = arith.mulf %208, %208 : vector<16x128xf32>
      %cst_99 = arith.constant dense<0.000000e+00> : vector<16xf32>
      %210 = vector.multi_reduction <add>, %209, %cst_99 [1] : vector<16x128xf32> to vector<16xf32>
      %211 = vector.shape_cast %210 : vector<16xf32> to vector<16x1xf32>
      %cst_100 = arith.constant 1.280000e+02 : f32
      %212 = vector.broadcast %cst_100 : f32 to vector<16x1xf32>
      %213 = arith.divf %211, %212 : vector<16x1xf32>
      %214 = vector.broadcast %206 : vector<16x1xf32> to vector<16x128xf32>
      %215 = arith.subf %200, %214 : vector<16x128xf32>
      %cst_101 = arith.constant 9.99999996E-13 : f32
      %216 = vector.broadcast %cst_101 : f32 to vector<16x1xf32>
      %217 = arith.addf %213, %216 : vector<16x1xf32>
      %218 = math.rsqrt %217 : vector<16x1xf32>
      %219 = vector.broadcast %218 : vector<16x1xf32> to vector<16x128xf32>
      %220 = arith.mulf %215, %219 : vector<16x128xf32>
      %221 = vector.broadcast %201 : vector<1x128xf32> to vector<16x128xf32>
      %222 = arith.mulf %220, %221 : vector<16x128xf32>
      %223 = vector.broadcast %202 : vector<1x128xf32> to vector<16x128xf32>
      %224 = arith.addf %222, %223 : vector<16x128xf32>
      %c0_102 = arith.constant 0 : index
      %c0_103 = arith.constant 0 : index
      %225 = vector.load %arg21[%c0_102, %c0_103] : memref<16x128xf32, #tpu.memory_space<vmem>>, vector<16x128xf32>
      tpu.vector_store %arg21[%c0_102, %c0_103], %224 {strides = array<i32>} : memref<16x128xf32, #tpu.memory_space<vmem>>, vector<16x128xf32>,
    } else {
    }
    %c0 = arith.constant 0 : index
    %c0_1 = arith.constant 0 : index
    %3 = vector.load %arg21[%c0, %c0_1] : memref<16x128xf32, #tpu.memory_space<vmem>>, vector<16x128xf32>
    %4 = arith.truncf %3 : vector<16x128xf32> to vector<16x128xbf16>
    %c0_2 = arith.constant 0 : index
    %c0_3 = arith.constant 0 : index
    %c0_4 = arith.constant 0 : index
    %5 = vector.load %arg6[%c0_2, %c0_3, %c0_4] : memref<1x128x384xbf16, #tpu.memory_space<vmem>>, vector<1x128x384xbf16>
    %6 = vector.shape_cast %5 : vector<1x128x384xbf16> to vector<128x384xbf16>
    %cst = arith.constant dense<0.000000e+00> : vector<16x384xf32>
    %7 = tpu.matmul %4, %6, %cst {dimension_numbers = #tpu.dot_dimension_numbers<[1], [0], [0], [1], [0, 0, 1, 1], [], []>} : vector<16x128xbf16>, vector<128x384xbf16>, vector<16x384xf32> -> vector<16x384xf32>
    %c0_5 = arith.constant 0 : index
    %c0_6 = arith.constant 0 : index
    %c0_7 = arith.constant 0 : index
    %8 = vector.load %arg7[%c0_5, %c0_6, %c0_7] : memref<1x1x384xf32, #tpu.memory_space<vmem>>, vector<1x1x384xf32>
    %9 = vector.shape_cast %8 : vector<1x1x384xf32> to vector<1x384xf32>
    %10 = vector.broadcast %9 : vector<1x384xf32> to vector<16x384xf32>
    %11 = arith.addf %7, %10 : vector<16x384xf32>
    %12 = vector.extract_strided_slice %11 {offsets = [0, 0], sizes = [16, 128], strides = [1, 1]} : vector<16x384xf32> to vector<16x128xf32>
    %cst_8 = arith.constant 0.176776692 : f32
    %13 = vector.broadcast %cst_8 : f32 to vector<16x128xf32>
    %14 = arith.mulf %12, %13 : vector<16x128xf32>
    %15 = arith.truncf %14 : vector<16x128xf32> to vector<16x128xbf16>
    %16 = vector.shape_cast %15 : vector<16x128xbf16> to vector<2x8x128xbf16>
    %17 = vector.extract_strided_slice %11 {offsets = [0, 128], sizes = [16, 128], strides = [1, 1]} : vector<16x384xf32> to vector<16x128xf32>
    %18 = arith.truncf %17 : vector<16x128xf32> to vector<16x128xbf16>
    %19 = vector.shape_cast %18 : vector<16x128xbf16> to vector<2x8x128xbf16>
    %20 = vector.extract_strided_slice %11 {offsets = [0, 256], sizes = [16, 128], strides = [1, 1]} : vector<16x384xf32> to vector<16x128xf32>
    %21 = arith.truncf %20 : vector<16x128xf32> to vector<16x128xbf16>
    %22 = vector.shape_cast %21 : vector<16x128xbf16> to vector<2x8x128xbf16>
    %c0_9 = arith.constant 0 : index
    %c0_10 = arith.constant 0 : index
    %c0_11 = arith.constant 0 : index
    %23 = vector.load %arg3[%c0_9, %c0_10, %c0_11] : memref<2x1x8xf32, #tpu.memory_space<vmem>>, vector<2x1x8xf32>
    %24 = vector.shape_cast %23 : vector<2x1x8xf32> to vector<2x1x8xf32>
    %25 = vector.broadcast %24 : vector<2x1x8xf32> to vector<2x8x8xf32>
    %26 = vector.extract_strided_slice %16 {offsets = [0, 0, 0], sizes = [2, 8, 32], strides = [1, 1, 1]} : vector<2x8x128xbf16> to vector<2x8x32xbf16>
    %27 = vector.extract_strided_slice %19 {offsets = [0, 0, 0], sizes = [2, 8, 32], strides = [1, 1, 1]} : vector<2x8x128xbf16> to vector<2x8x32xbf16>
    "tpu.trace_start"() <{level = 10 : i32, message = "bqd,bkd->bqk"}> : () -> ()
    %cst_12 = arith.constant dense<0.000000e+00> : vector<2x8x8xf32>
    %28 = tpu.matmul %26, %27, %cst_12 {dimension_numbers = #tpu.dot_dimension_numbers<[2], [2], [1], [1], [0, 0, 0, 1, 1, 1], [0], [0]>} : vector<2x8x32xbf16>, vector<2x8x32xbf16>, vector<2x8x8xf32> -> vector<2x8x8xf32>
    "tpu.trace_stop"() : () -> ()
    %29 = arith.addf %28, %25 : vector<2x8x8xf32>
    %cst_13 = arith.constant dense<0xFF800000> : vector<2x8xf32>
    %30 = vector.multi_reduction <maximumf>, %29, %cst_13 [2] : vector<2x8x8xf32> to vector<2x8xf32>
    %31 = vector.shape_cast %30 : vector<2x8xf32> to vector<2x8x1xf32>
    %32 = vector.broadcast %31 : vector<2x8x1xf32> to vector<2x8x8xf32>
    %33 = arith.subf %29, %32 : vector<2x8x8xf32>
    %34 = math.exp %33 : vector<2x8x8xf32>
    %cst_14 = arith.constant dense<0.000000e+00> : vector<2x8xf32>
    %35 = vector.multi_reduction <add>, %34, %cst_14 [2] : vector<2x8x8xf32> to vector<2x8xf32>
    %36 = vector.shape_cast %35 : vector<2x8xf32> to vector<2x8x1xf32>
    %37 = tpu.reciprocal %36 {approx = true} : vector<2x8x1xf32> -> vector<2x8x1xf32>
    %38 = vector.broadcast %37 : vector<2x8x1xf32> to vector<2x8x8xf32>
    %39 = arith.mulf %34, %38 : vector<2x8x8xf32>
    %40 = arith.truncf %39 : vector<2x8x8xf32> to vector<2x8x8xbf16>
    %41 = vector.extract_strided_slice %22 {offsets = [0, 0, 0], sizes = [2, 8, 32], strides = [1, 1, 1]} : vector<2x8x128xbf16> to vector<2x8x32xbf16>
    "tpu.trace_start"() <{level = 10 : i32, message = "bqk,bkd->bqd"}> : () -> ()
    %cst_15 = arith.constant dense<0.000000e+00> : vector<2x8x32xf32>
    %42 = tpu.matmul %40, %41, %cst_15 {dimension_numbers = #tpu.dot_dimension_numbers<[2], [1], [1], [2], [0, 0, 0, 1, 1, 2], [0], [0]>} : vector<2x8x8xbf16>, vector<2x8x32xbf16>, vector<2x8x32xf32> -> vector<2x8x32xf32>
    "tpu.trace_stop"() : () -> ()
    %43 = arith.truncf %42 : vector<2x8x32xf32> to vector<2x8x32xbf16>
    %c0_16 = arith.constant 0 : index
    %c0_17 = arith.constant 0 : index
    %c0_18 = arith.constant 0 : index
    %44 = vector.load %arg22[%c0_16, %c0_17, %c0_18] : memref<2x8x128xbf16, #tpu.memory_space<vmem>>, vector<2x8x32xbf16>
    tpu.vector_store %arg22[%c0_16, %c0_17, %c0_18], %43 {strides = array<i32>} : memref<2x8x128xbf16, #tpu.memory_space<vmem>>, vector<2x8x32xbf16>,
    %45 = vector.extract_strided_slice %16 {offsets = [0, 0, 32], sizes = [2, 8, 32], strides = [1, 1, 1]} : vector<2x8x128xbf16> to vector<2x8x32xbf16>
    %46 = vector.extract_strided_slice %19 {offsets = [0, 0, 32], sizes = [2, 8, 32], strides = [1, 1, 1]} : vector<2x8x128xbf16> to vector<2x8x32xbf16>
    "tpu.trace_start"() <{level = 10 : i32, message = "bqd,bkd->bqk"}> : () -> ()
    %cst_19 = arith.constant dense<0.000000e+00> : vector<2x8x8xf32>
    %47 = tpu.matmul %45, %46, %cst_19 {dimension_numbers = #tpu.dot_dimension_numbers<[2], [2], [1], [1], [0, 0, 0, 1, 1, 1], [0], [0]>} : vector<2x8x32xbf16>, vector<2x8x32xbf16>, vector<2x8x8xf32> -> vector<2x8x8xf32>
    "tpu.trace_stop"() : () -> ()
    %48 = arith.addf %47, %25 : vector<2x8x8xf32>
    %cst_20 = arith.constant dense<0xFF800000> : vector<2x8xf32>
    %49 = vector.multi_reduction <maximumf>, %48, %cst_20 [2] : vector<2x8x8xf32> to vector<2x8xf32>
    %50 = vector.shape_cast %49 : vector<2x8xf32> to vector<2x8x1xf32>
    %51 = vector.broadcast %50 : vector<2x8x1xf32> to vector<2x8x8xf32>
    %52 = arith.subf %48, %51 : vector<2x8x8xf32>
    %53 = math.exp %52 : vector<2x8x8xf32>
    %cst_21 = arith.constant dense<0.000000e+00> : vector<2x8xf32>
    %54 = vector.multi_reduction <add>, %53, %cst_21 [2] : vector<2x8x8xf32> to vector<2x8xf32>
    %55 = vector.shape_cast %54 : vector<2x8xf32> to vector<2x8x1xf32>
    %56 = tpu.reciprocal %55 {approx = true} : vector<2x8x1xf32> -> vector<2x8x1xf32>
    %57 = vector.broadcast %56 : vector<2x8x1xf32> to vector<2x8x8xf32>
    %58 = arith.mulf %53, %57 : vector<2x8x8xf32>
    %59 = arith.truncf %58 : vector<2x8x8xf32> to vector<2x8x8xbf16>
    %60 = vector.extract_strided_slice %22 {offsets = [0, 0, 32], sizes = [2, 8, 32], strides = [1, 1, 1]} : vector<2x8x128xbf16> to vector<2x8x32xbf16>
    "tpu.trace_start"() <{level = 10 : i32, message = "bqk,bkd->bqd"}> : () -> ()
    %cst_22 = arith.constant dense<0.000000e+00> : vector<2x8x32xf32>
    %61 = tpu.matmul %59, %60, %cst_22 {dimension_numbers = #tpu.dot_dimension_numbers<[2], [1], [1], [2], [0, 0, 0, 1, 1, 2], [0], [0]>} : vector<2x8x8xbf16>, vector<2x8x32xbf16>, vector<2x8x32xf32> -> vector<2x8x32xf32>
    "tpu.trace_stop"() : () -> ()
    %62 = arith.truncf %61 : vector<2x8x32xf32> to vector<2x8x32xbf16>
    %c0_23 = arith.constant 0 : index
    %c0_24 = arith.constant 0 : index
    %c32 = arith.constant 32 : index
    %63 = vector.load %arg22[%c0_23, %c0_24, %c32] : memref<2x8x128xbf16, #tpu.memory_space<vmem>>, vector<2x8x32xbf16>
    tpu.vector_store %arg22[%c0_23, %c0_24, %c32], %62 {strides = array<i32>} : memref<2x8x128xbf16, #tpu.memory_space<vmem>>, vector<2x8x32xbf16>,
    %64 = vector.extract_strided_slice %16 {offsets = [0, 0, 64], sizes = [2, 8, 32], strides = [1, 1, 1]} : vector<2x8x128xbf16> to vector<2x8x32xbf16>
    %65 = vector.extract_strided_slice %19 {offsets = [0, 0, 64], sizes = [2, 8, 32], strides = [1, 1, 1]} : vector<2x8x128xbf16> to vector<2x8x32xbf16>
    "tpu.trace_start"() <{level = 10 : i32, message = "bqd,bkd->bqk"}> : () -> ()
    %cst_25 = arith.constant dense<0.000000e+00> : vector<2x8x8xf32>
    %66 = tpu.matmul %64, %65, %cst_25 {dimension_numbers = #tpu.dot_dimension_numbers<[2], [2], [1], [1], [0, 0, 0, 1, 1, 1], [0], [0]>} : vector<2x8x32xbf16>, vector<2x8x32xbf16>, vector<2x8x8xf32> -> vector<2x8x8xf32>
    "tpu.trace_stop"() : () -> ()
    %67 = arith.addf %66, %25 : vector<2x8x8xf32>
    %cst_26 = arith.constant dense<0xFF800000> : vector<2x8xf32>
    %68 = vector.multi_reduction <maximumf>, %67, %cst_26 [2] : vector<2x8x8xf32> to vector<2x8xf32>
    %69 = vector.shape_cast %68 : vector<2x8xf32> to vector<2x8x1xf32>
    %70 = vector.broadcast %69 : vector<2x8x1xf32> to vector<2x8x8xf32>
    %71 = arith.subf %67, %70 : vector<2x8x8xf32>
    %72 = math.exp %71 : vector<2x8x8xf32>
    %cst_27 = arith.constant dense<0.000000e+00> : vector<2x8xf32>
    %73 = vector.multi_reduction <add>, %72, %cst_27 [2] : vector<2x8x8xf32> to vector<2x8xf32>
    %74 = vector.shape_cast %73 : vector<2x8xf32> to vector<2x8x1xf32>
    %75 = tpu.reciprocal %74 {approx = true} : vector<2x8x1xf32> -> vector<2x8x1xf32>
    %76 = vector.broadcast %75 : vector<2x8x1xf32> to vector<2x8x8xf32>
    %77 = arith.mulf %72, %76 : vector<2x8x8xf32>
    %78 = arith.truncf %77 : vector<2x8x8xf32> to vector<2x8x8xbf16>
    %79 = vector.extract_strided_slice %22 {offsets = [0, 0, 64], sizes = [2, 8, 32], strides = [1, 1, 1]} : vector<2x8x128xbf16> to vector<2x8x32xbf16>
    "tpu.trace_start"() <{level = 10 : i32, message = "bqk,bkd->bqd"}> : () -> ()
    %cst_28 = arith.constant dense<0.000000e+00> : vector<2x8x32xf32>
    %80 = tpu.matmul %78, %79, %cst_28 {dimension_numbers = #tpu.dot_dimension_numbers<[2], [1], [1], [2], [0, 0, 0, 1, 1, 2], [0], [0]>} : vector<2x8x8xbf16>, vector<2x8x32xbf16>, vector<2x8x32xf32> -> vector<2x8x32xf32>
    "tpu.trace_stop"() : () -> ()
    %81 = arith.truncf %80 : vector<2x8x32xf32> to vector<2x8x32xbf16>
    %c0_29 = arith.constant 0 : index
    %c0_30 = arith.constant 0 : index
    %c64 = arith.constant 64 : index
    %82 = vector.load %arg22[%c0_29, %c0_30, %c64] : memref<2x8x128xbf16, #tpu.memory_space<vmem>>, vector<2x8x32xbf16>
    tpu.vector_store %arg22[%c0_29, %c0_30, %c64], %81 {strides = array<i32>} : memref<2x8x128xbf16, #tpu.memory_space<vmem>>, vector<2x8x32xbf16>,
    %83 = vector.extract_strided_slice %16 {offsets = [0, 0, 96], sizes = [2, 8, 32], strides = [1, 1, 1]} : vector<2x8x128xbf16> to vector<2x8x32xbf16>
    %84 = vector.extract_strided_slice %19 {offsets = [0, 0, 96], sizes = [2, 8, 32], strides = [1, 1, 1]} : vector<2x8x128xbf16> to vector<2x8x32xbf16>
    "tpu.trace_start"() <{level = 10 : i32, message = "bqd,bkd->bqk"}> : () -> ()
    %cst_31 = arith.constant dense<0.000000e+00> : vector<2x8x8xf32>
    %85 = tpu.matmul %83, %84, %cst_31 {dimension_numbers = #tpu.dot_dimension_numbers<[2], [2], [1], [1], [0, 0, 0, 1, 1, 1], [0], [0]>} : vector<2x8x32xbf16>, vector<2x8x32xbf16>, vector<2x8x8xf32> -> vector<2x8x8xf32>
    "tpu.trace_stop"() : () -> ()
    %86 = arith.addf %85, %25 : vector<2x8x8xf32>
    %cst_32 = arith.constant dense<0xFF800000> : vector<2x8xf32>
    %87 = vector.multi_reduction <maximumf>, %86, %cst_32 [2] : vector<2x8x8xf32> to vector<2x8xf32>
    %88 = vector.shape_cast %87 : vector<2x8xf32> to vector<2x8x1xf32>
    %89 = vector.broadcast %88 : vector<2x8x1xf32> to vector<2x8x8xf32>
    %90 = arith.subf %86, %89 : vector<2x8x8xf32>
    %91 = math.exp %90 : vector<2x8x8xf32>
    %cst_33 = arith.constant dense<0.000000e+00> : vector<2x8xf32>
    %92 = vector.multi_reduction <add>, %91, %cst_33 [2] : vector<2x8x8xf32> to vector<2x8xf32>
    %93 = vector.shape_cast %92 : vector<2x8xf32> to vector<2x8x1xf32>
    %94 = tpu.reciprocal %93 {approx = true} : vector<2x8x1xf32> -> vector<2x8x1xf32>
    %95 = vector.broadcast %94 : vector<2x8x1xf32> to vector<2x8x8xf32>
    %96 = arith.mulf %91, %95 : vector<2x8x8xf32>
    %97 = arith.truncf %96 : vector<2x8x8xf32> to vector<2x8x8xbf16>
    %98 = vector.extract_strided_slice %22 {offsets = [0, 0, 96], sizes = [2, 8, 32], strides = [1, 1, 1]} : vector<2x8x128xbf16> to vector<2x8x32xbf16>
    "tpu.trace_start"() <{level = 10 : i32, message = "bqk,bkd->bqd"}> : () -> ()
    %cst_34 = arith.constant dense<0.000000e+00> : vector<2x8x32xf32>
    %99 = tpu.matmul %97, %98, %cst_34 {dimension_numbers = #tpu.dot_dimension_numbers<[2], [1], [1], [2], [0, 0, 0, 1, 1, 2], [0], [0]>} : vector<2x8x8xbf16>, vector<2x8x32xbf16>, vector<2x8x32xf32> -> vector<2x8x32xf32>
    "tpu.trace_stop"() : () -> ()
    %100 = arith.truncf %99 : vector<2x8x32xf32> to vector<2x8x32xbf16>
    %c0_35 = arith.constant 0 : index
    %c0_36 = arith.constant 0 : index
    %c96 = arith.constant 96 : index
    %101 = vector.load %arg22[%c0_35, %c0_36, %c96] : memref<2x8x128xbf16, #tpu.memory_space<vmem>>, vector<2x8x32xbf16>
    tpu.vector_store %arg22[%c0_35, %c0_36, %c96], %100 {strides = array<i32>} : memref<2x8x128xbf16, #tpu.memory_space<vmem>>, vector<2x8x32xbf16>,
    %c0_37 = arith.constant 0 : index
    %c0_38 = arith.constant 0 : index
    %c0_39 = arith.constant 0 : index
    %102 = vector.load %arg22[%c0_37, %c0_38, %c0_39] : memref<2x8x128xbf16, #tpu.memory_space<vmem>>, vector<2x8x128xbf16>
    %103 = vector.shape_cast %102 : vector<2x8x128xbf16> to vector<16x128xbf16>
    %c0_40 = arith.constant 0 : index
    %c0_41 = arith.constant 0 : index
    %c0_42 = arith.constant 0 : index
    %104 = vector.load %arg8[%c0_40, %c0_41, %c0_42] : memref<1x128x128xbf16, #tpu.memory_space<vmem>>, vector<1x128x128xbf16>
    %105 = vector.shape_cast %104 : vector<1x128x128xbf16> to vector<128x128xbf16>
    %cst_43 = arith.constant dense<0.000000e+00> : vector<16x128xf32>
    %106 = tpu.matmul %103, %105, %cst_43 {dimension_numbers = #tpu.dot_dimension_numbers<[1], [0], [0], [1], [0, 0, 1, 1], [], []>} : vector<16x128xbf16>, vector<128x128xbf16>, vector<16x128xf32> -> vector<16x128xf32>
    %c0_44 = arith.constant 0 : index
    %c0_45 = arith.constant 0 : index
    %c0_46 = arith.constant 0 : index
    %107 = vector.load %arg9[%c0_44, %c0_45, %c0_46] : memref<1x1x128xf32, #tpu.memory_space<vmem>>, vector<1x1x128xf32>
    %108 = vector.shape_cast %107 : vector<1x1x128xf32> to vector<1x128xf32>
    %109 = vector.broadcast %108 : vector<1x128xf32> to vector<16x128xf32>
    %110 = arith.addf %106, %109 : vector<16x128xf32>
    %111 = arith.addf %3, %110 : vector<16x128xf32>
    %c0_47 = arith.constant 0 : index
    %c0_48 = arith.constant 0 : index
    %c0_49 = arith.constant 0 : index
    %112 = vector.load %arg10[%c0_47, %c0_48, %c0_49] : memref<1x1x128xf32, #tpu.memory_space<vmem>>, vector<1x1x128xf32>
    %113 = vector.shape_cast %112 : vector<1x1x128xf32> to vector<1x128xf32>
    %c0_50 = arith.constant 0 : index
    %c0_51 = arith.constant 0 : index
    %c0_52 = arith.constant 0 : index
    %114 = vector.load %arg11[%c0_50, %c0_51, %c0_52] : memref<1x1x128xf32, #tpu.memory_space<vmem>>, vector<1x1x128xf32>
    %115 = vector.shape_cast %114 : vector<1x1x128xf32> to vector<1x128xf32>
    %cst_53 = arith.constant dense<0.000000e+00> : vector<16xf32>
    %116 = vector.multi_reduction <add>, %111, %cst_53 [1] : vector<16x128xf32> to vector<16xf32>
    %117 = vector.shape_cast %116 : vector<16xf32> to vector<16x1xf32>
    %cst_54 = arith.constant 1.280000e+02 : f32
    %118 = vector.broadcast %cst_54 : f32 to vector<16x1xf32>
    %119 = arith.divf %117, %118 : vector<16x1xf32>
    %120 = vector.broadcast %119 : vector<16x1xf32> to vector<16x128xf32>
    %121 = arith.subf %111, %120 : vector<16x128xf32>
    %122 = arith.mulf %121, %121 : vector<16x128xf32>
    %cst_55 = arith.constant dense<0.000000e+00> : vector<16xf32>
    %123 = vector.multi_reduction <add>, %122, %cst_55 [1] : vector<16x128xf32> to vector<16xf32>
    %124 = vector.shape_cast %123 : vector<16xf32> to vector<16x1xf32>
    %cst_56 = arith.constant 1.280000e+02 : f32
    %125 = vector.broadcast %cst_56 : f32 to vector<16x1xf32>
    %126 = arith.divf %124, %125 : vector<16x1xf32>
    %127 = vector.broadcast %119 : vector<16x1xf32> to vector<16x128xf32>
    %128 = arith.subf %111, %127 : vector<16x128xf32>
    %cst_57 = arith.constant 9.99999996E-13 : f32
    %129 = vector.broadcast %cst_57 : f32 to vector<16x1xf32>
    %130 = arith.addf %126, %129 : vector<16x1xf32>
    %131 = math.rsqrt %130 : vector<16x1xf32>
    %132 = vector.broadcast %131 : vector<16x1xf32> to vector<16x128xf32>
    %133 = arith.mulf %128, %132 : vector<16x128xf32>
    %134 = vector.broadcast %113 : vector<1x128xf32> to vector<16x128xf32>
    %135 = arith.mulf %133, %134 : vector<16x128xf32>
    %136 = vector.broadcast %115 : vector<1x128xf32> to vector<16x128xf32>
    %137 = arith.addf %135, %136 : vector<16x128xf32>
    %138 = arith.truncf %137 : vector<16x128xf32> to vector<16x128xbf16>
    %c0_58 = arith.constant 0 : index
    %c0_59 = arith.constant 0 : index
    %c0_60 = arith.constant 0 : index
    %139 = vector.load %arg12[%c0_58, %c0_59, %c0_60] : memref<1x128x256xbf16, #tpu.memory_space<vmem>>, vector<1x128x256xbf16>
    %140 = vector.shape_cast %139 : vector<1x128x256xbf16> to vector<128x256xbf16>
    %cst_61 = arith.constant dense<0.000000e+00> : vector<16x256xf32>
    %141 = tpu.matmul %138, %140, %cst_61 {dimension_numbers = #tpu.dot_dimension_numbers<[1], [0], [0], [1], [0, 0, 1, 1], [], []>} : vector<16x128xbf16>, vector<128x256xbf16>, vector<16x256xf32> -> vector<16x256xf32>
    %c0_62 = arith.constant 0 : index
    %c0_63 = arith.constant 0 : index
    %c0_64 = arith.constant 0 : index
    %142 = vector.load %arg13[%c0_62, %c0_63, %c0_64] : memref<1x1x256xf32, #tpu.memory_space<vmem>>, vector<1x1x256xf32>
    %143 = vector.shape_cast %142 : vector<1x1x256xf32> to vector<1x256xf32>
    %144 = vector.broadcast %143 : vector<1x256xf32> to vector<16x256xf32>
    %145 = arith.addf %141, %144 : vector<16x256xf32>
    %cst_65 = arith.constant 5.000000e-01 : f32
    %146 = vector.broadcast %cst_65 : f32 to vector<16x256xf32>
    %147 = arith.mulf %146, %145 : vector<16x256xf32>
    %cst_66 = arith.constant 4.471500e-02 : f32
    %148 = vector.broadcast %cst_66 : f32 to vector<16x256xf32>
    %149 = arith.mulf %148, %145 : vector<16x256xf32>
    %150 = arith.mulf %149, %145 : vector<16x256xf32>
    %151 = arith.mulf %150, %145 : vector<16x256xf32>
    %152 = arith.addf %145, %151 : vector<16x256xf32>
    %cst_67 = arith.constant 0.797884583 : f32
    %153 = vector.broadcast %cst_67 : f32 to vector<16x256xf32>
    %154 = arith.mulf %153, %152 : vector<16x256xf32>
    %155 = math.tanh %154 : vector<16x256xf32>
    %cst_68 = arith.constant 1.000000e+00 : f32
    %156 = vector.broadcast %cst_68 : f32 to vector<16x256xf32>
    %157 = arith.addf %156, %155 : vector<16x256xf32>
    %158 = arith.mulf %147, %157 : vector<16x256xf32>
    %159 = arith.truncf %158 : vector<16x256xf32> to vector<16x256xbf16>
    %c0_69 = arith.constant 0 : index
    %c0_70 = arith.constant 0 : index
    %c0_71 = arith.constant 0 : index
    %160 = vector.load %arg14[%c0_69, %c0_70, %c0_71] : memref<1x256x128xbf16, #tpu.memory_space<vmem>>, vector<1x256x128xbf16>
    %161 = vector.shape_cast %160 : vector<1x256x128xbf16> to vector<256x128xbf16>
    %cst_72 = arith.constant dense<0.000000e+00> : vector<16x128xf32>
    %162 = tpu.matmul %159, %161, %cst_72 {dimension_numbers = #tpu.dot_dimension_numbers<[1], [0], [0], [1], [0, 0, 1, 1], [], []>} : vector<16x256xbf16>, vector<256x128xbf16>, vector<16x128xf32> -> vector<16x128xf32>
    %c0_73 = arith.constant 0 : index
    %c0_74 = arith.constant 0 : index
    %c0_75 = arith.constant 0 : index
    %163 = vector.load %arg15[%c0_73, %c0_74, %c0_75] : memref<1x1x128xf32, #tpu.memory_space<vmem>>, vector<1x1x128xf32>
    %164 = vector.shape_cast %163 : vector<1x1x128xf32> to vector<1x128xf32>
    %165 = vector.broadcast %164 : vector<1x128xf32> to vector<16x128xf32>
    %166 = arith.addf %162, %165 : vector<16x128xf32>
    %167 = arith.addf %137, %166 : vector<16x128xf32>
    %c0_76 = arith.constant 0 : index
    %c0_77 = arith.constant 0 : index
    %c0_78 = arith.constant 0 : index
    %168 = vector.load %arg16[%c0_76, %c0_77, %c0_78] : memref<1x1x128xf32, #tpu.memory_space<vmem>>, vector<1x1x128xf32>
    %169 = vector.shape_cast %168 : vector<1x1x128xf32> to vector<1x128xf32>
    %c0_79 = arith.constant 0 : index
    %c0_80 = arith.constant 0 : index
    %c0_81 = arith.constant 0 : index
    %170 = vector.load %arg17[%c0_79, %c0_80, %c0_81] : memref<1x1x128xf32, #tpu.memory_space<vmem>>, vector<1x1x128xf32>
    %171 = vector.shape_cast %170 : vector<1x1x128xf32> to vector<1x128xf32>
    %cst_82 = arith.constant dense<0.000000e+00> : vector<16xf32>
    %172 = vector.multi_reduction <add>, %167, %cst_82 [1] : vector<16x128xf32> to vector<16xf32>
    %173 = vector.shape_cast %172 : vector<16xf32> to vector<16x1xf32>
    %cst_83 = arith.constant 1.280000e+02 : f32
    %174 = vector.broadcast %cst_83 : f32 to vector<16x1xf32>
    %175 = arith.divf %173, %174 : vector<16x1xf32>
    %176 = vector.broadcast %175 : vector<16x1xf32> to vector<16x128xf32>
    %177 = arith.subf %167, %176 : vector<16x128xf32>
    %178 = arith.mulf %177, %177 : vector<16x128xf32>
    %cst_84 = arith.constant dense<0.000000e+00> : vector<16xf32>
    %179 = vector.multi_reduction <add>, %178, %cst_84 [1] : vector<16x128xf32> to vector<16xf32>
    %180 = vector.shape_cast %179 : vector<16xf32> to vector<16x1xf32>
    %cst_85 = arith.constant 1.280000e+02 : f32
    %181 = vector.broadcast %cst_85 : f32 to vector<16x1xf32>
    %182 = arith.divf %180, %181 : vector<16x1xf32>
    %183 = vector.broadcast %175 : vector<16x1xf32> to vector<16x128xf32>
    %184 = arith.subf %167, %183 : vector<16x128xf32>
    %cst_86 = arith.constant 9.99999996E-13 : f32
    %185 = vector.broadcast %cst_86 : f32 to vector<16x1xf32>
    %186 = arith.addf %182, %185 : vector<16x1xf32>
    %187 = math.rsqrt %186 : vector<16x1xf32>
    %188 = vector.broadcast %187 : vector<16x1xf32> to vector<16x128xf32>
    %189 = arith.mulf %184, %188 : vector<16x128xf32>
    %190 = vector.broadcast %169 : vector<1x128xf32> to vector<16x128xf32>
    %191 = arith.mulf %189, %190 : vector<16x128xf32>
    %192 = vector.broadcast %171 : vector<1x128xf32> to vector<16x128xf32>
    %193 = arith.addf %191, %192 : vector<16x128xf32>
    %c0_87 = arith.constant 0 : index
    %c0_88 = arith.constant 0 : index
    %194 = vector.load %arg21[%c0_87, %c0_88] : memref<16x128xf32, #tpu.memory_space<vmem>>, vector<16x128xf32>
    tpu.vector_store %arg21[%c0_87, %c0_88], %193 {strides = array<i32>} : memref<16x128xf32, #tpu.memory_space<vmem>>, vector<16x128xf32>,
    %c1_i32 = arith.constant 1 : i32
    %195 = arith.cmpi eq, %arg1, %c1_i32 : i32
    %196 = arith.extui %195 : i1 to i32
    %c0_i32_89 = arith.constant 0 : i32
    %197 = arith.cmpi ne, %196, %c0_i32_89 : i32
    scf.if %197 {
      %198 = vector.extract_strided_slice %193 {offsets = [0, 0], sizes = [1, 128], strides = [1, 1]} : vector<16x128xf32> to vector<1x128xf32>
      %199 = vector.extract_strided_slice %193 {offsets = [8, 0], sizes = [1, 128], strides = [1, 1]} : vector<16x128xf32> to vector<1x128xf32>
      %200 = tpu.concatenate %198, %199 in 0 : vector<1x128xf32>, vector<1x128xf32> -> vector<2x128xf32>
      %201 = arith.truncf %200 : vector<2x128xf32> to vector<2x128xbf16>
      %c0_90 = arith.constant 0 : index
      %c0_91 = arith.constant 0 : index
      %202 = vector.load %arg18[%c0_90, %c0_91] : memref<128x128xbf16, #tpu.memory_space<vmem>>, vector<128x128xbf16>
      %cst_92 = arith.constant dense<0.000000e+00> : vector<2x128xf32>
      %203 = tpu.matmul %201, %202, %cst_92 {dimension_numbers = #tpu.dot_dimension_numbers<[1], [0], [0], [1], [0, 0, 1, 1], [], []>} : vector<2x128xbf16>, vector<128x128xbf16>, vector<2x128xf32> -> vector<2x128xf32>
      %c0_93 = arith.constant 0 : index
      %c0_94 = arith.constant 0 : index
      %204 = vector.load %arg19[%c0_93, %c0_94] : memref<1x128xf32, #tpu.memory_space<vmem>>, vector<1x128xf32>
      %205 = vector.broadcast %204 : vector<1x128xf32> to vector<2x128xf32>
      %206 = arith.addf %203, %205 : vector<2x128xf32>
      %207 = math.tanh %206 : vector<2x128xf32>
      %208 = vector.shape_cast %207 : vector<2x128xf32> to vector<2x1x128xf32>
      %c0_95 = arith.constant 0 : index
      %c0_96 = arith.constant 0 : index
      %c0_97 = arith.constant 0 : index
      %209 = vector.load %arg20[%c0_95, %c0_96, %c0_97] : memref<2x1x128xf32, #tpu.memory_space<vmem>>, vector<2x1x128xf32>
      tpu.vector_store %arg20[%c0_95, %c0_96, %c0_97], %208 {strides = array<i32>} : memref<2x1x128xf32, #tpu.memory_space<vmem>>, vector<2x1x128xf32>,
    } else {
    }
    return
  }
  func.func @transform_0(%arg0: i32, %arg1: i32) -> (i32, i32, i32) {
    %c0_i32 = arith.constant 0 : i32
    %c0_i32_0 = arith.constant 0 : i32
    %c0_i32_1 = arith.constant 0 : i32
    return %arg0, %c0_i32, %c0_i32_0 : i32, i32, i32
  }
  func.func @transform_1(%arg0: i32, %arg1: i32) -> (i32, i32, i32) {
    %c0_i32 = arith.constant 0 : i32
    %c0_i32_0 = arith.constant 0 : i32
    %c0_i32_1 = arith.constant 0 : i32
    return %arg0, %c0_i32, %c0_i32_0 : i32, i32, i32
  }
  func.func @transform_2(%arg0: i32, %arg1: i32) -> (i32, i32) {
    %c0_i32 = arith.constant 0 : i32
    %c0_i32_0 = arith.constant 0 : i32
    %c0_i32_1 = arith.constant 0 : i32
    return %c0_i32, %c0_i32_0 : i32, i32
  }
  func.func @transform_3(%arg0: i32, %arg1: i32) -> (i32, i32) {
    %c0_i32 = arith.constant 0 : i32
    %c0_i32_0 = arith.constant 0 : i32
    %c0_i32_1 = arith.constant 0 : i32
    return %c0_i32, %c0_i32_0 : i32, i32
  }
  func.func @transform_4(%arg0: i32, %arg1: i32) -> (i32, i32, i32) {
    %c0_i32 = arith.constant 0 : i32
    %c0_i32_0 = arith.constant 0 : i32
    %c0_i32_1 = arith.constant 0 : i32
    return %arg1, %c0_i32, %c0_i32_0 : i32, i32, i32
  }
  func.func @transform_5(%arg0: i32, %arg1: i32) -> (i32, i32, i32) {
    %c0_i32 = arith.constant 0 : i32
    %c0_i32_0 = arith.constant 0 : i32
    %c0_i32_1 = arith.constant 0 : i32
    return %arg1, %c0_i32, %c0_i32_0 : i32, i32, i32
  }
  func.func @transform_6(%arg0: i32, %arg1: i32) -> (i32, i32, i32) {
    %c0_i32 = arith.constant 0 : i32
    %c0_i32_0 = arith.constant 0 : i32
    %c0_i32_1 = arith.constant 0 : i32
    return %arg1, %c0_i32, %c0_i32_0 : i32, i32, i32
  }
  func.func @transform_7(%arg0: i32, %arg1: i32) -> (i32, i32, i32) {
    %c0_i32 = arith.constant 0 : i32
    %c0_i32_0 = arith.constant 0 : i32
    %c0_i32_1 = arith.constant 0 : i32
    return %arg1, %c0_i32, %c0_i32_0 : i32, i32, i32
  }
  func.func @transform_8(%arg0: i32, %arg1: i32) -> (i32, i32, i32) {
    %c0_i32 = arith.constant 0 : i32
    %c0_i32_0 = arith.constant 0 : i32
    %c0_i32_1 = arith.constant 0 : i32
    return %arg1, %c0_i32, %c0_i32_0 : i32, i32, i32
  }
  func.func @transform_9(%arg0: i32, %arg1: i32) -> (i32, i32, i32) {
    %c0_i32 = arith.constant 0 : i32
    %c0_i32_0 = arith.constant 0 : i32
    %c0_i32_1 = arith.constant 0 : i32
    return %arg1, %c0_i32, %c0_i32_0 : i32, i32, i32
  }
  func.func @transform_10(%arg0: i32, %arg1: i32) -> (i32, i32, i32) {
    %c0_i32 = arith.constant 0 : i32
    %c0_i32_0 = arith.constant 0 : i32
    %c0_i32_1 = arith.constant 0 : i32
    return %arg1, %c0_i32, %c0_i32_0 : i32, i32, i32
  }
  func.func @transform_11(%arg0: i32, %arg1: i32) -> (i32, i32, i32) {
    %c0_i32 = arith.constant 0 : i32
    %c0_i32_0 = arith.constant 0 : i32
    %c0_i32_1 = arith.constant 0 : i32
    return %arg1, %c0_i32, %c0_i32_0 : i32, i32, i32
  }
  func.func @transform_12(%arg0: i32, %arg1: i32) -> (i32, i32, i32) {
    %c0_i32 = arith.constant 0 : i32
    %c0_i32_0 = arith.constant 0 : i32
    %c0_i32_1 = arith.constant 0 : i32
    return %arg1, %c0_i32, %c0_i32_0 : i32, i32, i32
  }
  func.func @transform_13(%arg0: i32, %arg1: i32) -> (i32, i32, i32) {
    %c0_i32 = arith.constant 0 : i32
    %c0_i32_0 = arith.constant 0 : i32
    %c0_i32_1 = arith.constant 0 : i32
    return %arg1, %c0_i32, %c0_i32_0 : i32, i32, i32
  }
  func.func @transform_14(%arg0: i32, %arg1: i32) -> (i32, i32, i32) {
    %c0_i32 = arith.constant 0 : i32
    %c0_i32_0 = arith.constant 0 : i32
    %c0_i32_1 = arith.constant 0 : i32
    return %arg1, %c0_i32, %c0_i32_0 : i32, i32, i32
  }
  func.func @transform_15(%arg0: i32, %arg1: i32) -> (i32, i32, i32) {
    %c0_i32 = arith.constant 0 : i32
    %c0_i32_0 = arith.constant 0 : i32
    %c0_i32_1 = arith.constant 0 : i32
    return %arg1, %c0_i32, %c0_i32_0 : i32, i32, i32
  }
  func.func @transform_16(%arg0: i32, %arg1: i32) -> (i32, i32) {
    %c0_i32 = arith.constant 0 : i32
    %c0_i32_0 = arith.constant 0 : i32
    %c0_i32_1 = arith.constant 0 : i32
    return %c0_i32, %c0_i32_0 : i32, i32
  }
  func.func @transform_17(%arg0: i32, %arg1: i32) -> (i32, i32) {
    %c0_i32 = arith.constant 0 : i32
    %c0_i32_0 = arith.constant 0 : i32
    %c0_i32_1 = arith.constant 0 : i32
    return %c0_i32, %c0_i32_0 : i32, i32
  }
  func.func @transform_18(%arg0: i32, %arg1: i32) -> (i32, i32, i32) {
    %c0_i32 = arith.constant 0 : i32
    %c0_i32_0 = arith.constant 0 : i32
    %c0_i32_1 = arith.constant 0 : i32
    return %arg0, %c0_i32, %c0_i32_0 : i32, i32, i32
  }
}

</mosaic_0001>

<bundles_post_ra>
// kernel: tpu_custom_call.1
= control target key start
LH: loop header
LB: loop body
LE: loop exit
PB: predicated region body
PF: predicated region fallthrough
CT: control target
= control target key end

     0   :  { %s5865_s0 = inlined_call_operand.hbm [shape: bf16[2,8,128], index: 0, kind: input, shape index: {}]   ;;  %s5866_s1 = inlined_call_operand.hbm [shape: f32[2,1,8], index: 1, kind: input, shape index: {}]   ;;  %s5867_s2 = inlined_call_operand.hbm [shape: f32[1,128], index: 2, kind: input, shape index: {}]   ;;  %s5868_s3 = inlined_call_operand.hbm [shape: f32[1,128], index: 3, kind: input, shape index: {}]   ;;  %s5869_s4 = inlined_call_operand.hbm [shape: bf16[2,128,384], index: 4, kind: input, shape index: {}]   ;;  %s5870_s5 = inlined_call_operand.hbm [shape: f32[2,1,384], index: 5, kind: input, shape index: {}]   ;;  %s5871_s6 = inlined_call_operand.hbm [shape: bf16[2,128,128], index: 6, kind: input, shape index: {}]   ;;  %s5872_s7 = inlined_call_operand.hbm [shape: f32[2,1,128], index: 7, kind: input, shape index: {}]   ;;  %s5873_s8 = inlined_call_operand.hbm [shape: f32[2,1,128], index: 8, kind: input, shape index: {}]   ;;  %s5874_s9 = inlined_call_operand.hbm [shape: f32[2,1,128], index: 9, kind: input, shape index: {}]   ;;  %s5875_s10 = inlined_call_operand.hbm [shape: bf16[2,128,256], index: 10, kind: input, shape index: {}]   ;;  %s5876_s11 = inlined_call_operand.hbm [shape: f32[2,1,256], index: 11, kind: input, shape index: {}]   ;;  %s5877_s12 = inlined_call_operand.hbm [shape: bf16[2,256,128], index: 12, kind: input, shape index: {}]   ;;  %s5878_s13 = inlined_call_operand.hbm [shape: f32[2,1,128], index: 13, kind: input, shape index: {}]   ;;  %s5879_s14 = inlined_call_operand.hbm [shape: f32[2,1,128], index: 14, kind: input, shape index: {}]   ;;  %s5880_s15 = inlined_call_operand.hbm [shape: f32[2,1,128], index: 15, kind: input, shape index: {}]   ;;  %s5881_s16 = inlined_call_operand.hbm [shape: bf16[128,128], index: 16, kind: input, shape index: {}]   ;;  %s5882_s17 = inlined_call_operand.hbm [shape: f32[1,128], index: 17, kind: input, shape index: {}]   ;;  %s5883_s18 = inlined_call_operand.hbm [shape: f32[2,1,128], index: 18, kind: output, shape index: {}]  }
   0x1   :  { %5932 = sst [smem:[#allocation43_spill]] %s5865_s0 }
   0x2   :  { %5933 = sst [smem:[#allocation44_spill]] %s5866_s1 }
   0x3   :  { %5934 = sst [smem:[#allocation45_spill]] %s5867_s2 }
   0x4   :  { %5935 = sst [smem:[#allocation46_spill]] %s5868_s3 }
   0x5   :  { %5936 = sst [smem:[#allocation47_spill]] %s5869_s4 }
   0x6   :  { %5937 = sst [smem:[#allocation48_spill]] %s5870_s5 }
   0x7   :  { %5938 = sst [smem:[#allocation49_spill]] %s5871_s6 }
   0x8   :  { %5939 = sst [smem:[#allocation50_spill]] %s5872_s7 }
   0x9   :  { %5940 = sst [smem:[#allocation51_spill]] %s5873_s8 }
   0xa   :  { %5941 = sst [smem:[#allocation52_spill]] %s5878_s13 }
   0xb   :  { %5942 = sst [smem:[#allocation53_spill]] %s5879_s14 }
   0xc   :  { %5943 = sst [smem:[#allocation54_spill]] %s5880_s15 }
   0xd   :  { %5944 = sst [smem:[#allocation55_spill]] %s5881_s16 }
   0xe   :  { %5945 = sst [smem:[#allocation56_spill]] %s5882_s17 }
   0xf   :  { %5946 = sst [smem:[#allocation57_spill]] %s5883_s18 }
  0x10   :  { %23 = vsyncpa [#allocation5], 0 }
  0x11   :  { %24 = vsyncpa [#allocation8], 0 }
  0x12   :  { %25 = vsyncpa [#allocation11], 0 }
  0x13   :  { %26 = vsyncpa [#allocation6], 0  ;;  %s4923_s27 = smov 0   ;;  %s4925_s28 = smov 0  }
  0x14   :  { %s4927_s29 = smov 0   ;;  %s4929_s30 = smov 0  }
  0x15   :  { %s4931_s0 = smov 0   ;;  %s4933_s19 = smov 0  }
  0x16 LB: > { %5947 = sst [smem:[#allocation34_spill]] %s4772_s28  ;;  %s4952_s1 = sadd.s32 4294967295, %s4788_s19   ;;  %s4788_s19 = sphi %s4933_s19, %s32_s19   ;;  %s4784_s0 = sphi %s4931_s0, %s6024_s0   ;;  %s4780_s30 = sphi %s4929_s30, %s6023_s30   ;;  %s4776_s29 = sphi %s4927_s29, %s6021_s29   ;;  %s4772_s28 = sphi %s4925_s28, %s6020_s28   ;;  %s4768_s27 = sphi %s4923_s27, %s6019_s27  }
  0x17   : > { %5948 = sst [smem:[#allocation35_spill]] %s4776_s29  ;;  %p152_p0 = scmp.ne.s32.totalorder %s4776_s29, %s4772_s28 }
  0x18   : > { %5949 = sst [smem:[#allocation36_spill]] %s4780_s30  ;;  %p153_p1 = scmp.eq.s32.totalorder %s4788_s19, 0 }
  0x19   : > { %5950 = sst [smem:[#allocation37_spill]] %s4952_s1  ;;  %p158_p2 = scmp.ne.s32.totalorder %s4772_s28, %s4768_s27 }
  0x1a   : > { %p5895_p3 = scmp.eq.s32.totalorder %s4952_s1, 0  ;;  %p154_p4 = por %p153_p1, %p152_p0 }
  0x1b   : > { %p3398_p5 = scmp.ge.s32.totalorder %s4788_s19, 1  ;;  %p523_p7 = scmp.lt.s32.totalorder %s4788_s19, 3 }
  0x1c   : > { %p4963_p6 = por %p5895_p3, %p158_p2  ;;  %s4790_s2 = smov [#allocation4]  }
  0x1d   : > { %p4968_p8 = pnand %p3398_p5, %p523_p7  ;;  %s538_s23 = sshll.u32 %s4790_s2, 4  ;;  %s539_s23 = int_to_ptr.vmem [resolvable:$true] %s538_s23 }
  0x1e   : > { %s5951_s21 = scalar_select %p4963_p6, 1, 0 }
  0x1f   : > { %s5953_s22 = scalar_select %p4968_p8, 1, 0 }
  0x20   : > { %5952 = sst [smem:[#allocation38_spill]] %s5951_s21  ;;  %p3872_p9 = pneg %p4968_p8 }
  0x21   : > { %5954 = sst [smem:[#allocation39_spill]] %s5953_s22  ;;  %p3934_p10 = scmp.lt.s32.totalorder %s4788_s19, 2 }
  0x22   : > { %p4977_p11 = pnand %p3872_p9, %p5895_p3  ;;  %s4982_s25 = sand.u32 1, %s4776_s29  }
  0x23   : > { %p4984_p12 = pnand %p3934_p10, %p154_p4  ;;  %s5958_s18 = sld [smem:[#allocation43_spill]] }
  0x24   : > { %s5955_s24 = scalar_select %p4977_p11, 1, 0 }
  0x25   : > { %s5957_s26 = scalar_select %p4984_p12, 1, 0 }
  0x26   : > { %5956 = sst [smem:[#allocation40_spill]] %s5955_s24  ;;  %p4996_p0 = pneg %p4977_p11 }
  0x28   : > { %s5959_s28 = scalar_select %p4996_p0, 1, 0 }
  0x29   : > { %s4160_s2 = scalar_lea.hbm %s5958_s18, 128 }
  0x2a   : > { %p4161_p13 = scmp.ne.s32.totalorder %s5958_s18, %s4160_s2  ;;  %p4167_p4 = scmp.lt.u32.totalorder %s4160_s2, %s5958_s18 }
  0x2c   : > { %p4163_p1 = pnand %p4996_p0, %p4161_p13 }
  0x2e   : > { %p4164_p2 = pneg %p4163_p1 }
  0x30   : > { %p4169_p5 = pnand %p4167_p4, %p4164_p2 }
  0x32   : > { %4172 = shalt.err (!%p4169_p5)
}
  0x33   : > { %s4173_s20 = scalar_lea.vmem %s539_s23, 128  ;;  %p4181_p3 = scmp.lt.s32.totalorder %s539_s23, %s539_s23 }
  0x34   : > { %p4174_p7 = scmp.ne.s32.totalorder %s539_s23, %s4173_s20  ;;  %p4182_p6 = scmp.lt.s32.totalorder %s4173_s20, %s4173_s20 }
  0x36   : > { %p4176_p9 = pnand %p4174_p7, %p4996_p0  ;;  %p4183_p8 = por %p4182_p6, %p4181_p3 }
  0x38   : > { %p4177_p10 = pneg %p4176_p9 }
  0x3a   : > { %p4184_p12 = pnand %p4183_p8, %p4177_p10 }
  0x3c   : > { %4187 = shalt.err (!%p4184_p12)
}
  0x3d   : > { %s5907_s30 = smov 64   ;;  %s5913_s1 = smov 4  }
  0x3e   : > { %3875 = dma.hbm_to_vmem [thread:$0]  (!%p4977_p11), %s5958_s18, 128, %s539_s23, [#allocation5], %s5907_s30, %s5907_s30, %s5913_s1  }
  0x3f   : > { %s41_s27 = sadd.s32 1, %s4784_s0  ;;  %s614_s2 = sand.u32 1, %s4788_s19  }
  0x40   : > { %p42_p3 = scmp.ge.s32.totalorder %s41_s27, 2  ;;  %s3814_s20 = smul.u32 192, %s4982_s25 }
  0x41   : > { %s3815_s15 = smul.u32 3072, %s4784_s0  ;;  %s5961_s4 = sld [smem:[#allocation47_spill]] }
  0x42   : > { %s6026_s27 = smov (%p42_p3, %s41_s27), 0  ;;  %s618_s16 = scalar_lea.vmem [#allocation12], %s3814_s20 }
  0x43   : > { %5960 = sst [smem:[#allocation41_spill]] %s6026_s27  ;;  %s142_s17 = ssub.s32 %s4784_s0, %s6026_s27 }
  0x44   : > { %s625_s14 = sshll.u32 %s618_s16, 4  ;;  %p143_p6 = scmp.eq.s32.totalorder %s142_s17, 0  ;;  %s5028_s14 = int_to_ptr.vmem [resolvable:$true] %s625_s14 }
  0x45   : > { %s5962_s23 = sadd.s32 1, %s4776_s29  ;;  %s3816_s22 = smul.u32 3, %s4982_s25 }
  0x46   : > { %s5033_s21 = scalar_select %p143_p6, %s4776_s29, %s5962_s23  }
  0x47   : > { %s5026_s24 = scalar_lea.hbm %s5961_s4, %s3815_s15  ;;  %s5036_s30 = scalar_lea.sflag [#allocation5], %s614_s2 }
  0x48   : > { %5963 = sst [smem:[#allocation42_spill]] %s5033_s21  ;;  %s4188_s20 = scalar_lea.hbm %s5026_s24, 3072 }
  0x49   : > { %p4189_p8 = scmp.ne.s32.totalorder %s5026_s24, %s4188_s20  ;;  %p5964_p12 = scmp.ne.s32.totalorder %s5957_s26, 0 }
  0x4a   : > { %s4193_s15 = scalar_lea.hbm %s5961_s4, 6144  ;;  %p4194_p4 = scmp.lt.u32.totalorder %s5026_s24, %s5961_s4 }
  0x4b   : > { %p5042_p13 = pneg %p5964_p12  ;;  %p4195_p5 = scmp.lt.u32.totalorder %s4193_s15, %s4188_s20 }
  0x4c   : > { %p4197_p9 = scmp.lt.u32.totalorder %s4188_s20, %s5026_s24 }
  0x4d   : > { %s5965_s16 = scalar_select %p5042_p13, 1, 0 }
  0x4e   : > { %p4191_p1 = pnand %p5042_p13, %p4189_p8  ;;  %p4196_p7 = por %p4195_p5, %p4194_p4 }
  0x50   : > { %p4192_p2 = pneg %p4191_p1  ;;  %p4198_p10 = por %p4197_p9, %p4196_p7 }
  0x52   : > { %p4199_p3 = pnand %p4198_p10, %p4192_p2 }
  0x54   : > { %4202 = shalt.err (!%p4199_p3)
}
  0x55   : > { %s4203_s2 = scalar_lea.vmem %s5028_s14, 3072  ;;  %s4793_s3 = smov [#allocation12]  }
  0x56   : > { %p4204_p6 = scmp.ne.s32.totalorder %s5028_s14, %s4203_s2  ;;  %s4208_s13 = sshll.u32 %s4793_s3, 4  ;;  %s4209_s13 = int_to_ptr.vmem [resolvable:$false] %s4208_s13 }
  0x57   : > { %s4210_s17 = scalar_lea.vmem %s4209_s13, 6144  ;;  %p4211_p11 = scmp.lt.s32.totalorder %s5028_s14, %s4209_s13 }
  0x58   : > { %p4206_p8 = pnand %p4204_p6, %p5042_p13  ;;  %p4212_p0 = scmp.lt.s32.totalorder %s4210_s17, %s4203_s2 }
  0x5a   : > { %p4207_p1 = pneg %p4206_p8  ;;  %p4213_p4 = por %p4212_p0, %p4211_p11 }
  0x5c   : > { %p4214_p5 = pnand %p4213_p4, %p4207_p1 }
  0x5e   : > { %4217 = shalt.err (!%p4214_p5)
}
  0x5f   : > { %s4794_s20 = smov 192   ;;  %s4795_s15 = smov 12  }
  0x60   : > { %3894 = dma.hbm_to_vmem [thread:$0]  (!%p5964_p12), %s5026_s24, 3072, %s5028_s14, %s5036_s30, %s4794_s20, %s4794_s20, %s4795_s15  }
  0x61   : > { %s3817_s23 = smul.u32 48, %s4784_s0  ;;  %s639_s3 = scalar_lea.vmem [#allocation13], %s3816_s22 }
  0x62   : > { %s647_s13 = sshll.u32 %s639_s3, 4  ;;  %s3408_s2 = sshll.u32 %s4982_s25, 6  ;;  %s648_s13 = int_to_ptr.vmem [resolvable:$true] %s647_s13 }
  0x63   : > { %s5966_s5 = sld [smem:[#allocation48_spill]] }
  0x69   : > { %s645_s4 = scalar_lea.hbm %s5966_s5, %s3817_s23  ;;  %s4223_s29 = scalar_lea.hbm %s5966_s5, 96 }
  0x6a   : > { %s4218_s18 = scalar_lea.hbm %s645_s4, 48  ;;  %p4224_p7 = scmp.lt.u32.totalorder %s645_s4, %s5966_s5 }
  0x6b   : > { %p4219_p11 = scmp.ne.s32.totalorder %s645_s4, %s4218_s18  ;;  %p4225_p9 = scmp.lt.u32.totalorder %s4223_s29, %s4218_s18 }
  0x6c   : > { %p4227_p3 = scmp.lt.u32.totalorder %s4218_s18, %s645_s4 }
  0x6d   : > { %p4221_p0 = pnand %p4219_p11, %p5042_p13  ;;  %p4226_p10 = por %p4225_p9, %p4224_p7 }
  0x6f   : > { %p4222_p2 = pneg %p4221_p0  ;;  %p4228_p6 = por %p4227_p3, %p4226_p10 }
  0x71   : > { %p4229_p8 = pnand %p4228_p6, %p4222_p2 }
  0x73   : > { %4232 = shalt.err (!%p4229_p8)
}
  0x74   : > { %s4233_s1 = scalar_lea.vmem %s648_s13, 48  ;;  %s4796_s22 = smov [#allocation13]  }
  0x75   : > { %p4234_p1 = scmp.ne.s32.totalorder %s648_s13, %s4233_s1  ;;  %s4238_s20 = sshll.u32 %s4796_s22, 4  ;;  %s4239_s20 = int_to_ptr.vmem [resolvable:$false] %s4238_s20 }
  0x76   : > { %s4240_s27 = scalar_lea.vmem %s4239_s20, 96  ;;  %p4241_p11 = scmp.lt.s32.totalorder %s648_s13, %s4239_s20 }
  0x77   : > { %p4236_p4 = pnand %p4234_p1, %p5042_p13  ;;  %p4242_p0 = scmp.lt.s32.totalorder %s4240_s27, %s4233_s1 }
  0x79   : > { %p4237_p5 = pneg %p4236_p4  ;;  %p4243_p12 = por %p4242_p0, %p4241_p11 }
  0x7b   : > { %p4244_p7 = pnand %p4243_p12, %p4237_p5 }
  0x7d   : > { %4247 = shalt.err (!%p4244_p7)
}
  0x7e   : > { %p5967_p9 = scmp.ne.s32.totalorder %s5957_s26, 0  ;;  %s3557_s18 = sshll.u32 %s4784_s0, 10 }
  0x7f   : > { %s5968_s6 = sld [smem:[#allocation49_spill]]  ;;  %s658_s23 = scalar_lea.vmem [#allocation14], %s3408_s2 }
  0x80   : > { %3897 = dma.hbm_to_vmem [thread:$0]  (!%p5967_p9), %s645_s4, 48, %s648_s13, %s5036_s30  }
  0x81   : > { %s665_s3 = sshll.u32 %s658_s23, 4  ;;  %s5094_s3 = int_to_ptr.vmem [resolvable:$true] %s665_s3 }
  0x85   : > { %s5090_s15 = scalar_lea.hbm %s5968_s6, %s3557_s18  ;;  %s4253_s14 = scalar_lea.hbm %s5968_s6, 2048 }
  0x86   : > { %s4248_s17 = scalar_lea.hbm %s5090_s15, 1024  ;;  %p4254_p3 = scmp.lt.u32.totalorder %s5090_s15, %s5968_s6 }
  0x87   : > { %p4249_p12 = scmp.ne.s32.totalorder %s5090_s15, %s4248_s17  ;;  %p4255_p6 = scmp.lt.u32.totalorder %s4253_s14, %s4248_s17 }
  0x88   : > { %p4257_p1 = scmp.lt.u32.totalorder %s4248_s17, %s5090_s15 }
  0x89   : > { %p4251_p2 = pnand %p4249_p12, %p5042_p13  ;;  %p4256_p8 = por %p4255_p6, %p4254_p3 }
  0x8b   : > { %p4252_p10 = pneg %p4251_p2  ;;  %p4258_p4 = por %p4257_p1, %p4256_p8 }
  0x8d   : > { %p4259_p5 = pnand %p4258_p4, %p4252_p10 }
  0x8f   : > { %4262 = shalt.err (!%p4259_p5)
}
  0x90   : > { %s4263_s2 = scalar_lea.vmem %s5094_s3, 1024  ;;  %s4797_s22 = smov [#allocation14]  }
  0x91   : > { %p4264_p11 = scmp.ne.s32.totalorder %s5094_s3, %s4263_s2  ;;  %s4268_s20 = sshll.u32 %s4797_s22, 4  ;;  %s4269_s20 = int_to_ptr.vmem [resolvable:$false] %s4268_s20 }
  0x92   : > { %s4270_s27 = scalar_lea.vmem %s4269_s20, 2048  ;;  %p4271_p12 = scmp.lt.s32.totalorder %s5094_s3, %s4269_s20 }
  0x93   : > { %p4266_p0 = pnand %p4264_p11, %p5042_p13  ;;  %p4272_p2 = scmp.lt.s32.totalorder %s4270_s27, %s4263_s2 }
  0x95   : > { %p4267_p7 = pneg %p4266_p0  ;;  %p4273_p3 = por %p4272_p2, %p4271_p12 }
  0x97   : > { %p4274_p6 = pnand %p4273_p3, %p4267_p7 }
  0x99   : > { %4277 = shalt.err (!%p4274_p6)
}
  0x9a   : > { %s5969_s18 = smov 4   ;;  %s5970_s29 = smov 64  }
  0x9b   : > { %3900 = dma.hbm_to_vmem [thread:$0]  (!%p5967_p9), %s5090_s15, 1024, %s5094_s3, %s5036_s30, %s5970_s29, %s5970_s29, %s5969_s18  }
  0x9c   : > { %s5122_s21 = sshll.u32 %s4784_s0, 4  ;;  %s678_s23 = scalar_lea.vmem [#allocation15], %s4982_s25 }
  0x9d   : > { %s685_s17 = sshll.u32 %s678_s23, 4  ;;  %s5971_s7 = sld [smem:[#allocation50_spill]]  ;;  %s686_s17 = int_to_ptr.vmem [resolvable:$true] %s685_s17 }
  0xa3   : > { %s683_s14 = scalar_lea.hbm %s5971_s7, %s5122_s21  ;;  %s4283_s22 = scalar_lea.hbm %s5971_s7, 32 }
  0xa4   : > { %s4278_s24 = scalar_lea.hbm %s683_s14, 16  ;;  %p4284_p4 = scmp.lt.u32.totalorder %s683_s14, %s5971_s7 }
  0xa5   : > { %p4279_p10 = scmp.ne.s32.totalorder %s683_s14, %s4278_s24  ;;  %p4285_p5 = scmp.lt.u32.totalorder %s4283_s22, %s4278_s24 }
  0xa6   : > { %p4287_p0 = scmp.lt.u32.totalorder %s4278_s24, %s683_s14 }
  0xa7   : > { %p4281_p8 = pnand %p4279_p10, %p5042_p13  ;;  %p4286_p11 = por %p4285_p5, %p4284_p4 }
  0xa9   : > { %p4282_p1 = pneg %p4281_p8  ;;  %p4288_p7 = por %p4287_p0, %p4286_p11 }
  0xab   : > { %p4289_p12 = pnand %p4288_p7, %p4282_p1 }
  0xad   : > { %4292 = shalt.err (!%p4289_p12)
}
  0xae   : > { %s4293_s20 = scalar_lea.vmem %s686_s17, 16  ;;  %s4798_s27 = smov [#allocation15]  }
  0xaf   : > { %p4294_p2 = scmp.ne.s32.totalorder %s686_s17, %s4293_s20  ;;  %s4298_s23 = sshll.u32 %s4798_s27, 4  ;;  %s4299_s23 = int_to_ptr.vmem [resolvable:$false] %s4298_s23 }
  0xb0   : > { %s4300_s4 = scalar_lea.vmem %s4299_s23, 32  ;;  %p4301_p10 = scmp.lt.s32.totalorder %s686_s17, %s4299_s23 }
  0xb1   : > { %p4296_p3 = pnand %p4294_p2, %p5042_p13  ;;  %p4302_p8 = scmp.lt.s32.totalorder %s4300_s4, %s4293_s20 }
  0xb3   : > { %p4297_p6 = pneg %p4296_p3  ;;  %p4303_p9 = por %p4302_p8, %p4301_p10 }
  0xb5   : > { %p4304_p4 = pnand %p4303_p9, %p4297_p6 }
  0xb7   : > { %4307 = shalt.err (!%p4304_p4)
}
  0xb8   : > { %p5972_p5 = scmp.ne.s32.totalorder %s5957_s26, 0  ;;  %s5973_s8 = sld [smem:[#allocation51_spill]] }
  0xb9   : > { %s695_s2 = scalar_lea.vmem [#allocation16], %s4982_s25  ;;  %s5153_s20 = scalar_lea.hbm %s5874_s9, %s5122_s21 }
  0xba   : > { %3903 = dma.hbm_to_vmem [thread:$0]  (!%p5972_p5), %s683_s14, 16, %s686_s17, %s5036_s30  }
  0xbb   : > { %s702_s22 = sshll.u32 %s695_s2, 4  ;;  %s703_s22 = int_to_ptr.vmem [resolvable:$true] %s702_s22 }
  0xbe   : > { %s5146_s1 = scalar_lea.hbm %s5973_s8, %s5122_s21  ;;  %s4313_s23 = scalar_lea.hbm %s5973_s8, 32 }
  0xbf   : > { %s4308_s27 = scalar_lea.hbm %s5146_s1, 16  ;;  %p4314_p0 = scmp.lt.u32.totalorder %s5146_s1, %s5973_s8 }
  0xc0   : > { %p4309_p9 = scmp.ne.s32.totalorder %s5146_s1, %s4308_s27  ;;  %p4315_p7 = scmp.lt.u32.totalorder %s4313_s23, %s4308_s27 }
  0xc1   : > { %p4317_p2 = scmp.lt.u32.totalorder %s4308_s27, %s5146_s1 }
  0xc2   : > { %p4311_p1 = pnand %p4309_p9, %p5042_p13  ;;  %p4316_p12 = por %p4315_p7, %p4314_p0 }
  0xc4   : > { %p4312_p11 = pneg %p4311_p1  ;;  %p4318_p3 = por %p4317_p2, %p4316_p12 }
  0xc6   : > { %p4319_p6 = pnand %p4318_p3, %p4312_p11 }
  0xc8   : > { %4322 = shalt.err (!%p4319_p6)
}
  0xc9   : > { %s4323_s24 = scalar_lea.vmem %s703_s22, 16  ;;  %s4799_s2 = smov [#allocation16]  }
  0xca   : > { %p4324_p10 = scmp.ne.s32.totalorder %s703_s22, %s4323_s24  ;;  %s4328_s15 = sshll.u32 %s4799_s2, 4  ;;  %s4329_s15 = int_to_ptr.vmem [resolvable:$false] %s4328_s15 }
  0xcb   : > { %s4330_s3 = scalar_lea.vmem %s4329_s15, 32  ;;  %p4331_p9 = scmp.lt.s32.totalorder %s703_s22, %s4329_s15 }
  0xcc   : > { %p4326_p8 = pnand %p4324_p10, %p5042_p13  ;;  %p4332_p1 = scmp.lt.s32.totalorder %s4330_s3, %s4323_s24 }
  0xce   : > { %p4327_p4 = pneg %p4326_p8  ;;  %p4333_p5 = por %p4332_p1, %p4331_p9 }
  0xd0   : > { %p4334_p0 = pnand %p4333_p5, %p4327_p4 }
  0xd2   : > { %4337 = shalt.err (!%p4334_p0)
}
  0xd3   : > { %p5974_p7 = scmp.ne.s32.totalorder %s5957_s26, 0  ;;  %s712_s27 = scalar_lea.vmem [#allocation17], %s4982_s25 }
  0xd4   : > { %s719_s17 = sshll.u32 %s712_s27, 4  ;;  %s5920_s14 = sshll.u32 %s4982_s25, 7  ;;  %s720_s17 = int_to_ptr.vmem [resolvable:$true] %s719_s17 }
  0xd5   : > { %3906 = dma.hbm_to_vmem [thread:$0]  (!%p5974_p7), %s5146_s1, 16, %s703_s22, %s5036_s30  }
  0xd6   : > { %s4338_s23 = scalar_lea.hbm %s5153_s20, 16  ;;  %s4343_s24 = scalar_lea.hbm %s5874_s9, 32 }
  0xd7   : > { %p4339_p11 = scmp.ne.s32.totalorder %s5153_s20, %s4338_s23  ;;  %p4344_p2 = scmp.lt.u32.totalorder %s5153_s20, %s5874_s9 }
  0xd8   : > { %p4345_p3 = scmp.lt.u32.totalorder %s4343_s24, %s4338_s23  ;;  %p4347_p10 = scmp.lt.u32.totalorder %s4338_s23, %s5153_s20 }
  0xd9   : > { %p4341_p5 = pnand %p4339_p11, %p5042_p13 }
  0xda   : > { %p4346_p6 = por %p4345_p3, %p4344_p2 }
  0xdb   : > { %p4342_p12 = pneg %p4341_p5 }
  0xdc   : > { %p4348_p8 = por %p4347_p10, %p4346_p6 }
  0xde   : > { %p4349_p4 = pnand %p4348_p8, %p4342_p12 }
  0xe0   : > { %4352 = shalt.err (!%p4349_p4)
}
  0xe1   : > { %s4353_s1 = scalar_lea.vmem %s720_s17, 16  ;;  %s4800_s22 = smov [#allocation17]  }
  0xe2   : > { %p4354_p9 = scmp.ne.s32.totalorder %s720_s17, %s4353_s1  ;;  %s4358_s3 = sshll.u32 %s4800_s22, 4  ;;  %s4359_s3 = int_to_ptr.vmem [resolvable:$false] %s4358_s3 }
  0xe3   : > { %s4360_s27 = scalar_lea.vmem %s4359_s3, 32  ;;  %p4361_p11 = scmp.lt.s32.totalorder %s720_s17, %s4359_s3 }
  0xe4   : > { %p4356_p1 = pnand %p4354_p9, %p5042_p13  ;;  %p4362_p5 = scmp.lt.s32.totalorder %s4360_s27, %s4353_s1 }
  0xe6   : > { %p4357_p0 = pneg %p4356_p1  ;;  %p4363_p7 = por %p4362_p5, %p4361_p11 }
  0xe8   : > { %p4364_p2 = pnand %p4363_p7, %p4357_p0 }
  0xea   : > { %4367 = shalt.err (!%p4364_p2)
}
  0xeb   : > { %p5975_p3 = scmp.ne.s32.totalorder %s5957_s26, 0  ;;  %s3558_s23 = sshll.u32 %s4784_s0, 11 }
  0xec   : > { %s730_s4 = scalar_lea.vmem [#allocation18], %s5920_s14  ;;  %s5201_s15 = scalar_lea.hbm %s5875_s10, %s3558_s23 }
  0xed   : > { %3909 = dma.hbm_to_vmem [thread:$0]  (!%p5975_p3), %s5153_s20, 16, %s720_s17, %s5036_s30  }
  0xee   : > { %s737_s13 = sshll.u32 %s730_s4, 4  ;;  %s4368_s1 = scalar_lea.hbm %s5201_s15, 2048  ;;  %s5203_s13 = int_to_ptr.vmem [resolvable:$true] %s737_s13 }
  0xef   : > { %p4369_p7 = scmp.ne.s32.totalorder %s5201_s15, %s4368_s1  ;;  %s4373_s22 = scalar_lea.hbm %s5875_s10, 4096 }
  0xf0   : > { %p4374_p10 = scmp.lt.u32.totalorder %s5201_s15, %s5875_s10  ;;  %p4375_p8 = scmp.lt.u32.totalorder %s4373_s22, %s4368_s1 }
  0xf1   : > { %p4371_p12 = pnand %p4369_p7, %p5042_p13  ;;  %p4377_p9 = scmp.lt.u32.totalorder %s4368_s1, %s5201_s15 }
  0xf2   : > { %p4376_p4 = por %p4375_p8, %p4374_p10 }
  0xf3   : > { %p4372_p6 = pneg %p4371_p12 }
  0xf4   : > { %p4378_p1 = por %p4377_p9, %p4376_p4 }
  0xf6   : > { %p4379_p0 = pnand %p4378_p1, %p4372_p6 }
  0xf8   : > { %4382 = shalt.err (!%p4379_p0)
}
  0xf9   : > { %s4383_s4 = scalar_lea.vmem %s5203_s13, 2048  ;;  %s4801_s24 = smov [#allocation18]  }
  0xfa   : > { %p4384_p11 = scmp.ne.s32.totalorder %s5203_s13, %s4383_s4  ;;  %s4388_s2 = sshll.u32 %s4801_s24, 4  ;;  %s4389_s2 = int_to_ptr.vmem [resolvable:$false] %s4388_s2 }
  0xfb   : > { %s4390_s20 = scalar_lea.vmem %s4389_s2, 4096  ;;  %p4391_p7 = scmp.lt.s32.totalorder %s5203_s13, %s4389_s2 }
  0xfc   : > { %p4386_p5 = pnand %p4384_p11, %p5042_p13  ;;  %p4392_p12 = scmp.lt.s32.totalorder %s4390_s20, %s4383_s4 }
  0xfe   : > { %p4387_p2 = pneg %p4386_p5  ;;  %p4393_p10 = por %p4392_p12, %p4391_p7 }
 0x100   : > { %p4394_p8 = pnand %p4393_p10, %p4387_p2 }
 0x102   : > { %4397 = shalt.err (!%p4394_p8)
}
 0x103   : > { %s4802_s1 = smov 128   ;;  %s4803_s17 = smov 8  }
 0x104   : > { %3912 = dma.hbm_to_vmem [thread:$0]  (!%p5975_p3), %s5201_s15, 2048, %s5203_s13, %s5036_s30, %s4802_s1, %s4802_s1, %s4803_s17  }
 0x105   : > { %s3417_s22 = sshll.u32 %s4982_s25, 1  ;;  %s3559_s3 = sshll.u32 %s4784_s0, 5 }
 0x106   : > { %s5232_s4 = scalar_lea.hbm %s5876_s11, %s3559_s3  ;;  %s751_s2 = scalar_lea.vmem [#allocation19], %s3417_s22 }
 0x107   : > { %s759_s20 = sshll.u32 %s751_s2, 4  ;;  %s5239_s6 = scalar_lea.hbm %s5877_s12, %s3558_s23  ;;  %s760_s20 = int_to_ptr.vmem [resolvable:$true] %s759_s20 }
 0x108   : > { %s4398_s13 = scalar_lea.hbm %s5232_s4, 32  ;;  %s4403_s17 = scalar_lea.hbm %s5876_s11, 64 }
 0x109   : > { %p4399_p6 = scmp.ne.s32.totalorder %s5232_s4, %s4398_s13  ;;  %p4404_p1 = scmp.lt.u32.totalorder %s5232_s4, %s5876_s11 }
 0x10a   : > { %p4405_p0 = scmp.lt.u32.totalorder %s4403_s17, %s4398_s13  ;;  %p4407_p5 = scmp.lt.u32.totalorder %s4398_s13, %s5232_s4 }
 0x10b   : > { %p4401_p4 = pnand %p4399_p6, %p5042_p13 }
 0x10c   : > { %p4406_p11 = por %p4405_p0, %p4404_p1 }
 0x10d   : > { %p4402_p9 = pneg %p4401_p4 }
 0x10e   : > { %p4408_p2 = por %p4407_p5, %p4406_p11 }
 0x110   : > { %p4409_p7 = pnand %p4408_p2, %p4402_p9 }
 0x112   : > { %4412 = shalt.err (!%p4409_p7)
}
 0x113   : > { %s4413_s5 = scalar_lea.vmem %s760_s20, 32  ;;  %s4804_s14 = smov [#allocation19]  }
 0x114   : > { %p4414_p12 = scmp.ne.s32.totalorder %s760_s20, %s4413_s5  ;;  %s4418_s23 = sshll.u32 %s4804_s14, 4  ;;  %s4419_s23 = int_to_ptr.vmem [resolvable:$false] %s4418_s23 }
 0x115   : > { %s4420_s22 = scalar_lea.vmem %s4419_s23, 64  ;;  %p4421_p6 = scmp.lt.s32.totalorder %s760_s20, %s4419_s23 }
 0x116   : > { %p4416_p10 = pnand %p4414_p12, %p5042_p13  ;;  %p4422_p4 = scmp.lt.s32.totalorder %s4420_s22, %s4413_s5 }
 0x118   : > { %p4417_p8 = pneg %p4416_p10  ;;  %p4423_p3 = por %p4422_p4, %p4421_p6 }
 0x11a   : > { %p4424_p0 = pnand %p4423_p3, %p4417_p8 }
 0x11c   : > { %4427 = shalt.err (!%p4424_p0)
}
 0x11d   : > { %p5976_p1 = scmp.ne.s32.totalorder %s5957_s26, 0  ;;  %s5977_s24 = sshll.u32 %s4982_s25, 7 }
 0x11e   : > { %s770_s2 = scalar_lea.vmem [#allocation20], %s5977_s24  ;;  %s4805_s15 = smov [#allocation7]  }
 0x11f   : > { %3915 = dma.hbm_to_vmem [thread:$0]  (!%p5976_p1), %s5232_s4, 32, %s760_s20, %s5036_s30  }
 0x120   : > { %s777_s13 = sshll.u32 %s770_s2, 4  ;;  %s5263_s1 = sshll.u32 %s4805_s15, 4  ;;  %s5261_s13 = int_to_ptr.vmem [resolvable:$true] %s777_s13  ;;  %s555_s1 = int_to_ptr.vmem [resolvable:$true] %s5263_s1 }
 0x121   : > { %s4428_s17 = scalar_lea.hbm %s5239_s6, 2048  ;;  %s4433_s5 = scalar_lea.hbm %s5877_s12, 4096 }
 0x122   : > { %p4429_p3 = scmp.ne.s32.totalorder %s5239_s6, %s4428_s17  ;;  %p4434_p5 = scmp.lt.u32.totalorder %s5239_s6, %s5877_s12 }
 0x123   : > { %p4435_p2 = scmp.lt.u32.totalorder %s4433_s5, %s4428_s17  ;;  %p4437_p12 = scmp.lt.u32.totalorder %s4428_s17, %s5239_s6 }
 0x124   : > { %p4431_p9 = pnand %p4429_p3, %p5042_p13 }
 0x125   : > { %p4436_p7 = por %p4435_p2, %p4434_p5 }
 0x126   : > { %p4432_p11 = pneg %p4431_p9 }
 0x127   : > { %p4438_p10 = por %p4437_p12, %p4436_p7 }
 0x129   : > { %p4439_p8 = pnand %p4438_p10, %p4432_p11 }
 0x12b   : > { %4442 = shalt.err (!%p4439_p8)
}
 0x12c   : > { %s4443_s4 = scalar_lea.vmem %s5261_s13, 2048  ;;  %s4806_s20 = smov [#allocation20]  }
 0x12d   : > { %p4444_p6 = scmp.ne.s32.totalorder %s5261_s13, %s4443_s4  ;;  %s4448_s22 = sshll.u32 %s4806_s20, 4  ;;  %s4449_s22 = int_to_ptr.vmem [resolvable:$false] %s4448_s22 }
 0x12e   : > { %s4450_s24 = scalar_lea.vmem %s4449_s22, 4096  ;;  %p4451_p3 = scmp.lt.s32.totalorder %s5261_s13, %s4449_s22 }
 0x12f   : > { %p4446_p4 = pnand %p4444_p6, %p5042_p13  ;;  %p4452_p9 = scmp.lt.s32.totalorder %s4450_s24, %s4443_s4 }
 0x131   : > { %p4447_p0 = pneg %p4446_p4  ;;  %p4453_p5 = por %p4452_p9, %p4451_p3 }
 0x133   : > { %p4454_p2 = pnand %p4453_p5, %p4447_p0 }
 0x135   : > { %4457 = shalt.err (!%p4454_p2)
}
 0x136   : > { %3918 = dma.hbm_to_vmem [thread:$0]  (!%p5976_p1), %s5239_s6, 2048, %s5261_s13, %s5036_s30, %s5970_s29, %s5970_s29, %s5969_s18  }
 0x137   : > { %s5978_s17 = sld [smem:[#allocation44_spill]]  ;;  %p5979_p7 = scmp.ne.s32.totalorder %s5959_s28, 0 }
 0x13d   : > { %s4458_s3 = scalar_lea.hbm %s5978_s17, 32 }
 0x13e   : > { %p4459_p11 = scmp.ne.s32.totalorder %s5978_s17, %s4458_s3  ;;  %p4465_p8 = scmp.lt.u32.totalorder %s4458_s3, %s5978_s17 }
 0x140   : > { %p4461_p12 = pnand %p4459_p11, %p5979_p7 }
 0x142   : > { %p4462_p10 = pneg %p4461_p12 }
 0x144   : > { %p4467_p6 = pnand %p4465_p8, %p4462_p10 }
 0x146   : > { %4470 = shalt.err (!%p4467_p6)
}
 0x147   : > { %s4471_s4 = scalar_lea.vmem %s555_s1, 32  ;;  %p4479_p9 = scmp.lt.s32.totalorder %s555_s1, %s555_s1 }
 0x148   : > { %p4472_p4 = scmp.ne.s32.totalorder %s555_s1, %s4471_s4  ;;  %p4480_p5 = scmp.lt.s32.totalorder %s4471_s4, %s4471_s4 }
 0x14a   : > { %p4474_p0 = pnand %p4472_p4, %p5979_p7  ;;  %p4481_p2 = por %p4480_p5, %p4479_p9 }
 0x14c   : > { %p4475_p3 = pneg %p4474_p0 }
 0x14e   : > { %p4482_p1 = pnand %p4481_p2, %p4475_p3 }
 0x150   : > { %4485 = shalt.err (!%p4482_p1)
}
 0x151   : > { %s4807_s6 = smov 16   ;;  %s5980_s13 = sld [smem:[#allocation40_spill]] }
 0x152   : > { %s4808_s20 = smov 1   ;;  %s5982_s3 = sld [smem:[#allocation52_spill]] }
 0x153   : > { %s790_s5 = scalar_lea.vmem [#allocation21], %s4982_s25 }
 0x154   : > { %s797_s14 = sshll.u32 %s790_s5, 4  ;;  %s798_s14 = int_to_ptr.vmem [resolvable:$true] %s797_s14 }
 0x157   : > { %p5981_p11 = scmp.ne.s32.totalorder %s5980_s13, 0 }
 0x158   : > { %s5313_s27 = scalar_lea.hbm %s5982_s3, %s5122_s21 }
 0x159   : > { %3878 = dma.hbm_to_vmem [thread:$0]  (!%p5981_p11), %s5978_s17, 32, %s555_s1, [#allocation8], %s4807_s6, %s4807_s6, %s4808_s20  }
 0x15a   : > { %s4486_s23 = scalar_lea.hbm %s5313_s27, 16  ;;  %s4491_s1 = scalar_lea.hbm %s5982_s3, 32 }
 0x15b   : > { %p4487_p1 = scmp.ne.s32.totalorder %s5313_s27, %s4486_s23  ;;  %p4492_p8 = scmp.lt.u32.totalorder %s5313_s27, %s5982_s3 }
 0x15c   : > { %p4493_p6 = scmp.lt.u32.totalorder %s4491_s1, %s4486_s23  ;;  %p4495_p0 = scmp.lt.u32.totalorder %s4486_s23, %s5313_s27 }
 0x15d   : > { %p4489_p12 = pnand %p4487_p1, %p5042_p13 }
 0x15e   : > { %p4494_p4 = por %p4493_p6, %p4492_p8 }
 0x15f   : > { %p4490_p10 = pneg %p4489_p12 }
 0x160   : > { %p4496_p3 = por %p4495_p0, %p4494_p4 }
 0x162   : > { %p4497_p9 = pnand %p4496_p3, %p4490_p10 }
 0x164   : > { %4500 = shalt.err (!%p4497_p9)
}
 0x165   : > { %s4501_s24 = scalar_lea.vmem %s798_s14, 16  ;;  %s4809_s2 = smov [#allocation21]  }
 0x166   : > { %p4502_p5 = scmp.ne.s32.totalorder %s798_s14, %s4501_s24  ;;  %s4506_s15 = sshll.u32 %s4809_s2, 4  ;;  %s4507_s15 = int_to_ptr.vmem [resolvable:$false] %s4506_s15 }
 0x167   : > { %s4508_s5 = scalar_lea.vmem %s4507_s15, 32  ;;  %p4509_p12 = scmp.lt.s32.totalorder %s798_s14, %s4507_s15 }
 0x168   : > { %p4504_p2 = pnand %p4502_p5, %p5042_p13  ;;  %p4510_p11 = scmp.lt.s32.totalorder %s4508_s5, %s4501_s24 }
 0x16a   : > { %p4505_p1 = pneg %p4504_p2  ;;  %p4511_p7 = por %p4510_p11, %p4509_p12 }
 0x16c   : > { %p4512_p6 = pnand %p4511_p7, %p4505_p1 }
 0x16e   : > { %4515 = shalt.err (!%p4512_p6)
}
 0x16f   : > { %p5983_p8 = scmp.ne.s32.totalorder %s5957_s26, 0  ;;  %s4810_s23 = smov [#allocation9]  }
 0x170   : > { %s568_s4 = sshll.u32 %s4810_s23, 4  ;;  %s4811_s22 = smov [#allocation10]   ;;  %s569_s4 = int_to_ptr.vmem [resolvable:$true] %s568_s4 }
 0x171   : > { %3921 = dma.hbm_to_vmem [thread:$0]  (!%p5983_p8), %s5313_s27, 16, %s798_s14, %s5036_s30  }
 0x172   : > { %s579_s1 = sshll.u32 %s4811_s22, 4  ;;  %s5984_s2 = sld [smem:[#allocation45_spill]]  ;;  %s580_s1 = int_to_ptr.vmem [resolvable:$true] %s579_s1 }
 0x173   : > { %p5985_p11 = scmp.ne.s32.totalorder %s5959_s28, 0 }
 0x178   : > { %s4516_s3 = scalar_lea.hbm %s5984_s2, 16 }
 0x179   : > { %p4517_p7 = scmp.ne.s32.totalorder %s5984_s2, %s4516_s3  ;;  %p4523_p0 = scmp.lt.u32.totalorder %s4516_s3, %s5984_s2 }
 0x17b   : > { %p4519_p10 = pnand %p4517_p7, %p5985_p11 }
 0x17d   : > { %p4520_p4 = pneg %p4519_p10 }
 0x17f   : > { %p4525_p3 = pnand %p4523_p0, %p4520_p4 }
 0x181   : > { %4528 = shalt.err (!%p4525_p3)
}
 0x182   : > { %s4529_s27 = scalar_lea.vmem %s569_s4, 16  ;;  %s4536_s14 = scalar_lea.vmem %s569_s4, 32 }
 0x183   : > { %p4530_p9 = scmp.ne.s32.totalorder %s569_s4, %s4529_s27  ;;  %p4537_p1 = scmp.lt.s32.totalorder %s569_s4, %s569_s4 }
 0x184   : > { %p4538_p12 = scmp.lt.s32.totalorder %s4536_s14, %s4529_s27 }
 0x185   : > { %p4532_p5 = pnand %p4530_p9, %p5985_p11 }
 0x186   : > { %p4539_p6 = por %p4538_p12, %p4537_p1 }
 0x187   : > { %p4533_p2 = pneg %p4532_p5 }
 0x189   : > { %p4540_p8 = pnand %p4539_p6, %p4533_p2 }
 0x18b   : > { %4543 = shalt.err (!%p4540_p8)
}
 0x18c   : > { %p5986_p7 = scmp.ne.s32.totalorder %s5980_s13, 0  ;;  %s5987_s6 = sld [smem:[#allocation46_spill]] }
 0x18e   : > { %3881 = dma.hbm_to_vmem [thread:$0]  (!%p5986_p7), %s5984_s2, 16, %s569_s4, [#allocation8]  }
 0x192   : > { %s4544_s20 = scalar_lea.hbm %s5987_s6, 16 }
 0x193   : > { %p4545_p10 = scmp.ne.s32.totalorder %s5987_s6, %s4544_s20  ;;  %p4551_p8 = scmp.lt.u32.totalorder %s4544_s20, %s5987_s6 }
 0x195   : > { %p4547_p4 = pnand %p4545_p10, %p5985_p11 }
 0x197   : > { %p4548_p0 = pneg %p4547_p4 }
 0x199   : > { %p4553_p3 = pnand %p4551_p8, %p4548_p0 }
 0x19b   : > { %4556 = shalt.err (!%p4553_p3)
}
 0x19c   : > { %s4557_s14 = scalar_lea.vmem %s580_s1, 16  ;;  %s4564_s4 = scalar_lea.vmem %s580_s1, 32 }
 0x19d   : > { %p4558_p9 = scmp.ne.s32.totalorder %s580_s1, %s4557_s14  ;;  %p4565_p1 = scmp.lt.s32.totalorder %s580_s1, %s580_s1 }
 0x19e   : > { %p4566_p12 = scmp.lt.s32.totalorder %s4564_s4, %s4557_s14 }
 0x19f   : > { %p4560_p5 = pnand %p4558_p9, %p5985_p11 }
 0x1a0   : > { %p4567_p6 = por %p4566_p12, %p4565_p1 }
 0x1a1   : > { %p4561_p2 = pneg %p4560_p5 }
 0x1a3   : > { %p4568_p13 = pnand %p4567_p6, %p4561_p2 }
 0x1a5   : > { %4571 = shalt.err (!%p4568_p13)
}
 0x1a6   : > { %3884 = dma.hbm_to_vmem [thread:$0]  (!%p5986_p7), %s5987_s6, 16, %s580_s1, [#allocation11]  }
 0x1a7   : > { %s5988_s20 = sld [smem:[#allocation53_spill]]  ;;  %s807_s24 = scalar_lea.vmem [#allocation22], %s4982_s25 }
 0x1a8   : > { %s814_s5 = sshll.u32 %s807_s24, 4  ;;  %p5989_p10 = scmp.ne.s32.totalorder %s5965_s16, 0  ;;  %s815_s5 = int_to_ptr.vmem [resolvable:$true] %s814_s5 }
 0x1ad   : > { %s5374_s15 = scalar_lea.hbm %s5988_s20, %s5122_s21  ;;  %s4577_s1 = scalar_lea.hbm %s5988_s20, 32 }
 0x1ae   : > { %s4572_s27 = scalar_lea.hbm %s5374_s15, 16  ;;  %p4578_p8 = scmp.lt.u32.totalorder %s5374_s15, %s5988_s20 }
 0x1af   : > { %p4573_p13 = scmp.ne.s32.totalorder %s5374_s15, %s4572_s27  ;;  %p4579_p3 = scmp.lt.u32.totalorder %s4577_s1, %s4572_s27 }
 0x1b0   : > { %p4581_p5 = scmp.lt.u32.totalorder %s4572_s27, %s5374_s15 }
 0x1b1   : > { %p4575_p4 = pnand %p4573_p13, %p5989_p10  ;;  %p4580_p9 = por %p4579_p3, %p4578_p8 }
 0x1b3   : > { %p4576_p0 = pneg %p4575_p4  ;;  %p4582_p2 = por %p4581_p5, %p4580_p9 }
 0x1b5   : > { %p4583_p1 = pnand %p4582_p2, %p4576_p0 }
 0x1b7   : > { %4586 = shalt.err (!%p4583_p1)
}
 0x1b8   : > { %s4587_s7 = scalar_lea.vmem %s815_s5, 16  ;;  %s4812_s3 = smov [#allocation22]  }
 0x1b9   : > { %p4588_p12 = scmp.ne.s32.totalorder %s815_s5, %s4587_s7  ;;  %s4592_s24 = sshll.u32 %s4812_s3, 4  ;;  %s4593_s24 = int_to_ptr.vmem [resolvable:$false] %s4592_s24 }
 0x1ba   : > { %s4594_s14 = scalar_lea.vmem %s4593_s24, 32  ;;  %p4595_p4 = scmp.lt.s32.totalorder %s815_s5, %s4593_s24 }
 0x1bb   : > { %p4590_p6 = pnand %p4588_p12, %p5989_p10  ;;  %p4596_p7 = scmp.lt.s32.totalorder %s4594_s14, %s4587_s7 }
 0x1bd   : > { %p4591_p13 = pneg %p4590_p6  ;;  %p4597_p11 = por %p4596_p7, %p4595_p4 }
 0x1bf   : > { %p4598_p3 = pnand %p4597_p11, %p4591_p13 }
 0x1c1   : > { %4601 = shalt.err (!%p4598_p3)
}
 0x1c2   : > { %p5990_p8 = scmp.ne.s32.totalorder %s5957_s26, 0  ;;  %s4813_s27 = smov [#allocation24]  }
 0x1c3   : > { %s589_s4 = sshll.u32 %s4813_s27, 4  ;;  %s4814_s1 = smov [#allocation25]   ;;  %s590_s4 = int_to_ptr.vmem [resolvable:$true] %s589_s4 }
 0x1c4   : > { %3924 = dma.hbm_to_vmem [thread:$0]  (!%p5990_p8), %s5374_s15, 16, %s815_s5, %s5036_s30  }
 0x1c5   : > { %s603_s23 = sshll.u32 %s4814_s1, 4  ;;  %s5991_s2 = sld [smem:[#allocation55_spill]]  ;;  %s604_s23 = int_to_ptr.vmem [resolvable:$true] %s603_s23 }
 0x1c6   : > { %p5992_p7 = scmp.ne.s32.totalorder %s5959_s28, 0 }
 0x1cb   : > { %s4602_s6 = scalar_lea.hbm %s5991_s2, 1024 }
 0x1cc   : > { %p4603_p11 = scmp.ne.s32.totalorder %s5991_s2, %s4602_s6  ;;  %p4609_p5 = scmp.lt.u32.totalorder %s4602_s6, %s5991_s2 }
 0x1ce   : > { %p4605_p0 = pnand %p4603_p11, %p5992_p7 }
 0x1d0   : > { %p4606_p9 = pneg %p4605_p0 }
 0x1d2   : > { %p4611_p2 = pnand %p4609_p5, %p4606_p9 }
 0x1d4   : > { %4614 = shalt.err (!%p4611_p2)
}
 0x1d5   : > { %s4615_s15 = scalar_lea.vmem %s590_s4, 1024  ;;  %p4623_p13 = scmp.lt.s32.totalorder %s590_s4, %s590_s4 }
 0x1d6   : > { %p4616_p1 = scmp.ne.s32.totalorder %s590_s4, %s4615_s15  ;;  %p4624_p4 = scmp.lt.s32.totalorder %s4615_s15, %s4615_s15 }
 0x1d8   : > { %p4618_p12 = pnand %p4616_p1, %p5992_p7  ;;  %p4625_p3 = por %p4624_p4, %p4623_p13 }
 0x1da   : > { %p4619_p6 = pneg %p4618_p12 }
 0x1dc   : > { %p4626_p8 = pnand %p4625_p3, %p4619_p6 }
 0x1de   : > { %4629 = shalt.err (!%p4626_p8)
}
 0x1df   : > { %p5993_p11 = scmp.ne.s32.totalorder %s5980_s13, 0  ;;  %s5994_s1 = sld [smem:[#allocation56_spill]] }
 0x1e1   : > { %3887 = dma.hbm_to_vmem [thread:$0]  (!%p5993_p11), %s5991_s2, 1024, %s590_s4, [#allocation8], %s5970_s29, %s5970_s29, %s5969_s18  }
 0x1e5   : > { %s4630_s22 = scalar_lea.hbm %s5994_s1, 16 }
 0x1e6   : > { %p4631_p0 = scmp.ne.s32.totalorder %s5994_s1, %s4630_s22  ;;  %p4637_p5 = scmp.lt.u32.totalorder %s4630_s22, %s5994_s1 }
 0x1e8   : > { %p4633_p8 = pnand %p4631_p0, %p5992_p7 }
 0x1ea   : > { %p4634_p9 = pneg %p4633_p8 }
 0x1ec   : > { %p4639_p2 = pnand %p4637_p5, %p4634_p9 }
 0x1ee   : > { %4642 = shalt.err (!%p4639_p2)
}
 0x1ef   : > { %s4643_s15 = scalar_lea.vmem %s604_s23, 16  ;;  %s4650_s18 = scalar_lea.vmem %s604_s23, 32 }
 0x1f0   : > { %p4644_p1 = scmp.ne.s32.totalorder %s604_s23, %s4643_s15  ;;  %p4651_p13 = scmp.lt.s32.totalorder %s604_s23, %s604_s23 }
 0x1f1   : > { %p4652_p4 = scmp.lt.s32.totalorder %s4650_s18, %s4643_s15 }
 0x1f2   : > { %p4646_p12 = pnand %p4644_p1, %p5992_p7 }
 0x1f3   : > { %p4653_p3 = por %p4652_p4, %p4651_p13 }
 0x1f4   : > { %p4647_p6 = pneg %p4646_p12 }
 0x1f6   : > { %p4654_p10 = pnand %p4653_p3, %p4647_p6 }
 0x1f8   : > { %4657 = shalt.err (!%p4654_p10)
}
 0x1f9   : > { %3890 = dma.hbm_to_vmem [thread:$0]  (!%p5993_p11), %s5994_s1, 16, %s604_s23, [#allocation11]  }
 0x1fa   : > { %s5995_s28 = sld [smem:[#allocation54_spill]]  ;;  %s824_s22 = scalar_lea.vmem [#allocation23], %s4982_s25 }
 0x1fb   : > { %s831_s3 = sshll.u32 %s824_s22, 4  ;;  %p5997_p7 = scmp.ne.s32.totalorder %s5965_s16, 0  ;;  %s832_s3 = int_to_ptr.vmem [resolvable:$true] %s831_s3 }
 0x200   : > { %s5996_s5 = smov %s5995_s28  ;;  %s5438_s27 = scalar_lea.hbm %s5995_s28, %s5122_s21 }
 0x201   : > { %s4658_s13 = scalar_lea.hbm %s5438_s27, 16  ;;  %s4663_s23 = scalar_lea.hbm %s5996_s5, 32 }
 0x202   : > { %p4659_p10 = scmp.ne.s32.totalorder %s5438_s27, %s4658_s13  ;;  %p4664_p11 = scmp.lt.u32.totalorder %s5438_s27, %s5996_s5 }
 0x203   : > { %p4665_p9 = scmp.lt.u32.totalorder %s4663_s23, %s4658_s13  ;;  %p4667_p2 = scmp.lt.u32.totalorder %s4658_s13, %s5438_s27 }
 0x204   : > { %p4661_p0 = pnand %p4659_p10, %p5997_p7 }
 0x205   : > { %p4666_p5 = por %p4665_p9, %p4664_p11 }
 0x206   : > { %p4662_p8 = pneg %p4661_p0 }
 0x207   : > { %p4668_p1 = por %p4667_p2, %p4666_p5 }
 0x209   : > { %p4669_p12 = pnand %p4668_p1, %p4662_p8 }
 0x20b   : > { %4672 = shalt.err (!%p4669_p12)
}
 0x20c   : > { %s4673_s25 = scalar_lea.vmem %s832_s3, 16  ;;  %s4815_s21 = smov [#allocation23]  }
 0x20d   : > { %p4674_p6 = scmp.ne.s32.totalorder %s832_s3, %s4673_s25  ;;  %s4678_s18 = sshll.u32 %s4815_s21, 4  ;;  %s4679_s18 = int_to_ptr.vmem [resolvable:$false] %s4678_s18 }
 0x20e   : > { %s4680_s29 = scalar_lea.vmem %s4679_s18, 32  ;;  %p4681_p3 = scmp.lt.s32.totalorder %s832_s3, %s4679_s18 }
 0x20f   : > { %p4676_p13 = pnand %p4674_p6, %p5997_p7  ;;  %p4682_p10 = scmp.lt.s32.totalorder %s4680_s29, %s4673_s25 }
 0x211   : > { %p4677_p4 = pneg %p4676_p13  ;;  %p4683_p0 = por %p4682_p10, %p4681_p3 }
 0x213   : > { %p4684_p9 = pnand %p4683_p0, %p4677_p4 }
 0x215   : > { %4687 = shalt.err (!%p4684_p9)
}
 0x216   : > { %p5998_p11 = scmp.ne.s32.totalorder %s5957_s26, 0  ;;  %s5999_s4 = sld [smem:[#allocation39_spill]] }
 0x218   : > { %3927 = dma.hbm_to_vmem [thread:$0]  (!%p5998_p11), %s5438_s27, 16, %s832_s3, %s5036_s30  }
 0x21c   : > { %p6000_p8 = scmp.ne.s32.totalorder %s5999_s4, 0 }
 0x21d   : > { %s6001_s16 = sld [smem:[#allocation37_spill]] (!%p6000_p8) }
 0x21e   : > { %840 = sbr.rel (%p6000_p8) target bundleno = 5285 (0x14a5), region = 92 }
 0x223   : > { %p6002_p7 = scmp.eq.s32.totalorder (!%p6000_p8), %s6001_s16, 0 }
 0x225   : > { %4739 = dma.done.wait (%p6002_p7), [#allocation5], 128   ;;  %p6003_p5 = pmov %p6002_p7 }
 0x227   : > { %4741 = vsyncadd (%p6003_p5), [#allocation5], 4294967168  ;;  %p6004_p2 = pmov %p6003_p5 }
 0x229   : > { %4743 = dma.done.wait (%p6004_p2), [#allocation8], 48   ;;  %p6005_p1 = pmov %p6004_p2 }
 0x22b   : > { %4745 = vsyncadd (%p6005_p1), [#allocation8], 4294967248  ;;  %p6006_p12 = pmov %p6005_p1 }
 0x22c   : > { %p6007_p6 = pmov %p6005_p1 }
 0x22d   : > { %4747 = dma.done.wait (%p6006_p12), [#allocation11], 16  }
 0x22e   : > { %4749 = vsyncadd (%p6007_p6), [#allocation11], 4294967280  ;;  %s6008_s26 = sld [smem:[#allocation34_spill]]  ;;  %s6009_s30 = sld [smem:[#allocation38_spill]] }
 0x22f   : > { %s858_s8 = sand.u32 1, %s6001_s16  }
 0x230   : > { %s859_s27 = scalar_lea.sflag [#allocation5], %s858_s8 }
 0x234   : > { %s5475_s6 = sand.u32 1, %s6008_s26   ;;  %p6010_p13 = scmp.ne.s32.totalorder %s6009_s30, 0 }
 0x235   : > { %s3818_s28 = smul.u32 192, %s5475_s6 }
 0x237   : > { %s5478_s22 = scalar_lea.vmem [#allocation12], %s3818_s28 }
 0x238   : > { %4751 = dma.done.wait (%p6010_p13), %s859_s27, 8368  }
 0x239   : > { %4753 = vsyncadd (%p6010_p13), %s859_s27, 4294958928  ;;  %s3819_s3 = smul.u32 3, %s5475_s6  ;;  %s3431_s13 = sshll.u32 %s5475_s6, 6 }
 0x23a   : > { %s3432_s24 = sshll.u32 %s5475_s6, 7  ;;  %s3433_s7 = sshll.u32 %s5475_s6, 1 }
 0x23b   : > { %s5488_s23 = scalar_lea.vmem [#allocation13], %s3819_s3  ;;  %s5490_s14 = scalar_lea.vmem [#allocation14], %s3431_s13 }
 0x23c   : > { %s888_s15 = scalar_lea.vmem [#allocation15], %s5475_s6  ;;  %s896_s25 = scalar_lea.vmem [#allocation16], %s5475_s6 }
 0x23d   : > { %s904_s21 = scalar_lea.vmem [#allocation17], %s5475_s6  ;;  %s5495_s18 = scalar_lea.vmem [#allocation18], %s3432_s24 }
 0x23e   : > { %s5497_s29 = scalar_lea.vmem [#allocation19], %s3433_s7  ;;  %s5499_s4 = scalar_lea.vmem [#allocation20], %s3432_s24 }
 0x23f   : > { %s939_s26 = scalar_lea.vmem [#allocation21], %s5475_s6  ;;  %s947_s30 = scalar_lea.vmem [#allocation22], %s5475_s6 }
 0x240   : > { %s955_s8 = scalar_lea.vmem [#allocation23], %s5475_s6  ;;  %p6011_p4 = pmov %p6005_p1 }
 0x241   : > { %p6012_p3 = pmov %p6005_p1 }
 0x242   : > { %4755 = dma.done.wait (%p6011_p4), [#allocation8], 1024  }
 0x243   : > { %4757 = vsyncadd (%p6012_p3), [#allocation8], 4294966272  ;;  %p6013_p10 = pmov %p6005_p1 }
 0x244   : > { %p6014_p0 = pmov %p6005_p1 }
 0x245   : > { %4759 = dma.done.wait (%p6013_p10), [#allocation11], 16  }
 0x246   : > { %4761 = vsyncadd (%p6014_p0), [#allocation11], 4294967280  ;;  %s6015_s28 = sld [smem:[#allocation36_spill]] }
 0x24c   : > { %p3437_p9 = scmp.ne.s32.totalorder %s6015_s28, 0 }
 0x24d   : > { %v3574_v0 = vld [vmem:[#allocation4] sm:$0xff] (!%p3437_p9)   ;;  %v3438_v18 = vld [vmem:[#allocation9] ss:$0 sm:$0xff] (!%p3437_p9)  ;;  %v3439_v20 = vld [vmem:[#allocation10] ss:$0 sm:$0xff] (!%p3437_p9) }
 0x24e   : > { %1067 = sbr.rel (%p3437_p9) target bundleno = 908 (0x38c), region = 168  ;;  %v3575_v1 = vunpack.c.l.bf16 (!%p3437_p9), %v3574_v0  ;;  %v3576_v2 = vunpack.c.h.bf16 (!%p3437_p9), %v3574_v0 }
 0x250   : > { %1074 = vadd.xlane.f32.xlu0 (!%p3437_p9), %v3575_v1 }
 0x254   : > { %1076 = vadd.xlane.f32.xlu0 (!%p3437_p9), %v3576_v2 }
 0x2dd   : > { %v1075_v3 = vpop.xlane.xlu0 %1074 }
 0x2de   : > { %v1079_v4 = vmul.f32 0.0078125, %v1075_v3 }
 0x2e0   : > { %v1081_v5 = vsub.f32 %v3575_v1, %v1079_v4 }
 0x2e1   : > { %v1077_v6 = vpop.xlane.xlu0 %1076 }
 0x2e2   : > { %v1080_v7 = vmul.f32 0.0078125, %v1077_v6  ;;  %v1083_v8 = vmul.f32 %v1081_v5, %v1081_v5 }
 0x2e4   : > { %v1082_v9 = vsub.f32 %v3576_v2, %v1080_v7  ;;  %1085 = vadd.xlane.f32.xlu1 %v1083_v8 }
 0x2e6   : > { %v1084_v10 = vmul.f32 %v1082_v9, %v1082_v9 }
 0x2e8   : > { %1087 = vadd.xlane.f32.xlu1 %v1084_v10 }
 0x371   : > { %v1086_v11 = vpop.xlane.xlu1 %1085 }
 0x372   : > { %v1089_v12 = vmul.f32 0.0078125, %v1086_v11 }
 0x374   : > { %v1091_v13 = vadd.f32 1e-12, %v1089_v12 }
 0x375   : > { %v1088_v14 = vpop.xlane.xlu1 %1087 }
 0x376   : > { %4017 = vrsqrt.f32 %v1091_v13  ;;  %v1090_v15 = vmul.f32 0.0078125, %v1088_v14 }
 0x378   : > { %v1092_v16 = vadd.f32 1e-12, %v1090_v15 }
 0x37a   : > { %4019 = vrsqrt.f32 %v1092_v16 }
 0x380   : > { %v4018_v17 = vpop.eup %4017 }
 0x381   : > { %v1095_v19 = vmul.f32 %v4018_v17, %v1081_v5 }
 0x383   : > { %v1103_v21 = vmul.f32 %v3438_v18, %v1095_v19 }
 0x384   : > { %v4020_v22 = vpop.eup %4019 }
 0x385   : > { %v1111_v23 = vadd.f32 %v3439_v20, %v1103_v21  ;;  %v1096_v24 = vmul.f32 %v4020_v22, %v1082_v9 }
 0x387   : > { %1113 = vst [vmem:[#allocation2] sm:$0xff] %v1111_v23  ;;  %v1104_v25 = vmul.f32 %v3438_v18, %v1096_v24 }
 0x389   : > { %v1112_v26 = vadd.f32 %v3439_v20, %v1104_v25 }
 0x38b   : > { %1114 = vst [vmem:[#allocation2 + $0x8] sm:$0xff] %v1112_v26 }
 0x38c PF: > { %v4021_v27 = vld [vmem:[%s5478_s22 + $0x4] ss:$12 sps:$4 sm:$0xff]   ;;  %v4023_v28 = vld [vmem:[%s5478_s22] ss:$12 sps:$4 sm:$0xff]   ;;  %v4816_v29 = vmov 0   ;;  %v4817_v30 = vmov 0.0   ;;  %v1152_v56 = vlaneseq }
 0x38d   : > { %1327 = vmatprep.mubr.bf16.mxu0 %v4816_v29  ;;  %3658 = vmatprep.subr.bf16.mxu1 %v4817_v30  ;;  %v4024_v31 = vld [vmem:[%s5478_s22 + $0x1c] ss:$12 sps:$4 sm:$0xff]   ;;  %v4026_v32 = vld [vmem:[%s5478_s22 + $0x18] ss:$12 sps:$4 sm:$0xff]   ;;  %v4027_v33 = vld [vmem:[%s5478_s22 + $0x34] ss:$12 sps:$4 sm:$0xff]  }
 0x38e   : > { %1295 = vmatprep.subr.bf16.mxu0 %v4021_v27  ;;  %v4029_v34 = vld [vmem:[%s5478_s22 + $0x30] ss:$12 sps:$4 sm:$0xff]   ;;  %v4030_v35 = vld [vmem:[%s5478_s22 + $0x4c] ss:$12 sps:$4 sm:$0xff]   ;;  %v4032_v36 = vld [vmem:[%s5478_s22 + $0x48] ss:$12 sps:$4 sm:$0xff]  }
 0x38f   : > { %1296 = vmatpush1.bf16.msra.mxu0 %v4023_v28  ;;  %v4033_v37 = vld [vmem:[%s5478_s22 + $0x64] ss:$12 sps:$4 sm:$0xff]   ;;  %v4045_v38 = vld [vmem:[%s5478_s22 + $0x8] ss:$12 sps:$4 sm:$0xff]   ;;  %v4046_v39 = vld [vmem:[%s5478_s22 + $0x20] ss:$12 sps:$4 sm:$0xff]  }
 0x390   : > { %1297 = vmatprep.subr.bf16.mxu0 %v4024_v31  ;;  %3659 = vmatpush3.bf16.msra.mxu1 %v4045_v38  ;;  %v4035_v40 = vld [vmem:[%s5478_s22 + $0x60] ss:$12 sps:$4 sm:$0xff]   ;;  %v4036_v41 = vld [vmem:[%s5478_s22 + $0x7c] ss:$12 sps:$4 sm:$0xff]   ;;  %v4047_v42 = vld [vmem:[%s5478_s22 + $0x38] ss:$12 sps:$4 sm:$0xff]  }
 0x391   : > { %3660 = vmatprep.subr.bf16.mxu1 %v4817_v30  ;;  %v4038_v43 = vld [vmem:[%s5478_s22 + $0x78] ss:$12 sps:$4 sm:$0xff]   ;;  %v4039_v44 = vld [vmem:[%s5478_s22 + $0x94] ss:$12 sps:$4 sm:$0xff]   ;;  %v4048_v45 = vld [vmem:[%s5478_s22 + $0x50] ss:$12 sps:$4 sm:$0xff]  }
 0x392   : > { %v4041_v46 = vld [vmem:[%s5478_s22 + $0x90] ss:$12 sps:$4 sm:$0xff]   ;;  %v4042_v47 = vld [vmem:[%s5478_s22 + $0xac] ss:$12 sps:$4 sm:$0xff]   ;;  %v4049_v48 = vld [vmem:[%s5478_s22 + $0x68] ss:$12 sps:$4 sm:$0xff]  }
 0x393   : > { %1298 = vmatpush1.bf16.msra.mxu0 %v4026_v32  ;;  %v4044_v49 = vld [vmem:[%s5478_s22 + $0xa8] ss:$12 sps:$4 sm:$0xff]   ;;  %v5539_v50 = vld [vmem:[#allocation2] sm:$0xff]  ;;  %vm4818_vm0 = vmmov 0   ;;  %v5560_v57 = vshrl.u32 %v1152_v56, 7  ;;  %vm1413_vm1 = vcmask 261120  }
 0x394   : > { %1299 = vmatprep.subr.bf16.mxu0 %v4027_v33  ;;  %3661 = vmatpush3.bf16.msra.mxu1 %v4046_v39  ;;  %v5541_v51 = vld [vmem:[#allocation2 + $0x8] sm:$0xff]  ;;  %v4052_v55 = vld [vmem:[%s5478_s22 + $0xb0] ss:$12 sps:$4 sm:$0xff]   ;;  %vm1534_vm2 = vcmask 1043456   ;;  %v5597_v25 = vld [vmem:[#allocation7] ss:$0 sm:$0xff] }
 0x395   : > { %3662 = vmatprep.subr.bf16.mxu1 %v4817_v30  ;;  %v4050_v52 = vld [vmem:[%s5478_s22 + $0x80] ss:$12 sps:$4 sm:$0xff]   ;;  %v1117_v53 = vpack.c.bf16 %v5541_v51, %v5539_v50  ;;  %v4051_v54 = vld [vmem:[%s5478_s22 + $0x98] ss:$12 sps:$4 sm:$0xff]   ;;  %3674 = vmatprep.mubr.msk.bf16.mxu1 %vm4818_vm0, %v4817_v30  ;;  %v1158_v58 = vsub.s32 1, %v5560_v57  ;;  %v1154_v60 = vsub.s32 0, %v5560_v57 }
 0x396   : > { %v1150_v59 = vld [vmem:[%s5488_s23] sm:$0x7]  ;;  %v1162_v15 = vsub.s32 2, %v5560_v57  ;;  %vm1506_vm3 = vcmask 64512   ;;  %s4819_s16 = smov 96   ;;  %vm1626_vm4 = vcmask 257024  }
 0x397   : > { %1300 = vmatpush1.bf16.msra.mxu0 %v4029_v34  ;;  %v1159_v61 = vrot.slane %v1150_v59, %v1158_v58  ;;  %v1155_v62 = vrot.slane %v1150_v59, %v1154_v60  ;;  %v5601_v34 = vld [vmem:[#allocation7 + $0x1] ss:$0 sm:$0xff]  ;;  %s4820_s27 = smov 64   ;;  %s4821_s22 = smov 32   ;;  %vm1863_vm5 = vcmask 519424   ;;  %vm2100_vm6 = vcmask 781824  }
 0x398   : > { %1301 = vmatprep.subr.bf16.mxu0 %v4030_v35  ;;  %3663 = vmatpush3.bf16.msra.mxu1 %v4047_v42  ;;  %v1163_v16 = vrot.slane %v1150_v59, %v1162_v15  ;;  %vm2337_vm7 = vcmask 1044224   ;;  %s6016_s3 = sld [smem:[#allocation36_spill]] }
 0x399   : > { %3664 = vmatprep.subr.bf16.mxu1 %v4817_v30 }
 0x39b   : > { %1302 = vmatpush1.bf16.msra.mxu0 %v4032_v36 }
 0x39c   : > { %1303 = vmatprep.subr.bf16.mxu0 %v4033_v37  ;;  %3665 = vmatpush3.bf16.msra.mxu1 %v4048_v45 }
 0x39d   : > { %3666 = vmatprep.subr.bf16.mxu1 %v4817_v30 }
 0x39e   : > { %p3541_p11 = scmp.ne.s32.totalorder %s6016_s3, 1 }
 0x39f   : > { %1304 = vmatpush1.bf16.msra.mxu0 %v4035_v40  ;;  %vm4823_vm8 = vmmov (!%p3541_p11), 0   ;;  %vm2920_vm9 = vcmask (!%p3541_p11), 1040384  }
 0x3a0   : > { %1305 = vmatprep.subr.bf16.mxu0 %v4036_v41  ;;  %3667 = vmatpush3.bf16.msra.mxu1 %v4049_v48 }
 0x3a1   : > { %3668 = vmatprep.subr.bf16.mxu1 %v4817_v30 }
 0x3a3   : > { %1306 = vmatpush1.bf16.msra.mxu0 %v4038_v43 }
 0x3a4   : > { %1307 = vmatprep.subr.bf16.mxu0 %v4039_v44  ;;  %3669 = vmatpush3.bf16.msra.mxu1 %v4050_v52 }
 0x3a5   : > { %3670 = vmatprep.subr.bf16.mxu1 %v4817_v30 }
 0x3a7   : > { %1308 = vmatpush1.bf16.msra.mxu0 %v4041_v46 }
 0x3a8   : > { %1309 = vmatprep.subr.bf16.mxu0 %v4042_v47  ;;  %3671 = vmatpush3.bf16.msra.mxu1 %v4051_v54 }
 0x3a9   : > { %3672 = vmatprep.subr.bf16.mxu1 %v4817_v30 }
 0x3ab   : > { %1310 = vmatpush1.bf16.msra.mxu0 %v4044_v49 }
 0x3ac   : > { %3702 = vmatprep.subr.bf16.mxu0 %v4817_v30  ;;  %3673 = vmatpush3.bf16.msra.mxu1 %v4052_v55 }
 0x3ad   : > { %3678 = vmatprep.subr.bf16.mxu1 %v4817_v30 }
 0x3ae   : > { %1328 = vmatmul.mubr.bf16.vlgmr.msra.gmra.mrb[0].mxu0 %v1117_v53 }
 0x3af   : > { %3704 = vmatprep.mubr.msk.bf16.mxu0 %vm4818_vm0, %v4817_v30  ;;  %3675 = vmatmul.mubr.bf16.vlgmr.msra.gmra.mrb[0].mxu1 %v1117_v53 }
 0x3b0   : > { %3680 = vmatprep.mubr.msk.bf16.mxu1 %vm4818_vm0, %v4817_v30 }
 0x481   : > { %v1329_v63 = vpop.f32.mrb[0].mxu0 }
 0x482   : > { %v1331_v0 = vpop.f32.mrb[1].mxu0  ;;  %v1330_v4 = vadd.f32 %v1329_v63, %v1155_v62  ;;  %v1372_v17 = vpop.f32.mrb[0].mxu1 }
 0x483   : > { %v1332_v1 = vadd.f32 %v1331_v0, %v1159_v61  ;;  %v1333_v2 = vpop.f32.mrb[2].mxu0  ;;  %v1373_v18 = vadd.f32 %v1372_v17, %v1163_v16  ;;  %v3676_v19 = vpop.f32.mrb[1].mxu1 }
 0x484   : > { %v1335_v3 = vpop.f32.mrb[3].mxu0  ;;  %v1379_v8 = vmul.f32 0.17677669, %v1330_v4  ;;  %v1334_v11 = vadd.f32 %v1333_v2, %v1155_v62  ;;  %v1375_v20 = vpop.f32.mrb[2].mxu1 }
 0x485   : > { %v5569_v5 = vpack.c.bf16 %v1332_v1, %v1332_v1  ;;  %v1336_v6 = vadd.f32 %v1335_v3, %v1159_v61  ;;  %v5592_v21 = vpack.c.bf16 %v1373_v18, %v1373_v18  ;;  %v1376_v22 = vadd.f32 %v1375_v20, %v1163_v16  ;;  %v3677_v23 = vpop.f32.mrb[3].mxu1 }
 0x486   : > { %v5576_v10 = vpack.c.bf16 %v1379_v8, %v1379_v8  ;;  %v1380_v13 = vmul.f32 0.17677669, %v1334_v11 }
 0x487   : > { %v1418_v7 = vsel %vm1413_vm1, %v5569_v5, 0  ;;  %v5574_v9 = vpack.c.bf16 %v1336_v6, %v1336_v6  ;;  %v1536_v24 = vsel %vm1534_vm2, %v5592_v21, 0  ;;  %v5617_v59 = vpack.c.bf16 %v1376_v22, %v1376_v22 }
 0x488   : > { %3679 = vmatpush3.bf16.xpose.msra.mxu1 %v1418_v7  ;;  %v5585_v14 = vpack.c.bf16 %v1380_v13, %v1380_v13 }
 0x489   : > { %3684 = vmatprep.subr.bf16.mxu1 %v4817_v30  ;;  %v1464_v12 = vsel %vm1413_vm1, %v5574_v9, 0  ;;  %v1582_v63 = vsel %vm1534_vm2, %v5617_v59, 0 }
 0x48f   : > { %3681 = vmatmul.mubr.msk.bf16.vlgmr.msra.gmra.mrb[4].mxu1 %vm1413_vm1, %v5576_v10 }
 0x490   : > { %3685 = vmatpush3.bf16.xpose.msra.mxu1 %v1464_v12  ;;  %3686 = vmatprep.mubr.msk.bf16.mxu1 %vm4818_vm0, %v4817_v30 }
 0x491   : > { %3690 = vmatprep.subr.bf16.mxu1 %v4817_v30 }
 0x497   : > { %3687 = vmatmul.mubr.msk.bf16.vlgmr.msra.gmra.mrb[8].mxu1 %vm1413_vm1, %v5585_v14 }
 0x498   : > { %3692 = vmatprep.mubr.msk.bf16.mxu1 %vm4818_vm0, %v4817_v30  ;;  %3691 = vmatpush3.bf16.msra.mxu1 %v1536_v24 }
 0x499   : > { %3696 = vmatprep.subr.bf16.mxu1 %v4817_v30 }
 0x562   : > { %v1454_v26 = vpop.f32.mrb[4].mxu1 }
 0x563   : > { %v1455_v27 = vadd.f32 %v5597_v25, %v1454_v26  ;;  %v3682_v28 = vpop.f32.mrb[5].mxu1 }
 0x564   : > { %v1457_v31 = vpop.f32.mrb[6].mxu1 }
 0x565   : > { %v3683_v32 = vpop.f32.mrb[7].mxu1  ;;  %v1507_v33 = vsel %vm1506_vm3, %v1455_v27, -inf }
 0x566   : > { %1508 = vmax.xlane.f32.xlu0 %v1507_v33 }
 0x56a   : > { %v1500_v35 = vpop.f32.mrb[8].mxu1 }
 0x56b   : > { %v1501_v36 = vadd.f32 %v5601_v34, %v1500_v35  ;;  %v3688_v37 = vpop.f32.mrb[9].mxu1 }
 0x56c   : > { %v1503_v38 = vpop.f32.mrb[10].mxu1 }
 0x56d   : > { %v3689_v39 = vpop.f32.mrb[11].mxu1  ;;  %v1510_v40 = vsel %vm1506_vm3, %v1501_v36, -inf }
 0x56e   : > { %1511 = vmax.xlane.f32.xlu0 %v1510_v40 }
 0x584   : > { %1631 = vrot.lane.b32.xlu0 %v5569_v5, %s4819_s16 }
 0x5f3   : > { %v1509_v41 = vpop.xlane.xlu0 %1508 }
 0x5f4   : > { %v1513_v42 = vsub.f32 %v1455_v27, %v1509_v41 }
 0x5f6   : > { %v1515_v43 = vmul.f32 1.442695, %v1513_v42 }
 0x5f8   : > { %4102 = vpow2.f32 %v1515_v43 }
 0x5fb   : > { %v1512_v44 = vpop.xlane.xlu0 %1511 }
 0x5fc   : > { %v1514_v49 = vsub.f32 %v1501_v36, %v1512_v44 }
 0x5fe   : > { %v1517_v52 = vmul.f32 1.442695, %v1514_v49 }
 0x5ff   : > { %v1632_v45 = vpop.permute.xlu0 %1631 }
 0x600   : > { %v1637_v46 = vsel %vm1413_vm1, %v1632_v45, 0  ;;  %4104 = vpow2.f32 %v1517_v52 }
 0x601   : > { %3703 = vmatpush3.bf16.xpose.msra.mxu0 %v1637_v46 }
 0x602   : > { %v4103_v47 = vpop.eup %4102  ;;  %3714 = vmatprep.subr.bf16.mxu0 %v4817_v30 }
 0x603   : > { %v1519_v48 = vsel %vm1506_vm3, %v4103_v47, 0.0 }
 0x604   : > { %1520 = vadd.xlane.f32.xlu1 %v1519_v48 }
 0x60a   : > { %v4105_v53 = vpop.eup %4104 }
 0x60b   : > { %v1522_v54 = vsel %vm1506_vm3, %v4105_v53, 0.0 }
 0x615   : > { %1681 = vrot.lane.b32.xlu1 %v5574_v9, %s4819_s16 }
 0x639   : > { %1523 = vadd.xlane.f32.xlu1 %v1522_v54 }
 0x64a   : > { %1629 = vrot.lane.b32.xlu1 %v5576_v10, %s4819_s16 }
 0x64e   : > { %1679 = vrot.lane.b32.xlu1 %v5585_v14, %s4819_s16 }
 0x691   : > { %v1521_v55 = vpop.xlane.xlu1 %1520 }
 0x692   : > { %4106 = vrcp.f32 %v1521_v55 }
 0x695   : > { %v1682_v0 = vpop.permute.xlu1 %1681 }
 0x696   : > { %v1687_v7 = vsel %vm1413_vm1, %v1682_v0, 0 }
 0x69c   : > { %v4107_v56 = vpop.eup %4106 }
 0x69d   : > { %v1527_v61 = vmul.f32 %v4107_v56, %v4103_v47 }
 0x69f   : > { %v1529_v62 = vpack.c.bf16 %v1527_v61, %v1527_v61 }
 0x6a1   : > { %3693 = vmatmul.mubr.msk.bf16.vlgmr.msra.gmra.mrb[12].mxu1 %vm1506_vm3, %v1529_v62 }
 0x6a2   : > { %3697 = vmatpush3.bf16.msra.mxu1 %v1582_v63  ;;  %3698 = vmatprep.mubr.msk.bf16.mxu1 %vm4818_vm0, %v4817_v30 }
 0x6a3   : > { %3708 = vmatprep.subr.bf16.mxu1 %v4817_v30 }
 0x6c6   : > { %v1524_v1 = vpop.xlane.xlu1 %1523 }
 0x6c7   : > { %4108 = vrcp.f32 %v1524_v1 }
 0x6ca   : > { %v1630_v2 = vpop.permute.xlu1 %1629 }
 0x6cb   : > { %3705 = vmatmul.mubr.msk.bf16.vlgmr.msra.gmra.mrb[4].mxu0 %vm1413_vm1, %v1630_v2 }
 0x6cc   : > { %3716 = vmatprep.mubr.msk.bf16.mxu0 %vm4818_vm0, %v4817_v30 }
 0x6ce   : > { %v1680_v8 = vpop.permute.xlu1 %1679 }
 0x6d1   : > { %v4109_v3 = vpop.eup %4108 }
 0x6d2   : > { %v1528_v4 = vmul.f32 %v4109_v3, %v4105_v53 }
 0x6d4   : > { %v1530_v6 = vpack.c.bf16 %v1528_v4, %v1528_v4 }
 0x6d6   : > { %3699 = vmatmul.mubr.msk.bf16.vlgmr.msra.gmra.mrb[16].mxu1 %vm1506_vm3, %v1530_v6 }
 0x6d7   : > { %3709 = vmatpush3.bf16.xpose.msra.mxu1 %v1687_v7  ;;  %3710 = vmatprep.mubr.msk.bf16.mxu1 %vm4818_vm0, %v4817_v30 }
 0x6d8   : > { %3720 = vmatprep.subr.bf16.mxu1 %v4817_v30 }
 0x6de   : > { %3711 = vmatmul.mubr.msk.bf16.vlgmr.msra.gmra.mrb[20].mxu1 %vm1413_vm1, %v1680_v8 }
 0x6df   : > { %3722 = vmatprep.mubr.msk.bf16.mxu1 %vm4818_vm0, %v4817_v30 }
 0x774   : > { %v1572_v11 = vpop.f32.mrb[12].mxu1 }
 0x775   : > { %v1624_v12 = vpack.c.bf16 %v1572_v11, %v1572_v11  ;;  %v3694_v13 = vpop.f32.mrb[13].mxu1 }
 0x776   : > { %v1575_v15 = vpop.f32.mrb[14].mxu1 }
 0x777   : > { %1627 = vst.msk [vmem:[#allocation3] sm:$0xf] %vm1626_vm4, %v1624_v12  ;;  %v3695_v16 = vpop.f32.mrb[15].mxu1 }
 0x79e   : > { %v1673_v17 = vpop.f32.mrb[4].mxu0 }
 0x79f   : > { %v1674_v18 = vadd.f32 %v5597_v25, %v1673_v17  ;;  %v3706_v19 = vpop.f32.mrb[5].mxu0 }
 0x7a0   : > { %v1676_v20 = vpop.f32.mrb[6].mxu0 }
 0x7a1   : > { %v3707_v22 = vpop.f32.mrb[7].mxu0  ;;  %v1729_v23 = vsel %vm1506_vm3, %v1674_v18, -inf }
 0x7a2   : > { %1730 = vmax.xlane.f32.xlu0 %v1729_v23 }
 0x7a9   : > { %v1618_v24 = vpop.f32.mrb[16].mxu1 }
 0x7aa   : > { %v1625_v26 = vpack.c.bf16 %v1618_v24, %v1618_v24  ;;  %v3700_v27 = vpop.f32.mrb[17].mxu1 }
 0x7ab   : > { %v1621_v28 = vpop.f32.mrb[18].mxu1 }
 0x7ac   : > { %1628 = vst.msk [vmem:[#allocation3 + $0x4] sm:$0xf] %vm1626_vm4, %v1625_v26  ;;  %v3701_v31 = vpop.f32.mrb[19].mxu1 }
 0x7b1   : > { %v1723_v32 = vpop.f32.mrb[20].mxu1 }
 0x7b2   : > { %v1724_v33 = vadd.f32 %v5601_v34, %v1723_v32  ;;  %v3712_v35 = vpop.f32.mrb[21].mxu1 }
 0x7b3   : > { %v1726_v36 = vpop.f32.mrb[22].mxu1 }
 0x7b4   : > { %v3713_v37 = vpop.f32.mrb[23].mxu1  ;;  %v1732_v38 = vsel %vm1506_vm3, %v1724_v33, -inf }
 0x7b5   : > { %1733 = vmax.xlane.f32.xlu1 %v1732_v38 }
 0x7c6   : > { %1801 = vrot.lane.b32.xlu1 %v5617_v59, %s4819_s16 }
 0x7ca   : > { %1868 = vrot.lane.b32.xlu1 %v5569_v5, %s4820_s27 }
 0x7ce   : > { %1918 = vrot.lane.b32.xlu1 %v5574_v9, %s4820_s27 }
 0x7d2   : > { %1916 = vrot.lane.b32.xlu1 %v5585_v14, %s4820_s27 }
 0x82f   : > { %v1731_v39 = vpop.xlane.xlu0 %1730 }
 0x830   : > { %v1735_v40 = vsub.f32 %v1674_v18, %v1731_v39 }
 0x832   : > { %v1737_v41 = vmul.f32 1.442695, %v1735_v40 }
 0x834   : > { %4110 = vpow2.f32 %v1737_v41 }
 0x83e   : > { %v4111_v42 = vpop.eup %4110 }
 0x83f   : > { %v1741_v43 = vsel %vm1506_vm3, %v4111_v42, 0.0 }
 0x840   : > { %1742 = vadd.xlane.f32.xlu0 %v1741_v43 }
 0x842   : > { %v1734_v44 = vpop.xlane.xlu1 %1733 }
 0x843   : > { %v1736_v45 = vsub.f32 %v1724_v33, %v1734_v44 }
 0x845   : > { %v1739_v46 = vmul.f32 1.442695, %v1736_v45 }
 0x846   : > { %v1802_v47 = vpop.permute.xlu1 %1801 }
 0x847   : > { %4112 = vpow2.f32 %v1739_v46  ;;  %v1807_v48 = vsel %vm1534_vm2, %v1802_v47, 0 }
 0x848   : > { %3721 = vmatpush3.bf16.msra.mxu1 %v1807_v48 }
 0x849   : > { %3732 = vmatprep.subr.bf16.mxu1 %v4817_v30 }
 0x84a   : > { %v1869_v63 = vpop.permute.xlu1 %1868 }
 0x84b   : > { %v1874_v4 = vsel %vm1413_vm1, %v1869_v63, 0 }
 0x84e   : > { %v1919_v3 = vpop.permute.xlu1 %1918 }
 0x84f   : > { %v1924_v7 = vsel %vm1413_vm1, %v1919_v3, 0 }
 0x851   : > { %v4113_v49 = vpop.eup %4112 }
 0x852   : > { %v1744_v52 = vsel %vm1506_vm3, %v4113_v49, 0.0  ;;  %v1917_v11 = vpop.permute.xlu1 %1916 }
 0x853   : > { %1745 = vadd.xlane.f32.xlu0 %v1744_v52 }
 0x869   : > { %1753 = vrot.lane.b32.xlu0 %v5592_v21, %s4819_s16 }
 0x86d   : > { %1866 = vrot.lane.b32.xlu0 %v5576_v10, %s4820_s27 }
 0x8cd   : > { %v1743_v53 = vpop.xlane.xlu0 %1742 }
 0x8ce   : > { %4114 = vrcp.f32 %v1743_v53 }
 0x8d8   : > { %v4115_v54 = vpop.eup %4114 }
 0x8d9   : > { %v1749_v56 = vmul.f32 %v4115_v54, %v4111_v42 }
 0x8db   : > { %v1751_v0 = vpack.c.bf16 %v1749_v56, %v1749_v56 }
 0x8e0   : > { %v1746_v55 = vpop.xlane.xlu0 %1745 }
 0x8e1   : > { %4116 = vrcp.f32 %v1746_v55 }
 0x8e4   : > { %v1754_v61 = vpop.permute.xlu0 %1753 }
 0x8e5   : > { %v1759_v62 = vsel %vm1534_vm2, %v1754_v61, 0 }
 0x8e6   : > { %3715 = vmatpush3.bf16.msra.mxu0 %v1759_v62 }
 0x8e7   : > { %3726 = vmatprep.subr.bf16.mxu0 %v4817_v30 }
 0x8e8   : > { %v1867_v8 = vpop.permute.xlu0 %1866 }
 0x8e9   : > { %3717 = vmatmul.mubr.msk.bf16.vlgmr.msra.gmra.mrb[8].mxu0 %vm1506_vm3, %v1751_v0 }
 0x8ea   : > { %3728 = vmatprep.mubr.msk.bf16.mxu0 %vm4818_vm0, %v4817_v30 }
 0x8eb   : > { %v4117_v1 = vpop.eup %4116 }
 0x8ec   : > { %v1750_v2 = vmul.f32 %v4117_v1, %v4113_v49 }
 0x8ee   : > { %v1752_v6 = vpack.c.bf16 %v1750_v2, %v1750_v2 }
 0x8ef   : > { %3727 = vmatpush3.bf16.xpose.msra.mxu0 %v1874_v4 }
 0x8f0   : > { %3723 = vmatmul.mubr.msk.bf16.vlgmr.msra.gmra.mrb[24].mxu1 %vm1506_vm3, %v1752_v6  ;;  %3738 = vmatprep.subr.bf16.mxu0 %v4817_v30 }
 0x8f1   : > { %3733 = vmatpush3.bf16.xpose.msra.mxu1 %v1924_v7  ;;  %3734 = vmatprep.mubr.msk.bf16.mxu1 %vm4818_vm0, %v4817_v30 }
 0x8f2   : > { %3744 = vmatprep.subr.bf16.mxu1 %v4817_v30 }
 0x8f6   : > { %3729 = vmatmul.mubr.msk.bf16.vlgmr.msra.gmra.mrb[12].mxu0 %vm1413_vm1, %v1867_v8 }
 0x8f7   : > { %3740 = vmatprep.mubr.msk.bf16.mxu0 %vm4818_vm0, %v4817_v30 }
 0x8f8   : > { %3735 = vmatmul.mubr.msk.bf16.vlgmr.msra.gmra.mrb[28].mxu1 %vm1413_vm1, %v1917_v11 }
 0x8f9   : > { %3746 = vmatprep.mubr.msk.bf16.mxu1 %vm4818_vm0, %v4817_v30 }
 0x9bc   : > { %v5676_v12 = vpop.f32.mrb[8].mxu0 }
 0x9bd   : > { %v3718_v13 = vpop.f32.mrb[9].mxu0 }
 0x9be   : > { %v1798_v15 = vpop.f32.mrb[10].mxu0 }
 0x9bf   : > { %v3719_v16 = vpop.f32.mrb[11].mxu0 }
 0x9c3   : > { %v5678_v17 = vpop.f32.mrb[24].mxu1 }
 0x9c4   : > { %v3724_v18 = vpop.f32.mrb[25].mxu1 }
 0x9c5   : > { %v1846_v19 = vpop.f32.mrb[26].mxu1 }
 0x9c6   : > { %v3725_v20 = vpop.f32.mrb[27].mxu1 }
 0x9c9   : > { %v1910_v22 = vpop.f32.mrb[12].mxu0 }
 0x9ca   : > { %v1911_v23 = vadd.f32 %v5597_v25, %v1910_v22  ;;  %v3730_v24 = vpop.f32.mrb[13].mxu0 }
 0x9cb   : > { %v1913_v26 = vpop.f32.mrb[14].mxu0  ;;  %v1960_v27 = vpop.f32.mrb[28].mxu1 }
 0x9cc   : > { %v1961_v28 = vadd.f32 %v5601_v34, %v1960_v27  ;;  %v3731_v31 = vpop.f32.mrb[15].mxu0  ;;  %v3736_v32 = vpop.f32.mrb[29].mxu1  ;;  %v1966_v33 = vsel %vm1506_vm3, %v1911_v23, -inf }
 0x9cd   : > { %1967 = vmax.xlane.f32.xlu0 %v1966_v33  ;;  %v1963_v35 = vpop.f32.mrb[30].mxu1 }
 0x9ce   : > { %v3737_v36 = vpop.f32.mrb[31].mxu1  ;;  %v1969_v37 = vsel %vm1506_vm3, %v1961_v28, -inf }
 0x9cf   : > { %1970 = vmax.xlane.f32.xlu1 %v1969_v37 }
 0x9e0   : > { %2038 = vrot.lane.b32.xlu1 %v5617_v59, %s4820_s27 }
 0x9e4   : > { %2105 = vrot.lane.b32.xlu1 %v5569_v5, %s4821_s22 }
 0x9e8   : > { %2155 = vrot.lane.b32.xlu1 %v5574_v9, %s4821_s22 }
 0x9ec   : > { %2153 = vrot.lane.b32.xlu1 %v5585_v14, %s4821_s22 }
 0xa5a   : > { %v1968_v38 = vpop.xlane.xlu0 %1967 }
 0xa5b   : > { %v1972_v39 = vsub.f32 %v1911_v23, %v1968_v38 }
 0xa5c   : > { %v1971_v40 = vpop.xlane.xlu1 %1970 }
 0xa5d   : > { %v1974_v41 = vmul.f32 1.442695, %v1972_v39  ;;  %v1973_v42 = vsub.f32 %v1961_v28, %v1971_v40 }
 0xa5f   : > { %4118 = vpow2.f32 %v1974_v41  ;;  %v1976_v43 = vmul.f32 1.442695, %v1973_v42 }
 0xa60   : > { %v2039_v44 = vpop.permute.xlu1 %2038 }
 0xa61   : > { %4120 = vpow2.f32 %v1976_v43  ;;  %v2044_v45 = vsel %vm1534_vm2, %v2039_v44, 0 }
 0xa62   : > { %3745 = vmatpush3.bf16.msra.mxu1 %v2044_v45 }
 0xa63   : > { %3756 = vmatprep.subr.bf16.mxu1 %v4817_v30 }
 0xa64   : > { %v2106_v54 = vpop.permute.xlu1 %2105 }
 0xa68   : > { %v2156_v63 = vpop.permute.xlu1 %2155 }
 0xa69   : > { %v4119_v5 = vpop.eup %4118  ;;  %v2161_v1 = vsel %vm1413_vm1, %v2156_v63, 0  ;;  %v4054_v63 = vld [vmem:[%s5490_s14 + $0x8] sm:$0xff]  }
 0xa6a   : > { %v1978_v9 = vsel %vm1506_vm3, %v4119_v5, 0.0 }
 0xa6b   : > { %v4121_v46 = vpop.eup %4120  ;;  %1979 = vadd.xlane.f32.xlu0 %v1978_v9 }
 0xa6c   : > { %v1981_v14 = vsel %vm1506_vm3, %v4121_v46, 0.0  ;;  %v2154_v3 = vpop.permute.xlu1 %2153 }
 0xa6f   : > { %1982 = vadd.xlane.f32.xlu0 %v1981_v14 }
 0xa85   : > { %1990 = vrot.lane.b32.xlu0 %v5592_v21, %s4820_s27 }
 0xa89   : > { %2103 = vrot.lane.b32.xlu0 %v5576_v10, %s4821_s22  ;;  %v2111_v10 = vsel %vm1413_vm1, %v2106_v54, 0 }
 0xaf8   : > { %v1980_v47 = vpop.xlane.xlu0 %1979 }
 0xaf9   : > { %4122 = vrcp.f32 %v1980_v47 }
 0xafc   : > { %v1983_v48 = vpop.xlane.xlu0 %1982 }
 0xafd   : > { %4124 = vrcp.f32 %v1983_v48 }
 0xb00   : > { %v1991_v49 = vpop.permute.xlu0 %1990 }
 0xb01   : > { %v1996_v52 = vsel %vm1534_vm2, %v1991_v49, 0 }
 0xb02   : > { %3739 = vmatpush3.bf16.msra.mxu0 %v1996_v52 }
 0xb03   : > { %v4123_v53 = vpop.eup %4122  ;;  %3750 = vmatprep.subr.bf16.mxu0 %v4817_v30 }
 0xb04   : > { %v1986_v55 = vmul.f32 %v4123_v53, %v4119_v5  ;;  %v2104_v2 = vpop.permute.xlu0 %2103 }
 0xb06   : > { %v1988_v56 = vpack.c.bf16 %v1986_v55, %v1986_v55 }
 0xb07   : > { %v4125_v61 = vpop.eup %4124 }
 0xb08   : > { %v1987_v62 = vmul.f32 %v4125_v61, %v4121_v46  ;;  %3741 = vmatmul.mubr.msk.bf16.vlgmr.msra.gmra.mrb[16].mxu0 %vm1506_vm3, %v1988_v56 }
 0xb09   : > { %3752 = vmatprep.mubr.msk.bf16.mxu0 %vm4818_vm0, %v4817_v30 }
 0xb0a   : > { %v1989_v0 = vpack.c.bf16 %v1987_v62, %v1987_v62  ;;  %v4053_v62 = vld [vmem:[%s5490_s14] sm:$0xff]  }
 0xb0b   : > { %3751 = vmatpush3.bf16.xpose.msra.mxu0 %v2111_v10  ;;  %v4055_v10 = vld [vmem:[%s5490_s14 + $0x10] sm:$0xff]  }
 0xb0c   : > { %3747 = vmatmul.mubr.msk.bf16.vlgmr.msra.gmra.mrb[32].mxu1 %vm1506_vm3, %v1989_v0  ;;  %3762 = vmatprep.subr.bf16.mxu0 %v4817_v30  ;;  %v4056_v0 = vld [vmem:[%s5490_s14 + $0x18] sm:$0xff]  }
 0xb0d   : > { %3757 = vmatpush3.bf16.xpose.msra.mxu1 %v2161_v1  ;;  %3758 = vmatprep.mubr.msk.bf16.mxu1 %vm4818_vm0, %v4817_v30  ;;  %v4057_v1 = vld [vmem:[%s5490_s14 + $0x20] sm:$0xff]  }
 0xb0e   : > { %3768 = vmatprep.subr.bf16.mxu1 %v4817_v30 }
 0xb12   : > { %3753 = vmatmul.mubr.msk.bf16.vlgmr.msra.gmra.mrb[20].mxu0 %vm1413_vm1, %v2104_v2  ;;  %v4059_v2 = vld [vmem:[%s5490_s14 + $0x30] sm:$0xff]  }
 0xb13   : > { %3764 = vmatprep.mubr.msk.bf16.mxu0 %vm4818_vm0, %v4817_v30 }
 0xb14   : > { %3759 = vmatmul.mubr.msk.bf16.vlgmr.msra.gmra.mrb[36].mxu1 %vm1413_vm1, %v2154_v3  ;;  %v4060_v3 = vld [vmem:[%s5490_s14 + $0x38] sm:$0xff]  }
 0xb15   : > { %3770 = vmatprep.mubr.msk.bf16.mxu1 %vm4818_vm0, %v4817_v30 }
 0xbdb   : > { %v2032_v4 = vpop.f32.mrb[16].mxu0 }
 0xbdc   : > { %v3742_v6 = vpop.f32.mrb[17].mxu0  ;;  %v3569_v46 = vpack.c.bf16 %v2032_v4, %v2032_v4 }
 0xbdd   : > { %v2035_v7 = vpop.f32.mrb[18].mxu0 }
 0xbde   : > { %v3743_v8 = vpop.f32.mrb[19].mxu0 }
 0xbdf   : > { %v2080_v11 = vpop.f32.mrb[32].mxu1 }
 0xbe0   : > { %v3748_v13 = vpop.f32.mrb[33].mxu1  ;;  %v3570_v35 = vpack.c.bf16 %v2080_v11, %v2080_v11 }
 0xbe1   : > { %v2083_v15 = vpop.f32.mrb[34].mxu1 }
 0xbe2   : > { %v3749_v16 = vpop.f32.mrb[35].mxu1 }
 0xbe5   : > { %v2147_v18 = vpop.f32.mrb[20].mxu0 }
 0xbe6   : > { %v2148_v19 = vadd.f32 %v5597_v25, %v2147_v18  ;;  %v3754_v20 = vpop.f32.mrb[21].mxu0  ;;  %v3567_v25 = vpack.c.bf16 %v5676_v12, %v5676_v12 }
 0xbe7   : > { %v2150_v22 = vpop.f32.mrb[22].mxu0  ;;  %v2197_v23 = vpop.f32.mrb[36].mxu1 }
 0xbe8   : > { %v2198_v24 = vadd.f32 %v5601_v34, %v2197_v23  ;;  %v3755_v26 = vpop.f32.mrb[23].mxu0  ;;  %v3760_v27 = vpop.f32.mrb[37].mxu1  ;;  %v2203_v28 = vsel %vm1506_vm3, %v2148_v19, -inf  ;;  %v3568_v34 = vpack.c.bf16 %v5678_v17, %v5678_v17  ;;  %v3494_v23 = vld [vmem:[%s888_s15] ss:$0 sm:$0xff] }
 0xbe9   : > { %2204 = vmax.xlane.f32.xlu0 %v2203_v28  ;;  %v2200_v31 = vpop.f32.mrb[38].mxu1 }
 0xbea   : > { %v3761_v32 = vpop.f32.mrb[39].mxu1  ;;  %v2206_v33 = vsel %vm1506_vm3, %v2198_v24, -inf }
 0xbeb   : > { %2207 = vmax.xlane.f32.xlu1 %v2206_v33 }
 0xbfc   : > { %2275 = vrot.lane.b32.xlu1 %v5617_v59, %s4821_s22 }
 0xc00   : > { %1857 = vrot.lane.b32.xlu1 %v3567_v25, %s4821_s22 }
 0xc04   : > { %1859 = vrot.lane.b32.xlu1 %v3568_v34, %s4821_s22  ;;  %v4062_v34 = vld [vmem:[%s5495_s18] ss:$8 sps:$4 sm:$0xff]  }
 0xc08   : > { %2096 = vrot.lane.b32.xlu1 %v3570_v35, %s4820_s27  ;;  %v4064_v35 = vld [vmem:[%s5495_s18 + $0x4] ss:$8 sps:$4 sm:$0xff]  }
 0xc76   : > { %v2205_v36 = vpop.xlane.xlu0 %2204 }
 0xc77   : > { %v2209_v37 = vsub.f32 %v2148_v19, %v2205_v36  ;;  %v4067_v36 = vld [vmem:[%s5495_s18 + $0x14] ss:$8 sps:$4 sm:$0xff]  }
 0xc78   : > { %v2208_v38 = vpop.xlane.xlu1 %2207 }
 0xc79   : > { %v2211_v39 = vmul.f32 1.442695, %v2209_v37  ;;  %v2210_v40 = vsub.f32 %v2198_v24, %v2208_v38  ;;  %v4065_v37 = vld [vmem:[%s5495_s18 + $0x10] ss:$8 sps:$4 sm:$0xff]  }
 0xc7b   : > { %4126 = vpow2.f32 %v2211_v39  ;;  %v2213_v59 = vmul.f32 1.442695, %v2210_v40 }
 0xc7c   : > { %v2276_v41 = vpop.permute.xlu1 %2275 }
 0xc7d   : > { %4128 = vpow2.f32 %v2213_v59  ;;  %v2281_v12 = vsel %vm1534_vm2, %v2276_v41, 0 }
 0xc7e   : > { %3769 = vmatpush3.bf16.msra.mxu1 %v2281_v12 }
 0xc7f   : > { %2612 = vmatprep.subr.bf16.mxu1 %v4064_v35 }
 0xc80   : > { %v1858_v42 = vpop.permute.xlu1 %1857 }
 0xc81   : > { %1864 = vst.msk [vmem:[#allocation3] sm:$0xf] %vm1863_vm5, %v1858_v42  ;;  %v4070_v42 = vld [vmem:[%s5495_s18 + $0x24] ss:$8 sps:$4 sm:$0xff]  }
 0xc84   : > { %v1860_v17 = vpop.permute.xlu1 %1859 }
 0xc85   : > { %v4127_v43 = vpop.eup %4126  ;;  %1865 = vst.msk [vmem:[#allocation3 + $0x4] sm:$0xf] %vm1863_vm5, %v1860_v17  ;;  %v4068_v17 = vld [vmem:[%s5495_s18 + $0x20] ss:$8 sps:$4 sm:$0xff]  }
 0xc86   : > { %v2215_v44 = vsel %vm1506_vm3, %v4127_v43, 0.0 }
 0xc87   : > { %v4129_v45 = vpop.eup %4128  ;;  %2216 = vadd.xlane.f32.xlu0 %v2215_v44  ;;  %v4071_v44 = vld [vmem:[%s5495_s18 + $0x30] ss:$8 sps:$4 sm:$0xff]  }
 0xc88   : > { %v2097_v5 = vpop.permute.xlu1 %2096  ;;  %v2218_v9 = vsel %vm1506_vm3, %v4129_v45, 0.0 }
 0xc89   : > { %2102 = vst.msk [vmem:[#allocation3 + $0x4] sm:$0xf] %vm2100_vm6, %v2097_v5  ;;  %v4074_v5 = vld [vmem:[%s5495_s18 + $0x40] ss:$8 sps:$4 sm:$0xff]  }
 0xc8b   : > { %2219 = vadd.xlane.f32.xlu0 %v2218_v9  ;;  %v4079_v9 = vld [vmem:[%s5495_s18 + $0x54] ss:$8 sps:$4 sm:$0xff]  }
 0xca1   : > { %2227 = vrot.lane.b32.xlu0 %v5592_v21, %s4821_s22 }
 0xca5   : > { %2094 = vrot.lane.b32.xlu0 %v3569_v46, %s4820_s27  ;;  %v4077_v46 = vld [vmem:[%s5495_s18 + $0x50] ss:$8 sps:$4 sm:$0xff]  }
 0xd14   : > { %v2217_v14 = vpop.xlane.xlu0 %2216 }
 0xd15   : > { %4130 = vrcp.f32 %v2217_v14  ;;  %v4082_v14 = vld [vmem:[%s5495_s18 + $0x64] ss:$8 sps:$4 sm:$0xff]  }
 0xd18   : > { %v2220_v47 = vpop.xlane.xlu0 %2219 }
 0xd19   : > { %4132 = vrcp.f32 %v2220_v47  ;;  %v4080_v47 = vld [vmem:[%s5495_s18 + $0x60] ss:$8 sps:$4 sm:$0xff]  }
 0xd1c   : > { %v2228_v48 = vpop.permute.xlu0 %2227 }
 0xd1d   : > { %v2233_v49 = vsel %vm1534_vm2, %v2228_v48, 0  ;;  %v4085_v48 = vld [vmem:[%s5495_s18 + $0x74] ss:$8 sps:$4 sm:$0xff]  }
 0xd1e   : > { %3763 = vmatpush3.bf16.msra.mxu0 %v2233_v49  ;;  %v4083_v49 = vld [vmem:[%s5495_s18 + $0x70] ss:$8 sps:$4 sm:$0xff]  }
 0xd1f   : > { %v4131_v52 = vpop.eup %4130  ;;  %3774 = vmatprep.subr.bf16.mxu0 %v4817_v30 }
 0xd20   : > { %v2223_v53 = vmul.f32 %v4131_v52, %v4127_v43  ;;  %v2095_v54 = vpop.permute.xlu0 %2094  ;;  %v4073_v43 = vld [vmem:[%s5495_s18 + $0x34] ss:$8 sps:$4 sm:$0xff]  }
 0xd21   : > { %2101 = vst.msk [vmem:[#allocation3] sm:$0xf] %vm2100_vm6, %v2095_v54 }
 0xd22   : > { %v2225_v21 = vpack.c.bf16 %v2223_v53, %v2223_v53 }
 0xd23   : > { %v4133_v55 = vpop.eup %4132 }
 0xd24   : > { %v2224_v56 = vmul.f32 %v4133_v55, %v4129_v45  ;;  %3765 = vmatmul.mubr.msk.bf16.vlgmr.msra.gmra.mrb[24].mxu0 %vm1506_vm3, %v2225_v21  ;;  %v4076_v45 = vld [vmem:[%s5495_s18 + $0x44] ss:$8 sps:$4 sm:$0xff]  }
 0xd25   : > { %3790 = vmatprep.mubr.msk.bf16.mxu0 %vm4818_vm0, %v4817_v30  ;;  %3775 = vmatpush3.bf16.msra.mxu0 %v4053_v62 }
 0xd26   : > { %v2226_v61 = vpack.c.bf16 %v2224_v56, %v2224_v56  ;;  %3776 = vmatprep.subr.bf16.mxu0 %v4817_v30 }
 0xd28   : > { %3771 = vmatmul.mubr.msk.bf16.vlgmr.msra.gmra.mrb[40].mxu1 %vm1506_vm3, %v2226_v61 }
 0xd29   : > { %2644 = vmatprep.mubr.bf16.mxu1 %v4816_v29  ;;  %3777 = vmatpush3.bf16.msra.mxu0 %v4054_v63  ;;  %v4058_v29 = vld [vmem:[%s5490_s14 + $0x28] sm:$0xff]   ;;  %v3504_v63 = vld [vmem:[%s896_s25] ss:$0 sm:$0xff] }
 0xd2a   : > { %3778 = vmatprep.subr.bf16.mxu0 %v4817_v30  ;;  %2613 = vmatpush1.bf16.msra.mxu1 %v4062_v34 }
 0xd2b   : > { %2614 = vmatprep.subr.bf16.mxu1 %v4067_v36 }
 0xd2d   : > { %3779 = vmatpush3.bf16.msra.mxu0 %v4055_v10 }
 0xd2e   : > { %3780 = vmatprep.subr.bf16.mxu0 %v4817_v30  ;;  %2615 = vmatpush1.bf16.msra.mxu1 %v4065_v37 }
 0xd2f   : > { %2616 = vmatprep.subr.bf16.mxu1 %v4070_v42 }
 0xd31   : > { %3781 = vmatpush3.bf16.msra.mxu0 %v4056_v0 }
 0xd32   : > { %3782 = vmatprep.subr.bf16.mxu0 %v4817_v30  ;;  %2617 = vmatpush1.bf16.msra.mxu1 %v4068_v17 }
 0xd33   : > { %2618 = vmatprep.subr.bf16.mxu1 %v4073_v43 }
 0xd35   : > { %3783 = vmatpush3.bf16.msra.mxu0 %v4057_v1 }
 0xd36   : > { %3784 = vmatprep.subr.bf16.mxu0 %v4817_v30  ;;  %2619 = vmatpush1.bf16.msra.mxu1 %v4071_v44 }
 0xd37   : > { %2620 = vmatprep.subr.bf16.mxu1 %v4076_v45 }
 0xd39   : > { %3785 = vmatpush3.bf16.msra.mxu0 %v4058_v29  ;;  %v3505_v29 = vld [vmem:[%s904_s21] ss:$0 sm:$0xff] }
 0xd3a   : > { %3786 = vmatprep.subr.bf16.mxu0 %v4817_v30  ;;  %2621 = vmatpush1.bf16.msra.mxu1 %v4074_v5 }
 0xd3b   : > { %2622 = vmatprep.subr.bf16.mxu1 %v4079_v9 }
 0xd3d   : > { %3787 = vmatpush3.bf16.msra.mxu0 %v4059_v2 }
 0xd3e   : > { %3788 = vmatprep.subr.bf16.mxu0 %v4817_v30  ;;  %2623 = vmatpush1.bf16.msra.mxu1 %v4077_v46 }
 0xd3f   : > { %2624 = vmatprep.subr.bf16.mxu1 %v4082_v14 }
 0xd41   : > { %3789 = vmatpush3.bf16.msra.mxu0 %v4060_v3 }
 0xd42   : > { %2625 = vmatpush1.bf16.msra.mxu1 %v4080_v47 }
 0xd43   : > { %2626 = vmatprep.subr.bf16.mxu1 %v4085_v48 }
 0xd46   : > { %2627 = vmatpush1.bf16.msra.mxu1 %v4083_v49 }
 0xdf7   : > { %v2269_v4 = vpop.f32.mrb[24].mxu0 }
 0xdf8   : > { %v3571_v6 = vpack.c.bf16 %v2269_v4, %v2269_v4  ;;  %v3766_v7 = vpop.f32.mrb[25].mxu0 }
 0xdf9   : > { %v2272_v8 = vpop.f32.mrb[26].mxu0  ;;  %v4086_v7 = vld [vmem:[%s5499_s4 + $0x40] sm:$0xff]  }
 0xdfa   : > { %2331 = vrot.lane.b32.xlu0 %v3571_v6, %s4819_s16  ;;  %v3767_v11 = vpop.f32.mrb[27].mxu0  ;;  %v4087_v8 = vld [vmem:[%s5499_s4] sm:$0xff]   ;;  %3627 = vmatprep.subr.bf16.mxu0 %v4086_v7 }
 0xdfb   : > { %v2317_v13 = vpop.f32.mrb[40].mxu1  ;;  %v4088_v11 = vld [vmem:[%s5499_s4 + $0x48] sm:$0xff]  }
 0xdfc   : > { %v3572_v15 = vpack.c.bf16 %v2317_v13, %v2317_v13  ;;  %v3772_v16 = vpop.f32.mrb[41].mxu1  ;;  %v4089_v13 = vld [vmem:[%s5499_s4 + $0x8] sm:$0xff]  }
 0xdfd   : > { %v2320_v18 = vpop.f32.mrb[42].mxu1  ;;  %v4091_v16 = vld [vmem:[%s5499_s4 + $0x10] sm:$0xff]  }
 0xdfe   : > { %2333 = vrot.lane.b32.xlu1 %v3572_v15, %s4819_s16  ;;  %v3773_v19 = vpop.f32.mrb[43].mxu1  ;;  %v4090_v15 = vld [vmem:[%s5499_s4 + $0x50] sm:$0xff]   ;;  %v4092_v18 = vld [vmem:[%s5499_s4 + $0x58] sm:$0xff]  }
 0xdff   : > { %v4093_v19 = vld [vmem:[%s5499_s4 + $0x18] sm:$0xff]  }
 0xe6c   : > { %v2332_v20 = vpop.permute.xlu0 %2331 }
 0xe6d   : > { %2338 = vst.msk [vmem:[#allocation3] sm:$0xf] %vm2337_vm7, %v2332_v20  ;;  %v4094_v20 = vld [vmem:[%s5499_s4 + $0x60] sm:$0xff]  }
 0xe70   : > { %v2334_v30 = vpop.permute.xlu1 %2333 }
 0xe71   : > { %2339 = vst.msk [vmem:[#allocation3 + $0x4] sm:$0xf] %vm2337_vm7, %v2334_v30  ;;  %v4095_v30 = vld [vmem:[%s5499_s4 + $0x20] sm:$0xff]  }
 0xe78   : > { %v4061_v22 = vld [vmem:[#allocation3] sm:$0xff]  }
 0xe79   : > { %3791 = vmatmul.mubr.bf16.vlgmr.msra.gmra.mrb[28].mxu0 %v4061_v22  ;;  %v4096_v22 = vld [vmem:[%s5499_s4 + $0x68] sm:$0xff]  }
 0xe7a   : > { %3628 = vmatpush3.bf16.msra.mxu0 %v4087_v8 }
 0xe7b   : > { %3629 = vmatprep.subr.bf16.mxu0 %v4088_v11 }
 0xe7e   : > { %3630 = vmatpush3.bf16.msra.mxu0 %v4089_v13 }
 0xe7f   : > { %3631 = vmatprep.subr.bf16.mxu0 %v4090_v15 }
 0xe82   : > { %3632 = vmatpush3.bf16.msra.mxu0 %v4091_v16  ;;  %v3522_v16 = vld [vmem:[%s939_s26] ss:$0 sm:$0xff] }
 0xe83   : > { %3633 = vmatprep.subr.bf16.mxu0 %v4092_v18 }
 0xe86   : > { %3634 = vmatpush3.bf16.msra.mxu0 %v4093_v19 }
 0xe87   : > { %3635 = vmatprep.subr.bf16.mxu0 %v4094_v20 }
 0xe8a   : > { %3636 = vmatpush3.bf16.msra.mxu0 %v4095_v30 }
 0xe8b   : > { %3637 = vmatprep.subr.bf16.mxu0 %v4096_v22 }
 0xf4c   : > { %v2453_v24 = vpop.f32.mrb[28].mxu0 }
 0xf4d   : > { %v2454_v26 = vadd.f32 %v3494_v23, %v2453_v24  ;;  %v3792_v27 = vpop.f32.mrb[29].mxu0  ;;  %v4098_v24 = vld [vmem:[%s5499_s4 + $0x70] sm:$0xff]  }
 0xf4e   : > { %v2456_v28 = vpop.f32.mrb[30].mxu0  ;;  %v4100_v27 = vld [vmem:[%s5499_s4 + $0x78] sm:$0xff]  }
 0xf4f   : > { %v2457_v31 = vadd.f32 %v3494_v23, %v2456_v28  ;;  %v3793_v32 = vpop.f32.mrb[31].mxu0  ;;  %v2460_v33 = vadd.f32 %v2454_v26, %v5539_v50  ;;  %v4097_v23 = vld [vmem:[%s5499_s4 + $0x28] sm:$0xff]   ;;  %v4099_v26 = vld [vmem:[%s5499_s4 + $0x30] sm:$0xff]   ;;  %v4101_v28 = vld [vmem:[%s5499_s4 + $0x38] sm:$0xff]  }
 0xf50   : > { %3638 = vmatpush3.bf16.msra.mxu0 %v4097_v23 }
 0xf51   : > { %2464 = vadd.xlane.f32.xlu0 %v2460_v33  ;;  %v2461_v25 = vadd.f32 %v2457_v31, %v5541_v51  ;;  %3639 = vmatprep.subr.bf16.mxu0 %v4098_v24  ;;  %v2520_v31 = vld [vmem:[%s5497_s29] sm:$0x3] }
 0xf52   : > { %v2525_v32 = vrot.slane %v2520_v31, %v1154_v60 }
 0xf53   : > { %2466 = vadd.xlane.f32.xlu1 %v2461_v25 }
 0xf54   : > { %3640 = vmatpush3.bf16.msra.mxu0 %v4099_v26 }
 0xf55   : > { %3641 = vmatprep.subr.bf16.mxu0 %v4100_v27 }
 0xf58   : > { %3642 = vmatpush3.bf16.msra.mxu0 %v4101_v28 }
 0xfde   : > { %v2465_v38 = vpop.xlane.xlu0 %2464 }
 0xfdf   : > { %v2469_v39 = vmul.f32 0.0078125, %v2465_v38 }
 0xfe0   : > { %v2467_v40 = vpop.xlane.xlu1 %2466 }
 0xfe1   : > { %v2471_v50 = vsub.f32 %v2460_v33, %v2469_v39  ;;  %v2470_v51 = vmul.f32 0.0078125, %v2467_v40  ;;  %v2529_v33 = vrot.slane %v2520_v31, %v1158_v58 }
 0xfe3   : > { %v2472_v59 = vsub.f32 %v2461_v25, %v2470_v51  ;;  %v2473_v41 = vmul.f32 %v2471_v50, %v2471_v50 }
 0xfe5   : > { %2475 = vadd.xlane.f32.xlu0 %v2473_v41  ;;  %v2474_v12 = vmul.f32 %v2472_v59, %v2472_v59 }
 0xfe9   : > { %2477 = vadd.xlane.f32.xlu0 %v2474_v12 }
0x1072   : > { %v2476_v52 = vpop.xlane.xlu0 %2475 }
0x1073   : > { %v2479_v53 = vmul.f32 0.0078125, %v2476_v52 }
0x1075   : > { %v2481_v54 = vadd.f32 1e-12, %v2479_v53 }
0x1076   : > { %v2478_v21 = vpop.xlane.xlu0 %2477 }
0x1077   : > { %4134 = vrsqrt.f32 %v2481_v54  ;;  %v2480_v55 = vmul.f32 0.0078125, %v2478_v21 }
0x1079   : > { %v2482_v56 = vadd.f32 1e-12, %v2480_v55 }
0x107b   : > { %4136 = vrsqrt.f32 %v2482_v56 }
0x1081   : > { %v4135_v61 = vpop.eup %4134 }
0x1082   : > { %v2485_v62 = vmul.f32 %v4135_v61, %v2471_v50 }
0x1084   : > { %v2493_v1 = vmul.f32 %v3504_v63, %v2485_v62 }
0x1085   : > { %v4137_v10 = vpop.eup %4136 }
0x1086   : > { %v2486_v0 = vmul.f32 %v4137_v10, %v2472_v59  ;;  %v5787_v3 = vadd.f32 %v3505_v29, %v2493_v1 }
0x1088   : > { %v2494_v2 = vmul.f32 %v3504_v63, %v2486_v0 }
0x108a   : > { %v5789_v4 = vadd.f32 %v3505_v29, %v2494_v2 }
0x108c   : > { %v2503_v6 = vpack.c.bf16 %v5789_v4, %v5787_v3 }
0x108e   : > { %2645 = vmatmul.mubr.bf16.vlgmr.msra.gmra.mrb[44].mxu1 %v2503_v6 }
0x1161   : > { %v2646_v25 = vpop.f32.mrb[44].mxu1 }
0x1162   : > { %v2647_v34 = vadd.f32 %v2646_v25, %v2525_v32  ;;  %v2648_v35 = vpop.f32.mrb[45].mxu1 }
0x1163   : > { %v2649_v36 = vadd.f32 %v2648_v35, %v2529_v33  ;;  %v2650_v37 = vpop.f32.mrb[46].mxu1 }
0x1164   : > { %v2659_v38 = vmul.f32 0.044715, %v2647_v34  ;;  %v2651_v39 = vadd.f32 %v2650_v37, %v2525_v32  ;;  %v2652_v40 = vpop.f32.mrb[47].mxu1  ;;  %v2655_v62 = vmul.f32 0.5, %v2647_v34 }
0x1165   : > { %v2660_v50 = vmul.f32 0.044715, %v2649_v36  ;;  %v2653_v51 = vadd.f32 %v2652_v40, %v2529_v33  ;;  %v2656_v0 = vmul.f32 0.5, %v2649_v36 }
0x1166   : > { %v2663_v59 = vmul.f32 %v2659_v38, %v2647_v34  ;;  %v2661_v41 = vmul.f32 0.044715, %v2651_v39  ;;  %v2657_v63 = vmul.f32 0.5, %v2651_v39 }
0x1167   : > { %v2664_v12 = vmul.f32 %v2660_v50, %v2649_v36  ;;  %v2662_v42 = vmul.f32 0.044715, %v2653_v51  ;;  %v2658_v1 = vmul.f32 0.5, %v2653_v51 }
0x1168   : > { %v2667_v17 = vmul.f32 %v2663_v59, %v2647_v34  ;;  %v2665_v43 = vmul.f32 %v2661_v41, %v2651_v39 }
0x1169   : > { %v2668_v60 = vmul.f32 %v2664_v12, %v2649_v36  ;;  %v2666_v44 = vmul.f32 %v2662_v42, %v2653_v51  ;;  %v3540_v12 = vld [vmem:[%s955_s8] ss:$0 sm:$0xff] }
0x116a   : > { %v2671_v45 = vadd.f32 %v2667_v17, %v2647_v34  ;;  %v2669_v58 = vmul.f32 %v2665_v43, %v2651_v39 }
0x116b   : > { %v2670_v5 = vmul.f32 %v2666_v44, %v2653_v51  ;;  %v2672_v9 = vadd.f32 %v2668_v60, %v2649_v36 }
0x116c   : > { %v2675_v46 = vmul.f32 0.7978846, %v2671_v45  ;;  %v2673_v14 = vadd.f32 %v2669_v58, %v2651_v39  ;;  %v4150_v45 = vld [vmem:[#allocation24] sm:$0xff] (!%p3541_p11)   ;;  %v4822_v58 = vmov (!%p3541_p11), 0.0  }
0x116d   : > { %v2674_v47 = vadd.f32 %v2670_v5, %v2653_v51  ;;  %v2676_v48 = vmul.f32 0.7978846, %v2672_v9  ;;  %v3539_v51 = vld [vmem:[%s947_s30] ss:$0 sm:$0xff]  ;;  %3794 = vmatprep.subr.bf16.mxu0 (!%p3541_p11), %v4822_v58  ;;  %v4151_v5 = vld [vmem:[#allocation24 + $0x8] sm:$0xff] (!%p3541_p11)   ;;  %v4152_v9 = vld [vmem:[#allocation24 + $0x10] sm:$0xff] (!%p3541_p11)  }
0x116e   : > { %4138 = vtanh.f32 %v2675_v46  ;;  %v2677_v49 = vmul.f32 0.7978846, %v2673_v14  ;;  %v4153_v46 = vld [vmem:[#allocation24 + $0x18] sm:$0xff] (!%p3541_p11)   ;;  %v4154_v14 = vld [vmem:[#allocation24 + $0x20] sm:$0xff] (!%p3541_p11)  }
0x116f   : > { %v2678_v52 = vmul.f32 0.7978846, %v2674_v47  ;;  %4140 = vtanh.f32 %v2676_v48  ;;  %v4155_v47 = vld [vmem:[#allocation24 + $0x28] sm:$0xff] (!%p3541_p11)   ;;  %v4156_v48 = vld [vmem:[#allocation24 + $0x30] sm:$0xff] (!%p3541_p11)  }
0x1170   : > { %4142 = vtanh.f32 %v2677_v49 }
0x1171   : > { %4144 = vtanh.f32 %v2678_v52  ;;  %v4157_v52 = vld [vmem:[#allocation24 + $0x38] sm:$0xff] (!%p3541_p11)  }
0x1178   : > { %v4139_v53 = vpop.eup %4138 }
0x1179   : > { %v4141_v54 = vpop.eup %4140  ;;  %v2683_v21 = vadd.f32 1.0, %v4139_v53 }
0x117a   : > { %v4143_v55 = vpop.eup %4142  ;;  %v2684_v56 = vadd.f32 1.0, %v4141_v54 }
0x117b   : > { %v4145_v61 = vpop.eup %4144  ;;  %v2685_v10 = vadd.f32 1.0, %v4143_v55  ;;  %v2687_v2 = vmul.f32 %v2683_v21, %v2655_v62  ;;  %v3542_v21 = vld [vmem:[#allocation25] ss:$0 sm:$0xff] (!%p3541_p11)  ;;  %v4824_v62 = vmov (!%p3541_p11), 1966171168  }
0x117c   : > { %v2686_v29 = vadd.f32 1.0, %v4145_v61  ;;  %v2688_v7 = vmul.f32 %v2684_v56, %v2656_v0 }
0x117d   : > { %v2689_v6 = vmul.f32 %v2685_v10, %v2657_v63  ;;  %v3037_v63 = vunpack.c.l.s4 (!%p3541_p11), %v4824_v62 }
0x117e   : > { %v2690_v8 = vmul.f32 %v2686_v29, %v2658_v1 }
0x117f   : > { %v2691_v11 = vpack.c.bf16 %v2689_v6, %v2687_v2  ;;  %v3038_v1 = vunpack.c.0.s8 (!%p3541_p11), %v3037_v63 }
0x1180   : > { %v2692_v13 = vpack.c.bf16 %v2690_v8, %v2688_v7 }
0x1181   : > { %v3041_v29 = vsub.s32 (!%p3541_p11), %v3038_v1, %v5560_v57 }
0x1182   : > { %2860 = vmatprep.mubr.bf16.mxu0 %v2692_v13 }
0x1183   : > { %2861 = vmatmul.mubr.bf16.vlgmr.msra.gmra.mrb[32].mxu0 %v2691_v11 }
0x1184   : > { %3795 = vmatpush3.bf16.msra.mxu0 (!%p3541_p11), %v4150_v45  ;;  %3810 = vmatprep.mubr.msk.bf16.mxu0 (!%p3541_p11), %vm4823_vm8, %v4822_v58 }
0x1185   : > { %3796 = vmatprep.subr.bf16.mxu0 (!%p3541_p11), %v4822_v58 }
0x1188   : > { %3797 = vmatpush3.bf16.msra.mxu0 (!%p3541_p11), %v4151_v5 }
0x1189   : > { %3798 = vmatprep.subr.bf16.mxu0 (!%p3541_p11), %v4822_v58 }
0x118c   : > { %3799 = vmatpush3.bf16.msra.mxu0 (!%p3541_p11), %v4152_v9 }
0x118d   : > { %3800 = vmatprep.subr.bf16.mxu0 (!%p3541_p11), %v4822_v58 }
0x1190   : > { %3801 = vmatpush3.bf16.msra.mxu0 (!%p3541_p11), %v4153_v46 }
0x1191   : > { %3802 = vmatprep.subr.bf16.mxu0 (!%p3541_p11), %v4822_v58 }
0x1194   : > { %3803 = vmatpush3.bf16.msra.mxu0 (!%p3541_p11), %v4154_v14 }
0x1195   : > { %3804 = vmatprep.subr.bf16.mxu0 (!%p3541_p11), %v4822_v58 }
0x1198   : > { %3805 = vmatpush3.bf16.msra.mxu0 (!%p3541_p11), %v4155_v47 }
0x1199   : > { %3806 = vmatprep.subr.bf16.mxu0 (!%p3541_p11), %v4822_v58 }
0x119c   : > { %3807 = vmatpush3.bf16.msra.mxu0 (!%p3541_p11), %v4156_v48 }
0x119d   : > { %3808 = vmatprep.subr.bf16.mxu0 (!%p3541_p11), %v4822_v58 }
0x11a0   : > { %3809 = vmatpush3.bf16.msra.mxu0 (!%p3541_p11), %v4157_v52 }
0x1256   : > { %v3643_v15 = vpop.f32.mrb[32].mxu0 }
0x1257   : > { %v3644_v18 = vpop.f32.mrb[33].mxu0 }
0x1258   : > { %v3645_v19 = vadd.f32 %v3644_v18, %v3643_v15  ;;  %v3646_v20 = vpop.f32.mrb[34].mxu0 }
0x1259   : > { %v3647_v30 = vpop.f32.mrb[35].mxu0 }
0x125a   : > { %v2863_v22 = vadd.f32 %v3645_v19, %v3522_v16  ;;  %v3648_v23 = vadd.f32 %v3647_v30, %v3646_v20 }
0x125c   : > { %v2866_v24 = vadd.f32 %v3648_v23, %v3522_v16  ;;  %v2869_v26 = vadd.f32 %v2863_v22, %v5787_v3 }
0x125e   : > { %2873 = vadd.xlane.f32.xlu0 %v2869_v26  ;;  %v2870_v27 = vadd.f32 %v2866_v24, %v5789_v4 }
0x1260   : > { %2875 = vadd.xlane.f32.xlu1 %v2870_v27 }
0x12eb   : > { %v2874_v28 = vpop.xlane.xlu0 %2873 }
0x12ec   : > { %v2877_v31 = vmul.f32 0.0078125, %v2874_v28 }
0x12ed   : > { %v2876_v32 = vpop.xlane.xlu1 %2875 }
0x12ee   : > { %v2879_v33 = vsub.f32 %v2869_v26, %v2877_v31  ;;  %v2878_v25 = vmul.f32 0.0078125, %v2876_v32 }
0x12f0   : > { %v2880_v34 = vsub.f32 %v2870_v27, %v2878_v25  ;;  %v2881_v35 = vmul.f32 %v2879_v33, %v2879_v33 }
0x12f2   : > { %2883 = vadd.xlane.f32.xlu0 %v2881_v35  ;;  %v2882_v36 = vmul.f32 %v2880_v34, %v2880_v34 }
0x12f4   : > { %2885 = vadd.xlane.f32.xlu1 %v2882_v36 }
0x137f   : > { %v2884_v37 = vpop.xlane.xlu0 %2883 }
0x1380   : > { %v2887_v38 = vmul.f32 0.0078125, %v2884_v37 }
0x1381   : > { %v2886_v39 = vpop.xlane.xlu1 %2885 }
0x1382   : > { %v2889_v3 = vadd.f32 1e-12, %v2887_v38  ;;  %v2888_v40 = vmul.f32 0.0078125, %v2886_v39 }
0x1384   : > { %4146 = vrsqrt.f32 %v2889_v3  ;;  %v2890_v4 = vadd.f32 1e-12, %v2888_v40 }
0x1386   : > { %4148 = vrsqrt.f32 %v2890_v4 }
0x138e   : > { %v4147_v50 = vpop.eup %4146 }
0x138f   : > { %v2893_v59 = vmul.f32 %v4147_v50, %v2879_v33 }
0x1390   : > { %v4149_v41 = vpop.eup %4148 }
0x1391   : > { %v2901_v42 = vmul.f32 %v3539_v51, %v2893_v59  ;;  %v2894_v17 = vmul.f32 %v4149_v41, %v2880_v34  ;;  %2916 = sbr.rel (%p3541_p11) target bundleno = 5250 (0x1482), region = 172 }
0x1393   : > { %v2909_v43 = vadd.f32 %v3540_v12, %v2901_v42  ;;  %v2902_v60 = vmul.f32 %v3539_v51, %v2894_v17 }
0x1395   : > { %2911 = vst [vmem:[#allocation2] sm:$0xff] %v2909_v43  ;;  %v2910_v44 = vadd.f32 %v3540_v12, %v2902_v60 }
0x1397   : > { %2912 = vst [vmem:[#allocation2 + $0x8] sm:$0xff] %v2910_v44  ;;  %v2918_v49 = vrot.slane (!%p3541_p11), %v2910_v44, 7 }
0x1399   : > { %v2921_v53 = vsel %vm2920_vm9, %v2909_v43, %v2918_v49 }
0x139a   : > { %v2922_v54 = vpack.c.bf16 %v2921_v53, %v2921_v53 }
0x139c   : > { %3811 = vmatmul.mubr.bf16.vlgmr.msra.gmra.mrb[0].mxu0 %v2922_v54 }
0x146f   : > { %v3028_v55 = vpop.f32.mrb[0].mxu0 }
0x1470   : > { %v3029_v56 = vadd.f32 %v3542_v21, %v3028_v55  ;;  %v3812_v61 = vpop.f32.mrb[1].mxu0 }
0x1471   : > { %v3031_v10 = vpop.f32.mrb[2].mxu0 }
0x1472   : > { %4158 = vtanh.f32 %v3029_v56  ;;  %v3813_v0 = vpop.f32.mrb[3].mxu0 }
0x147c   : > { %v4159_v2 = vpop.eup %4158 }
0x147d   : > { %v3042_v6 = vrot.slane %v4159_v2, %v3041_v29 }
0x147f   : > { %v3043_v7 = vcombine.high %v3042_v6, %v3042_v6  ;;  %3551 = vst.sshfl [vmem:[#allocation26] sm:$0x1 pattern:$0x73625140] %v3042_v6 }
0x1481   : > { %3552 = vst.sshfl [vmem:[#allocation26 + $0x1] sm:$0x1 pattern:$0x73625140] %v3043_v7 }
0x1482 PF: > { %s6017_s6 = sld [smem:[#allocation37_spill]]  ;;  %s4825_s13 = smov [#allocation26]  }
0x1483   : > { %s3071_s24 = sshll.u32 %s4825_s13, 4  ;;  %s3072_s24 = int_to_ptr.vmem [resolvable:$true] %s3071_s24 }
0x1484   : > { %s4688_s7 = scalar_lea.vmem %s3072_s24, 32  ;;  %p4695_p1 = scmp.lt.s32.totalorder %s3072_s24, %s3072_s24 }
0x1485   : > { %p4689_p7 = scmp.ne.s32.totalorder %s3072_s24, %s4688_s7  ;;  %p4696_p12 = scmp.lt.s32.totalorder %s4688_s7, %s4688_s7 }
0x1487   : > { %p4697_p6 = por %p4696_p12, %p4695_p1 }
0x1488   : > { %p3941_p8 = scmp.eq.s32.totalorder %s6017_s6, 1 }
0x148a   : > { %p4690_p5 = pnand %p4689_p7, %p3941_p8 }
0x148c   : > { %p4691_p2 = pneg %p4690_p5 }
0x148e   : > { %p4698_p13 = pnand %p4697_p6, %p4691_p2 }
0x1490   : > { %4701 = shalt.err (!%p4698_p13)
}
0x1491   : > { %s6018_s15 = sld [smem:[#allocation57_spill]] }
0x1497   : > { %s4702_s25 = scalar_lea.hbm %s6018_s15, 32 }
0x1498   : > { %p4703_p4 = scmp.ne.s32.totalorder %s6018_s15, %s4702_s25  ;;  %p4708_p0 = scmp.lt.u32.totalorder %s4702_s25, %s6018_s15 }
0x149a   : > { %p4704_p3 = pnand %p4703_p4, %p3941_p8 }
0x149c   : > { %p4705_p10 = pneg %p4704_p3 }
0x149e   : > { %p4710_p9 = pnand %p4708_p0, %p4705_p10 }
0x14a0   : > { %4713 = shalt.err (!%p4710_p9)
}
0x14a1   : > { %s4826_s26 = smov 16   ;;  %s4827_s30 = smov 1  }
0x14a2   : > { %3869 = dma.vmem_to_hbm [thread:$0]  (%p3941_p8), %s3072_s24, 32, %s6018_s15, [#allocation6], %s4826_s26, %s4826_s26, %s4827_s30  }
0x14a3   : > { %4763 = dma.done.wait (%p3941_p8), [#allocation6], 32  }
0x14a4   : > { %4765 = vsyncadd (%p3941_p8), [#allocation6], 4294967264 }
0x14a5 PF: > { %s32_s19 = sadd.s32 1, %s4788_s19   ;;  %s6019_s27 = sld [smem:[#allocation34_spill]] }
0x14a6   : > { %p29_p11 = scmp.ge.s32.totalorder %s32_s19, 4   ;;  %s6020_s28 = sld [smem:[#allocation35_spill]] }
0x14a7   : > { %s6021_s29 = sld [smem:[#allocation42_spill]]  ;;  %s6022_s16 = sld [smem:[#allocation41_spill]] }
0x14a8   : > { %s6023_s30 = smov %s4784_s0  ;;  %31 = sbr.rel (!%p29_p11) target bundleno = 22 (0x16), region = 284 }
0x14ad   : > { %s6024_s0 = smov %s6022_s16 }
0x14af   :  { %3087 = vsyncpa [#allocation5], 1 }
0x14b0   :  { %3089 = vsyncpa [#allocation5 + $0x1], 1 }
0x14b1   :  { %3090 = vsyncpa [#allocation8], 1 }
0x14b2   :  { %3091 = vsyncpa [#allocation11], 1 }
0x14b3   :  { %3092 = vsyncpa [#allocation6], 1 }
0x14b4   :  { %3094 = vsyncpa [#allocation6 + $0x1], 1 }

</bundles_post_ra>
